<compile_context>
chip_gen: v7x
topology: tpu7x:2x2x1
jax: 0.10.0
libtpu: 0.0.40
codegen_flags: <defaults>
</compile_context>

<pallas_src>
import functools

import jax
import jax.numpy as jnp
from jax.experimental import pallas as pl
from jax.experimental.pallas import tpu as pltpu

IN_DIM = 96 + 63      # 159
PAD_DIM = 256         # 159 padded up to a lane-aligned width
WIDTH = 256
OUT_DIM = 1
DEPTH = 4


# ----------------------------------------------------------------------------- kernel
def mlp_kernel(x_ref,
               # stage_one params, PyTorch layout W:(out,in) padded, b:(out,1)
               w10, b10, w11, b11, w12, b12, w13, b13,
               # stage_two params; last layer is a (1,256) row with (1,1) f32 bias
               w20, b20, w21, b21, w22, b22, w23, b23,
               o_ref, *, elem_dtype):
    x = x_ref[...]                                    # (PAD_DIM, tile_n) bf16, padded rows are 0

    def linear(h, w_ref, b_ref, relu=True):
        # bf16 operands on the MXU, f32 accumulation; bias + ReLU in `elem_dtype`
        # (bf16 on v6e/v7x, f32 on v5e) on the VPU.
        acc = jnp.dot(w_ref[...], h.astype(jnp.bfloat16),
                      preferred_element_type=jnp.float32)
        y = acc.astype(elem_dtype) + b_ref[...]
        return jnp.maximum(y, 0.0) if relu else y

    # stage_one (ReLU after every layer, including the last)
    h = linear(x, w10, b10)
    h = linear(h, w11, b11)
    h = linear(h, w12, b12)
    h = linear(h, w13, b13)          # (PAD_DIM, tile_n); padded rows stay 0 through ReLU

    # residual; padded rows remain exactly 0
    y = x.astype(elem_dtype) + h
    y = linear(y, w20, b20)
    y = linear(y, w21, b21)
    y = linear(y, w22, b22)

    # Final 256 -> 1 layer: (1,256) @ (256,tile_n) = (1,tile_n), lane-dense, no transpose.
    out = jnp.dot(w23[...], y.astype(jnp.bfloat16),
                  preferred_element_type=jnp.float32) + b23[...]
    o_ref[...] = out.astype(o_ref.dtype)


# ----------------------------------------------------------------------------- params
def init_params(key):
    """Deterministic PyTorch-style Linear init: U(-1/sqrt(fan_in), 1/sqrt(fan_in)).

    Weights in PyTorch layout (out_features, in_features); biases (out_features,). All f32.
    """
    dims_one = [(IN_DIM, WIDTH), (WIDTH, WIDTH), (WIDTH, WIDTH), (WIDTH, IN_DIM)]
    dims_two = [(IN_DIM, WIDTH), (WIDTH, WIDTH), (WIDTH, WIDTH), (WIDTH, OUT_DIM)]
    params = []
    for fan_in, fan_out in dims_one + dims_two:
        key, kw, kb = jax.random.split(key, 3)
        bound = float(fan_in) ** -0.5
        w = jax.random.uniform(kw, (fan_out, fan_in), jnp.float32, -bound, bound)
        b = jax.random.uniform(kb, (fan_out,), jnp.float32, -bound, bound)
        params += [w, b]
    return params


def _prep_params(params, elem_dtype):
    """Pad the ragged 159 dims to 256 with zeros, cast weights to bf16, biases to (out,1)."""
    (w10, b10, w11, b11, w12, b12, w13, b13,
     w20, b20, w21, b21, w22, b22, w23, b23) = params
    pad_f = PAD_DIM - IN_DIM

    def w_bf16(w, pad_rows=0, pad_cols=0):
        return jnp.pad(w, ((0, pad_rows), (0, pad_cols))).astype(jnp.bfloat16)

    def b_col(b, pad_rows=0):
        return jnp.pad(b, ((0, pad_rows),)).reshape(-1, 1).astype(elem_dtype)

    return [
        w_bf16(w10, 0, pad_f), b_col(b10),           # zero K cols for padded input features
        w_bf16(w11), b_col(b11),
        w_bf16(w12), b_col(b12),
        w_bf16(w13, pad_f, 0), b_col(b13, pad_f),    # zero output rows + bias entries
        w_bf16(w20, 0, pad_f), b_col(b20),
        w_bf16(w21), b_col(b21),
        w_bf16(w22), b_col(b22),
        w_bf16(w23), b23.reshape(1, 1).astype(jnp.float32),   # (1,256) row; final bias in f32
    ]


# ----------------------------------------------------------------------------- wrapper
def _round_up(a, m):
    return (a + m - 1) // m * m


def _chip_config():
    """Per-generation elementwise dtype / tile cap / VMEM limit."""
    try:
        kind = jax.devices()[0].device_kind.lower()
    except Exception:  # pragma: no cover
        kind = ""
    if "v5" in kind:   # v5e: no bf16 VALU -> keep f32 elementwise; 128 MiB VMEM
        return dict(bf16_elementwise=False, tile_cap=4096, vmem_limit_bytes=64 * 1024 * 1024)
    if "v7" in kind:   # v7x: 64 MiB VMEM per TC, 2 TCs
        return dict(bf16_elementwise=True, tile_cap=2048, vmem_limit_bytes=36 * 1024 * 1024)
    if "v6" in kind:   # v6e: 128 MiB VMEM
        return dict(bf16_elementwise=True, tile_cap=4096, vmem_limit_bytes=64 * 1024 * 1024)
    # Unknown: conservative middle ground (same limit that already compiled cleanly).
    return dict(bf16_elementwise=True, tile_cap=2048, vmem_limit_bytes=48 * 1024 * 1024)


def _choose_tile_n(n, cap):
    """Biggest 128-aligned row tile <= cap while keeping >= 2 grid steps when possible."""
    if n <= 128:
        return 128
    return min(cap, _round_up(-(-n // 2), 128))


@functools.partial(jax.jit,
                   static_argnames=("tile_n", "bf16_elementwise", "vmem_limit_bytes"))
def _mlp_forward_impl(x, params, *, tile_n, bf16_elementwise, vmem_limit_bytes):
    elem_dtype = jnp.bfloat16 if bf16_elementwise else jnp.float32
    n, f = x.shape
    assert f == IN_DIM
    assert tile_n % 128 == 0

    n_pad = _round_up(n, tile_n)
    num_tiles = n_pad // tile_n

    # Pad rows to a tile multiple, features 159 -> 256 with zeros, cast to bf16 (halves the
    # per-row HBM DMA), then transpose once to feature-major (256, n_pad).
    xp = jnp.pad(x, ((0, n_pad - n), (0, PAD_DIM - f))).astype(jnp.bfloat16).T

    kparams = _prep_params(params, elem_dtype)

    x_spec = pl.BlockSpec((PAD_DIM, tile_n), lambda i: (0, i))
    # Weights/biases: full-array blocks with constant index_map -> fetched once, VMEM-resident.
    param_specs = [pl.BlockSpec(p.shape, lambda i: (0, 0)) for p in kparams]
    # Lane-dense output: one (1, tile_n) row slab per grid step.
    out_spec = pl.BlockSpec((1, tile_n), lambda i: (0, i))

    out = pl.pallas_call(
        functools.partial(mlp_kernel, elem_dtype=elem_dtype),
        out_shape=jax.ShapeDtypeStruct((1, n_pad), jnp.float32),
        grid_spec=pltpu.PrefetchScalarGridSpec(
            num_scalar_prefetch=0,
            grid=(num_tiles,),
            in_specs=[x_spec] + param_specs,
            out_specs=out_spec,
        ),
        compiler_params=pltpu.CompilerParams(
            dimension_semantics=("parallel",),
            vmem_limit_bytes=vmem_limit_bytes,
        ),
    )(xp, *kparams)

    # (1, n_pad) row-major == (n_pad, 1); slice off padded rows.
    return out.reshape(n_pad, OUT_DIM)[:n]


def mlp_forward(x, params):
    cfg = _chip_config()
    tile_n = _choose_tile_n(x.shape[0], cfg["tile_cap"])
    return _mlp_forward_impl(x, params, tile_n=tile_n,
                             bf16_elementwise=cfg["bf16_elementwise"],
                             vmem_limit_bytes=cfg["vmem_limit_bytes"])


# ----------------------------------------------------------------------------- reference
def mlp_reference(x, params, bf16_elementwise):
    """Pure-JAX reference mimicking the kernel's bf16-MXU / f32-accumulate numerics."""
    elem = jnp.bfloat16 if bf16_elementwise else jnp.float32
    xb = x.astype(jnp.bfloat16)   # kernel DMAs x as bf16

    def linear(h, w, b, relu=True):
        acc = jnp.dot(h.astype(jnp.bfloat16), w.astype(jnp.bfloat16).T,
                      preferred_element_type=jnp.float32)
        y = acc.astype(elem) + b.astype(elem)
        return jnp.maximum(y, 0.0) if relu else y

    (w10, b10, w11, b11, w12, b12, w13, b13,
     w20, b20, w21, b21, w22, b22, w23, b23) = params
    h = linear(xb, w10, b10)
    h = linear(h, w11, b11)
    h = linear(h, w12, b12)
    h = linear(h, w13, b13)
    y = xb.astype(elem) + h
    y = linear(y, w20, b20)
    y = linear(y, w21, b21)
    y = linear(y, w22, b22)
    return jnp.dot(y.astype(jnp.bfloat16), w23.astype(jnp.bfloat16).T,
                   preferred_element_type=jnp.float32) + b23


# ----------------------------------------------------------------------------- main
if __name__ == "__main__":
    key = jax.random.PRNGKey(0)
    kx, kp = jax.random.split(key)

    N = 300  # small, deliberately not a multiple of the tile; wrapper pads rows and features
    x = jax.random.normal(kx, (N, IN_DIM), jnp.float32)
    params = init_params(kp)

    out = mlp_forward(x, params)
    out = jax.block_until_ready(out)

    cfg = _chip_config()
    ref = mlp_reference(x, params, cfg["bf16_elementwise"])
    assert out.shape == (N, OUT_DIM)
    err = float(jnp.max(jnp.abs(out - ref)))
    assert err < 2e-2, err
    # TODO(synk): bf16 MXU / bf16 elementwise will not bit-match a pure-f32 PyTorch MLP;
    # tolerance here is vs. a numerics-matched reference.

    print("KERNEL_OK")
</pallas_src>

<mosaic_0001>
module attributes {stable_mosaic.version = 11 : i64} {
  func.func @mlp_kernel(%arg0: i32, %arg1: memref<256x256xbf16, #tpu.memory_space<vmem>>, %arg2: memref<256x256xbf16, #tpu.memory_space<vmem>>, %arg3: memref<256x1xbf16, #tpu.memory_space<vmem>>, %arg4: memref<256x256xbf16, #tpu.memory_space<vmem>>, %arg5: memref<256x1xbf16, #tpu.memory_space<vmem>>, %arg6: memref<256x256xbf16, #tpu.memory_space<vmem>>, %arg7: memref<256x1xbf16, #tpu.memory_space<vmem>>, %arg8: memref<256x256xbf16, #tpu.memory_space<vmem>>, %arg9: memref<256x1xbf16, #tpu.memory_space<vmem>>, %arg10: memref<256x256xbf16, #tpu.memory_space<vmem>>, %arg11: memref<256x1xbf16, #tpu.memory_space<vmem>>, %arg12: memref<256x256xbf16, #tpu.memory_space<vmem>>, %arg13: memref<256x1xbf16, #tpu.memory_space<vmem>>, %arg14: memref<256x256xbf16, #tpu.memory_space<vmem>>, %arg15: memref<256x1xbf16, #tpu.memory_space<vmem>>, %arg16: memref<1x256xbf16, #tpu.memory_space<vmem>>, %arg17: memref<1x1xf32, #tpu.memory_space<vmem>>, %arg18: memref<1x256xf32, #tpu.memory_space<vmem>>) attributes {dimension_semantics = [#tpu.dimension_semantics<parallel>], iteration_bounds = array<i64: 2>, scalar_prefetch = 0 : i64, scratch_operands = 0 : i64, tpu.core_type = #tpu.core_type<tc>, window_params = [{transform_indices = @transform_0, window_bounds = array<i64: 256, 256>}, {pipeline_mode = #tpu.pipeline_mode<synchronous>, transform_indices = @transform_1, window_bounds = array<i64: 256, 256>}, {pipeline_mode = #tpu.pipeline_mode<synchronous>, transform_indices = @transform_2, window_bounds = array<i64: 256, 1>}, {pipeline_mode = #tpu.pipeline_mode<synchronous>, transform_indices = @transform_3, window_bounds = array<i64: 256, 256>}, {pipeline_mode = #tpu.pipeline_mode<synchronous>, transform_indices = @transform_4, window_bounds = array<i64: 256, 1>}, {pipeline_mode = #tpu.pipeline_mode<synchronous>, transform_indices = @transform_5, window_bounds = array<i64: 256, 256>}, {pipeline_mode = #tpu.pipeline_mode<synchronous>, transform_indices = @transform_6, window_bounds = array<i64: 256, 1>}, {pipeline_mode = #tpu.pipeline_mode<synchronous>, transform_indices = @transform_7, window_bounds = array<i64: 256, 256>}, {pipeline_mode = #tpu.pipeline_mode<synchronous>, transform_indices = @transform_8, window_bounds = array<i64: 256, 1>}, {pipeline_mode = #tpu.pipeline_mode<synchronous>, transform_indices = @transform_9, window_bounds = array<i64: 256, 256>}, {pipeline_mode = #tpu.pipeline_mode<synchronous>, transform_indices = @transform_10, window_bounds = array<i64: 256, 1>}, {pipeline_mode = #tpu.pipeline_mode<synchronous>, transform_indices = @transform_11, window_bounds = array<i64: 256, 256>}, {pipeline_mode = #tpu.pipeline_mode<synchronous>, transform_indices = @transform_12, window_bounds = array<i64: 256, 1>}, {pipeline_mode = #tpu.pipeline_mode<synchronous>, transform_indices = @transform_13, window_bounds = array<i64: 256, 256>}, {pipeline_mode = #tpu.pipeline_mode<synchronous>, transform_indices = @transform_14, window_bounds = array<i64: 256, 1>}, {pipeline_mode = #tpu.pipeline_mode<synchronous>, transform_indices = @transform_15, window_bounds = array<i64: 1, 256>}, {pipeline_mode = #tpu.pipeline_mode<synchronous>, transform_indices = @transform_16, window_bounds = array<i64: 1, 1>}, {transform_indices = @transform_17, window_bounds = array<i64: 1, 256>}]} {
    %c0 = arith.constant 0 : index
    %c0_0 = arith.constant 0 : index
    %0 = vector.load %arg1[%c0, %c0_0] : memref<256x256xbf16, #tpu.memory_space<vmem>>, vector<256x256xbf16>
    %c0_1 = arith.constant 0 : index
    %c0_2 = arith.constant 0 : index
    %1 = vector.load %arg2[%c0_1, %c0_2] : memref<256x256xbf16, #tpu.memory_space<vmem>>, vector<256x256xbf16>
    %cst = arith.constant dense<0.000000e+00> : vector<256x256xf32>
    %2 = tpu.matmul %1, %0, %cst {dimension_numbers = #tpu.dot_dimension_numbers<[1], [0], [0], [1], [0, 0, 1, 1], [], []>} : vector<256x256xbf16>, vector<256x256xbf16>, vector<256x256xf32> -> vector<256x256xf32>
    %3 = arith.truncf %2 : vector<256x256xf32> to vector<256x256xbf16>
    %c0_3 = arith.constant 0 : index
    %c0_4 = arith.constant 0 : index
    %4 = vector.load %arg3[%c0_3, %c0_4] : memref<256x1xbf16, #tpu.memory_space<vmem>>, vector<256x1xbf16>
    %5 = vector.broadcast %4 : vector<256x1xbf16> to vector<256x256xbf16>
    %6 = arith.addf %3, %5 : vector<256x256xbf16>
    %cst_5 = arith.constant 0.000000e+00 : bf16
    %7 = vector.broadcast %cst_5 : bf16 to vector<256x256xbf16>
    %8 = arith.maximumf %6, %7 : vector<256x256xbf16>
    %c0_6 = arith.constant 0 : index
    %c0_7 = arith.constant 0 : index
    %9 = vector.load %arg4[%c0_6, %c0_7] : memref<256x256xbf16, #tpu.memory_space<vmem>>, vector<256x256xbf16>
    %cst_8 = arith.constant dense<0.000000e+00> : vector<256x256xf32>
    %10 = tpu.matmul %9, %8, %cst_8 {dimension_numbers = #tpu.dot_dimension_numbers<[1], [0], [0], [1], [0, 0, 1, 1], [], []>} : vector<256x256xbf16>, vector<256x256xbf16>, vector<256x256xf32> -> vector<256x256xf32>
    %11 = arith.truncf %10 : vector<256x256xf32> to vector<256x256xbf16>
    %c0_9 = arith.constant 0 : index
    %c0_10 = arith.constant 0 : index
    %12 = vector.load %arg5[%c0_9, %c0_10] : memref<256x1xbf16, #tpu.memory_space<vmem>>, vector<256x1xbf16>
    %13 = vector.broadcast %12 : vector<256x1xbf16> to vector<256x256xbf16>
    %14 = arith.addf %11, %13 : vector<256x256xbf16>
    %cst_11 = arith.constant 0.000000e+00 : bf16
    %15 = vector.broadcast %cst_11 : bf16 to vector<256x256xbf16>
    %16 = arith.maximumf %14, %15 : vector<256x256xbf16>
    %c0_12 = arith.constant 0 : index
    %c0_13 = arith.constant 0 : index
    %17 = vector.load %arg6[%c0_12, %c0_13] : memref<256x256xbf16, #tpu.memory_space<vmem>>, vector<256x256xbf16>
    %cst_14 = arith.constant dense<0.000000e+00> : vector<256x256xf32>
    %18 = tpu.matmul %17, %16, %cst_14 {dimension_numbers = #tpu.dot_dimension_numbers<[1], [0], [0], [1], [0, 0, 1, 1], [], []>} : vector<256x256xbf16>, vector<256x256xbf16>, vector<256x256xf32> -> vector<256x256xf32>
    %19 = arith.truncf %18 : vector<256x256xf32> to vector<256x256xbf16>
    %c0_15 = arith.constant 0 : index
    %c0_16 = arith.constant 0 : index
    %20 = vector.load %arg7[%c0_15, %c0_16] : memref<256x1xbf16, #tpu.memory_space<vmem>>, vector<256x1xbf16>
    %21 = vector.broadcast %20 : vector<256x1xbf16> to vector<256x256xbf16>
    %22 = arith.addf %19, %21 : vector<256x256xbf16>
    %cst_17 = arith.constant 0.000000e+00 : bf16
    %23 = vector.broadcast %cst_17 : bf16 to vector<256x256xbf16>
    %24 = arith.maximumf %22, %23 : vector<256x256xbf16>
    %c0_18 = arith.constant 0 : index
    %c0_19 = arith.constant 0 : index
    %25 = vector.load %arg8[%c0_18, %c0_19] : memref<256x256xbf16, #tpu.memory_space<vmem>>, vector<256x256xbf16>
    %cst_20 = arith.constant dense<0.000000e+00> : vector<256x256xf32>
    %26 = tpu.matmul %25, %24, %cst_20 {dimension_numbers = #tpu.dot_dimension_numbers<[1], [0], [0], [1], [0, 0, 1, 1], [], []>} : vector<256x256xbf16>, vector<256x256xbf16>, vector<256x256xf32> -> vector<256x256xf32>
    %27 = arith.truncf %26 : vector<256x256xf32> to vector<256x256xbf16>
    %c0_21 = arith.constant 0 : index
    %c0_22 = arith.constant 0 : index
    %28 = vector.load %arg9[%c0_21, %c0_22] : memref<256x1xbf16, #tpu.memory_space<vmem>>, vector<256x1xbf16>
    %29 = vector.broadcast %28 : vector<256x1xbf16> to vector<256x256xbf16>
    %30 = arith.addf %27, %29 : vector<256x256xbf16>
    %cst_23 = arith.constant 0.000000e+00 : bf16
    %31 = vector.broadcast %cst_23 : bf16 to vector<256x256xbf16>
    %32 = arith.maximumf %30, %31 : vector<256x256xbf16>
    %33 = arith.addf %0, %32 : vector<256x256xbf16>
    %c0_24 = arith.constant 0 : index
    %c0_25 = arith.constant 0 : index
    %34 = vector.load %arg10[%c0_24, %c0_25] : memref<256x256xbf16, #tpu.memory_space<vmem>>, vector<256x256xbf16>
    %cst_26 = arith.constant dense<0.000000e+00> : vector<256x256xf32>
    %35 = tpu.matmul %34, %33, %cst_26 {dimension_numbers = #tpu.dot_dimension_numbers<[1], [0], [0], [1], [0, 0, 1, 1], [], []>} : vector<256x256xbf16>, vector<256x256xbf16>, vector<256x256xf32> -> vector<256x256xf32>
    %36 = arith.truncf %35 : vector<256x256xf32> to vector<256x256xbf16>
    %c0_27 = arith.constant 0 : index
    %c0_28 = arith.constant 0 : index
    %37 = vector.load %arg11[%c0_27, %c0_28] : memref<256x1xbf16, #tpu.memory_space<vmem>>, vector<256x1xbf16>
    %38 = vector.broadcast %37 : vector<256x1xbf16> to vector<256x256xbf16>
    %39 = arith.addf %36, %38 : vector<256x256xbf16>
    %cst_29 = arith.constant 0.000000e+00 : bf16
    %40 = vector.broadcast %cst_29 : bf16 to vector<256x256xbf16>
    %41 = arith.maximumf %39, %40 : vector<256x256xbf16>
    %c0_30 = arith.constant 0 : index
    %c0_31 = arith.constant 0 : index
    %42 = vector.load %arg12[%c0_30, %c0_31] : memref<256x256xbf16, #tpu.memory_space<vmem>>, vector<256x256xbf16>
    %cst_32 = arith.constant dense<0.000000e+00> : vector<256x256xf32>
    %43 = tpu.matmul %42, %41, %cst_32 {dimension_numbers = #tpu.dot_dimension_numbers<[1], [0], [0], [1], [0, 0, 1, 1], [], []>} : vector<256x256xbf16>, vector<256x256xbf16>, vector<256x256xf32> -> vector<256x256xf32>
    %44 = arith.truncf %43 : vector<256x256xf32> to vector<256x256xbf16>
    %c0_33 = arith.constant 0 : index
    %c0_34 = arith.constant 0 : index
    %45 = vector.load %arg13[%c0_33, %c0_34] : memref<256x1xbf16, #tpu.memory_space<vmem>>, vector<256x1xbf16>
    %46 = vector.broadcast %45 : vector<256x1xbf16> to vector<256x256xbf16>
    %47 = arith.addf %44, %46 : vector<256x256xbf16>
    %cst_35 = arith.constant 0.000000e+00 : bf16
    %48 = vector.broadcast %cst_35 : bf16 to vector<256x256xbf16>
    %49 = arith.maximumf %47, %48 : vector<256x256xbf16>
    %c0_36 = arith.constant 0 : index
    %c0_37 = arith.constant 0 : index
    %50 = vector.load %arg14[%c0_36, %c0_37] : memref<256x256xbf16, #tpu.memory_space<vmem>>, vector<256x256xbf16>
    %cst_38 = arith.constant dense<0.000000e+00> : vector<256x256xf32>
    %51 = tpu.matmul %50, %49, %cst_38 {dimension_numbers = #tpu.dot_dimension_numbers<[1], [0], [0], [1], [0, 0, 1, 1], [], []>} : vector<256x256xbf16>, vector<256x256xbf16>, vector<256x256xf32> -> vector<256x256xf32>
    %52 = arith.truncf %51 : vector<256x256xf32> to vector<256x256xbf16>
    %c0_39 = arith.constant 0 : index
    %c0_40 = arith.constant 0 : index
    %53 = vector.load %arg15[%c0_39, %c0_40] : memref<256x1xbf16, #tpu.memory_space<vmem>>, vector<256x1xbf16>
    %54 = vector.broadcast %53 : vector<256x1xbf16> to vector<256x256xbf16>
    %55 = arith.addf %52, %54 : vector<256x256xbf16>
    %cst_41 = arith.constant 0.000000e+00 : bf16
    %56 = vector.broadcast %cst_41 : bf16 to vector<256x256xbf16>
    %57 = arith.maximumf %55, %56 : vector<256x256xbf16>
    %c0_42 = arith.constant 0 : index
    %c0_43 = arith.constant 0 : index
    %58 = vector.load %arg16[%c0_42, %c0_43] : memref<1x256xbf16, #tpu.memory_space<vmem>>, vector<1x256xbf16>
    %cst_44 = arith.constant dense<0.000000e+00> : vector<1x256xf32>
    %59 = tpu.matmul %58, %57, %cst_44 {dimension_numbers = #tpu.dot_dimension_numbers<[1], [0], [0], [1], [0, 0, 1, 1], [], []>} : vector<1x256xbf16>, vector<256x256xbf16>, vector<1x256xf32> -> vector<1x256xf32>
    %c0_45 = arith.constant 0 : index
    %c0_46 = arith.constant 0 : index
    %60 = vector.load %arg17[%c0_45, %c0_46] : memref<1x1xf32, #tpu.memory_space<vmem>>, vector<1x1xf32>
    %61 = vector.broadcast %60 : vector<1x1xf32> to vector<1x256xf32>
    %62 = arith.addf %59, %61 : vector<1x256xf32>
    %c0_47 = arith.constant 0 : index
    %c0_48 = arith.constant 0 : index
    %63 = vector.load %arg18[%c0_47, %c0_48] : memref<1x256xf32, #tpu.memory_space<vmem>>, vector<1x256xf32>
    tpu.vector_store %arg18[%c0_47, %c0_48], %62 {strides = array<i32>} : memref<1x256xf32, #tpu.memory_space<vmem>>, vector<1x256xf32>,
    return
  }
  func.func @transform_0(%arg0: i32) -> (i32, i32) {
    %c0_i32 = arith.constant 0 : i32
    %c0_i32_0 = arith.constant 0 : i32
    return %c0_i32, %arg0 : i32, i32
  }
  func.func @transform_1(%arg0: i32) -> (i32, i32) {
    %c0_i32 = arith.constant 0 : i32
    %c0_i32_0 = arith.constant 0 : i32
    %c0_i32_1 = arith.constant 0 : i32
    return %c0_i32, %c0_i32_0 : i32, i32
  }
  func.func @transform_2(%arg0: i32) -> (i32, i32) {
    %c0_i32 = arith.constant 0 : i32
    %c0_i32_0 = arith.constant 0 : i32
    %c0_i32_1 = arith.constant 0 : i32
    return %c0_i32, %c0_i32_0 : i32, i32
  }
  func.func @transform_3(%arg0: i32) -> (i32, i32) {
    %c0_i32 = arith.constant 0 : i32
    %c0_i32_0 = arith.constant 0 : i32
    %c0_i32_1 = arith.constant 0 : i32
    return %c0_i32, %c0_i32_0 : i32, i32
  }
  func.func @transform_4(%arg0: i32) -> (i32, i32) {
    %c0_i32 = arith.constant 0 : i32
    %c0_i32_0 = arith.constant 0 : i32
    %c0_i32_1 = arith.constant 0 : i32
    return %c0_i32, %c0_i32_0 : i32, i32
  }
  func.func @transform_5(%arg0: i32) -> (i32, i32) {
    %c0_i32 = arith.constant 0 : i32
    %c0_i32_0 = arith.constant 0 : i32
    %c0_i32_1 = arith.constant 0 : i32
    return %c0_i32, %c0_i32_0 : i32, i32
  }
  func.func @transform_6(%arg0: i32) -> (i32, i32) {
    %c0_i32 = arith.constant 0 : i32
    %c0_i32_0 = arith.constant 0 : i32
    %c0_i32_1 = arith.constant 0 : i32
    return %c0_i32, %c0_i32_0 : i32, i32
  }
  func.func @transform_7(%arg0: i32) -> (i32, i32) {
    %c0_i32 = arith.constant 0 : i32
    %c0_i32_0 = arith.constant 0 : i32
    %c0_i32_1 = arith.constant 0 : i32
    return %c0_i32, %c0_i32_0 : i32, i32
  }
  func.func @transform_8(%arg0: i32) -> (i32, i32) {
    %c0_i32 = arith.constant 0 : i32
    %c0_i32_0 = arith.constant 0 : i32
    %c0_i32_1 = arith.constant 0 : i32
    return %c0_i32, %c0_i32_0 : i32, i32
  }
  func.func @transform_9(%arg0: i32) -> (i32, i32) {
    %c0_i32 = arith.constant 0 : i32
    %c0_i32_0 = arith.constant 0 : i32
    %c0_i32_1 = arith.constant 0 : i32
    return %c0_i32, %c0_i32_0 : i32, i32
  }
  func.func @transform_10(%arg0: i32) -> (i32, i32) {
    %c0_i32 = arith.constant 0 : i32
    %c0_i32_0 = arith.constant 0 : i32
    %c0_i32_1 = arith.constant 0 : i32
    return %c0_i32, %c0_i32_0 : i32, i32
  }
  func.func @transform_11(%arg0: i32) -> (i32, i32) {
    %c0_i32 = arith.constant 0 : i32
    %c0_i32_0 = arith.constant 0 : i32
    %c0_i32_1 = arith.constant 0 : i32
    return %c0_i32, %c0_i32_0 : i32, i32
  }
  func.func @transform_12(%arg0: i32) -> (i32, i32) {
    %c0_i32 = arith.constant 0 : i32
    %c0_i32_0 = arith.constant 0 : i32
    %c0_i32_1 = arith.constant 0 : i32
    return %c0_i32, %c0_i32_0 : i32, i32
  }
  func.func @transform_13(%arg0: i32) -> (i32, i32) {
    %c0_i32 = arith.constant 0 : i32
    %c0_i32_0 = arith.constant 0 : i32
    %c0_i32_1 = arith.constant 0 : i32
    return %c0_i32, %c0_i32_0 : i32, i32
  }
  func.func @transform_14(%arg0: i32) -> (i32, i32) {
    %c0_i32 = arith.constant 0 : i32
    %c0_i32_0 = arith.constant 0 : i32
    %c0_i32_1 = arith.constant 0 : i32
    return %c0_i32, %c0_i32_0 : i32, i32
  }
  func.func @transform_15(%arg0: i32) -> (i32, i32) {
    %c0_i32 = arith.constant 0 : i32
    %c0_i32_0 = arith.constant 0 : i32
    %c0_i32_1 = arith.constant 0 : i32
    return %c0_i32, %c0_i32_0 : i32, i32
  }
  func.func @transform_16(%arg0: i32) -> (i32, i32) {
    %c0_i32 = arith.constant 0 : i32
    %c0_i32_0 = arith.constant 0 : i32
    %c0_i32_1 = arith.constant 0 : i32
    return %c0_i32, %c0_i32_0 : i32, i32
  }
  func.func @transform_17(%arg0: i32) -> (i32, i32) {
    %c0_i32 = arith.constant 0 : i32
    %c0_i32_0 = arith.constant 0 : i32
    return %c0_i32, %arg0 : i32, i32
  }
}

</mosaic_0001>

<bundles_post_ra>
// kernel: _mlp_forward_impl.1
= control target key start
LH: loop header
LB: loop body
LE: loop exit
PB: predicated region body
PF: predicated region fallthrough
CT: control target
= control target key end

     0   :  { %s11917_s0 = inlined_call_operand.vmem [shape: bf16[256,512], index: 0, kind: input, shape index: {}]   ;;  %s11918_s1 = inlined_call_operand.vmem [shape: bf16[256,256], index: 1, kind: input, shape index: {}]   ;;  %s11919_s2 = inlined_call_operand.vmem [shape: bf16[256,1], index: 2, kind: input, shape index: {}]   ;;  %s11920_s3 = inlined_call_operand.vmem [shape: bf16[256,256], index: 3, kind: input, shape index: {}]   ;;  %s11921_s4 = inlined_call_operand.vmem [shape: bf16[256,1], index: 4, kind: input, shape index: {}]   ;;  %s11922_s5 = inlined_call_operand.vmem [shape: bf16[256,256], index: 5, kind: input, shape index: {}]   ;;  %s11923_s6 = inlined_call_operand.vmem [shape: bf16[256,1], index: 6, kind: input, shape index: {}]   ;;  %s11924_s7 = inlined_call_operand.vmem [shape: bf16[256,256], index: 7, kind: input, shape index: {}]   ;;  %s11925_s8 = inlined_call_operand.vmem [shape: bf16[256,1], index: 8, kind: input, shape index: {}]   ;;  %s11926_s9 = inlined_call_operand.vmem [shape: bf16[256,256], index: 9, kind: input, shape index: {}]   ;;  %s11927_s10 = inlined_call_operand.vmem [shape: bf16[256,1], index: 10, kind: input, shape index: {}]   ;;  %s11928_s11 = inlined_call_operand.vmem [shape: bf16[256,256], index: 11, kind: input, shape index: {}]   ;;  %s11929_s12 = inlined_call_operand.vmem [shape: bf16[256,1], index: 12, kind: input, shape index: {}]   ;;  %s11930_s13 = inlined_call_operand.vmem [shape: bf16[256,256], index: 13, kind: input, shape index: {}]   ;;  %s11931_s14 = inlined_call_operand.vmem [shape: bf16[256,1], index: 14, kind: input, shape index: {}]   ;;  %s11932_s15 = inlined_call_operand.vmem [shape: bf16[1,256], index: 15, kind: input, shape index: {}]   ;;  %s11933_s16 = inlined_call_operand.<no memory space> [shape: f32[1,1], index: 16, kind: input, shape index: {}]   ;;  %s11934_s17 = inlined_call_operand.vmem [shape: f32[1,512], index: 17, kind: output, shape index: {}]  }
   0x1   :  { %11943 = sst [smem:[#allocation65_spill]] %s11917_s0  ;;  %v22_v0 = vstv %s11933_s16 }
   0x2   :  { %11944 = sst [smem:[#allocation66_spill]] %s11918_s1  ;;  %23 = vst [vmem:[#allocation2] sm:$0x1] %v22_v0 }
   0x3   :  { %s9389_s26 = smov 0   ;;  %s9391_s27 = smov 0  }
   0x4   :  { %s9393_s28 = smov 0  }
   0x5 LB: > { %s9406_s29 = sadd.s32 1, %s9291_s28   ;;  %s36_s30 = sadd.s32 1, %s9287_s27  ;;  %s9291_s28 = sphi %s9393_s28, %s12089_s28   ;;  %s9287_s27 = sphi %s9391_s27, %s12088_s27   ;;  %s9283_s26 = sphi %s9389_s26, %s12087_s26  }
   0x6   : > { %s33_s0 = ssub.s32 %s9291_s28, %s9406_s29  ;;  %p43_p1 = scmp.ne.s32.totalorder %s9287_s27, %s9283_s26 }
   0x7   : > { %p34_p0 = scmp.eq.s32.totalorder %s33_s0, 0  ;;  %p44_p2 = scmp.eq.s32.totalorder %s9291_s28, 0 }
   0x8   : > { %p8365_p4 = scmp.ge.s32.totalorder %s9291_s28, 2 }
   0x9   : > { %s9415_s18 = scalar_select %p34_p0, %s9287_s27, %s36_s30  }
   0xa   : > { %p45_p3 = por %p44_p2, %p43_p1  ;;  %479 = sbr.rel (%p8365_p4) target bundleno = 43 (0x2b), region = 80 }
  0x11   : > { %482 = sbr.rel (!%p45_p3) target bundleno = 43 (0x2b), region = 84  ;;  %s484_s19 = sand.u32 (%p45_p3), 1, %s9287_s27  }
  0x12   : > { %s8807_s1 = sshll.u32 (%p45_p3), %s9291_s28, 3  ;;  %s8366_s20 = sshll.u32 (%p45_p3), %s484_s19, 8 }
  0x13   : > { %s11945_s23 = sld [smem:[#allocation65_spill]] (%p45_p3)  ;;  %s9428_s25 = scalar_lea.vmem (%p45_p3), [#allocation3], %s8366_s20 }
  0x19   : > { %s9423_s24 = scalar_lea.vmem %s11945_s23, %s8807_s1 }
  0x1a   : > { %v579_v1 = vld [vmem:[%s9423_s24] sm:$0xff]  ;;  %v581_v2 = vld [vmem:[%s9423_s24 + $0x10] sm:$0xff] }
  0x1b   : > { %v583_v3 = vld [vmem:[%s9423_s24 + $0x20] sm:$0xff]  ;;  %580 = vst [vmem:[%s9428_s25] sm:$0xff] %v579_v1  ;;  %582 = vst [vmem:[%s9428_s25 + $0x8] sm:$0xff] %v581_v2  ;;  %v585_v4 = vld [vmem:[%s9423_s24 + $0x30] sm:$0xff] }
  0x1c   : > { %584 = vst [vmem:[%s9428_s25 + $0x10] sm:$0xff] %v583_v3  ;;  %v587_v5 = vld [vmem:[%s9423_s24 + $0x40] sm:$0xff]  ;;  %v589_v6 = vld [vmem:[%s9423_s24 + $0x50] sm:$0xff]  ;;  %586 = vst [vmem:[%s9428_s25 + $0x18] sm:$0xff] %v585_v4 }
  0x1d   : > { %588 = vst [vmem:[%s9428_s25 + $0x20] sm:$0xff] %v587_v5  ;;  %590 = vst [vmem:[%s9428_s25 + $0x28] sm:$0xff] %v589_v6  ;;  %v591_v7 = vld [vmem:[%s9423_s24 + $0x60] sm:$0xff]  ;;  %v593_v8 = vld [vmem:[%s9423_s24 + $0x70] sm:$0xff] }
  0x1e   : > { %v595_v9 = vld [vmem:[%s9423_s24 + $0x80] sm:$0xff]  ;;  %592 = vst [vmem:[%s9428_s25 + $0x30] sm:$0xff] %v591_v7  ;;  %594 = vst [vmem:[%s9428_s25 + $0x38] sm:$0xff] %v593_v8  ;;  %v597_v10 = vld [vmem:[%s9423_s24 + $0x90] sm:$0xff] }
  0x1f   : > { %596 = vst [vmem:[%s9428_s25 + $0x40] sm:$0xff] %v595_v9  ;;  %v599_v11 = vld [vmem:[%s9423_s24 + $0xa0] sm:$0xff]  ;;  %v601_v12 = vld [vmem:[%s9423_s24 + $0xb0] sm:$0xff]  ;;  %598 = vst [vmem:[%s9428_s25 + $0x48] sm:$0xff] %v597_v10 }
  0x20   : > { %600 = vst [vmem:[%s9428_s25 + $0x50] sm:$0xff] %v599_v11  ;;  %602 = vst [vmem:[%s9428_s25 + $0x58] sm:$0xff] %v601_v12  ;;  %v603_v13 = vld [vmem:[%s9423_s24 + $0xc0] sm:$0xff]  ;;  %v605_v14 = vld [vmem:[%s9423_s24 + $0xd0] sm:$0xff] }
  0x21   : > { %v607_v15 = vld [vmem:[%s9423_s24 + $0xe0] sm:$0xff]  ;;  %604 = vst [vmem:[%s9428_s25 + $0x60] sm:$0xff] %v603_v13  ;;  %606 = vst [vmem:[%s9428_s25 + $0x68] sm:$0xff] %v605_v14  ;;  %v609_v16 = vld [vmem:[%s9423_s24 + $0xf0] sm:$0xff] }
  0x22   : > { %608 = vst [vmem:[%s9428_s25 + $0x70] sm:$0xff] %v607_v15  ;;  %v611_v17 = vld [vmem:[%s9423_s24 + $0x100] sm:$0xff]  ;;  %v613_v18 = vld [vmem:[%s9423_s24 + $0x110] sm:$0xff]  ;;  %610 = vst [vmem:[%s9428_s25 + $0x78] sm:$0xff] %v609_v16 }
  0x23   : > { %612 = vst [vmem:[%s9428_s25 + $0x80] sm:$0xff] %v611_v17  ;;  %614 = vst [vmem:[%s9428_s25 + $0x88] sm:$0xff] %v613_v18  ;;  %v615_v19 = vld [vmem:[%s9423_s24 + $0x120] sm:$0xff]  ;;  %v617_v20 = vld [vmem:[%s9423_s24 + $0x130] sm:$0xff] }
  0x24   : > { %v619_v21 = vld [vmem:[%s9423_s24 + $0x140] sm:$0xff]  ;;  %616 = vst [vmem:[%s9428_s25 + $0x90] sm:$0xff] %v615_v19  ;;  %618 = vst [vmem:[%s9428_s25 + $0x98] sm:$0xff] %v617_v20  ;;  %v621_v22 = vld [vmem:[%s9423_s24 + $0x150] sm:$0xff] }
  0x25   : > { %620 = vst [vmem:[%s9428_s25 + $0xa0] sm:$0xff] %v619_v21  ;;  %v623_v23 = vld [vmem:[%s9423_s24 + $0x160] sm:$0xff]  ;;  %v625_v24 = vld [vmem:[%s9423_s24 + $0x170] sm:$0xff]  ;;  %622 = vst [vmem:[%s9428_s25 + $0xa8] sm:$0xff] %v621_v22 }
  0x26   : > { %624 = vst [vmem:[%s9428_s25 + $0xb0] sm:$0xff] %v623_v23  ;;  %626 = vst [vmem:[%s9428_s25 + $0xb8] sm:$0xff] %v625_v24  ;;  %v627_v25 = vld [vmem:[%s9423_s24 + $0x180] sm:$0xff]  ;;  %v629_v26 = vld [vmem:[%s9423_s24 + $0x190] sm:$0xff] }
  0x27   : > { %v631_v27 = vld [vmem:[%s9423_s24 + $0x1a0] sm:$0xff]  ;;  %628 = vst [vmem:[%s9428_s25 + $0xc0] sm:$0xff] %v627_v25  ;;  %630 = vst [vmem:[%s9428_s25 + $0xc8] sm:$0xff] %v629_v26  ;;  %v633_v28 = vld [vmem:[%s9423_s24 + $0x1b0] sm:$0xff] }
  0x28   : > { %632 = vst [vmem:[%s9428_s25 + $0xd0] sm:$0xff] %v631_v27  ;;  %v635_v29 = vld [vmem:[%s9423_s24 + $0x1c0] sm:$0xff]  ;;  %v637_v30 = vld [vmem:[%s9423_s24 + $0x1d0] sm:$0xff]  ;;  %634 = vst [vmem:[%s9428_s25 + $0xd8] sm:$0xff] %v633_v28 }
  0x29   : > { %636 = vst [vmem:[%s9428_s25 + $0xe0] sm:$0xff] %v635_v29  ;;  %638 = vst [vmem:[%s9428_s25 + $0xe8] sm:$0xff] %v637_v30  ;;  %v639_v31 = vld [vmem:[%s9423_s24 + $0x1e0] sm:$0xff]  ;;  %v641_v32 = vld [vmem:[%s9423_s24 + $0x1f0] sm:$0xff] }
  0x2a   : > { %640 = vst [vmem:[%s9428_s25 + $0xf0] sm:$0xff] %v639_v31  ;;  %642 = vst [vmem:[%s9428_s25 + $0xf8] sm:$0xff] %v641_v32 }
  0x2b PF: > { %p8369_p5 = scmp.ge.s32.totalorder %s9291_s28, 1  ;;  %p647_p6 = scmp.lt.s32.totalorder %s9291_s28, 3 }
  0x2d   : > { %p648_p7 = pnand %p8369_p5, %p647_p6 }
  0x2f   : > { %651 = sbr.rel (%p648_p7) target bundleno = 2736 (0xab0), region = 122 }
  0x36   : > { %v1322_v33 = vld [vmem:[%s11919_s2 + $0x8] sm:$0xf]  ;;  %v1320_v34 = vld [vmem:[%s11919_s2] sm:$0xf]  ;;  %s654_s20 = sand.u32 1, %s9283_s26   ;;  %v11936_v35 = vmov 0  }
  0x37   : > { %8868 = vset.pattern.permute.xlu1 %v11936_v35  ;;  %8867 = vset.pattern.permute.xlu0 %v11936_v35  ;;  %s8370_s21 = sshll.u32 %s654_s20, 8  ;;  %v1323_v36 = vld [vmem:[%s11919_s2 + $0xc] sm:$0xf]  ;;  %v1321_v37 = vld [vmem:[%s11919_s2 + $0x4] sm:$0xf]  ;;  %s11946_s19 = sld [smem:[#allocation66_spill]] }
  0x38   : > { %1378 = vperm.xlu1 %8868, %v1322_v33   ;;  %1354 = vperm.xlu0 %8867, %v1320_v34   ;;  %s9508_s0 = scalar_lea.vmem [#allocation3], %s8370_s21  ;;  %v1325_v47 = vld [vmem:[%s11919_s2 + $0x14] sm:$0xf]  ;;  %v1324_v48 = vld [vmem:[%s11919_s2 + $0x10] sm:$0xf]  ;;  %s12085_s24 = sadd.s32 4294967295, %s9291_s28  }
  0x39   : > { %v711_v38 = vld [vmem:[%s9508_s0] sm:$0xff]  ;;  %v712_v39 = vld [vmem:[%s9508_s0 + $0x8] sm:$0xff]  ;;  %v713_v40 = vld [vmem:[%s9508_s0 + $0x10] sm:$0xff] }
  0x3a   : > { %v8405_v41 = vcombine.high %v711_v38, %v712_v39  ;;  %v8404_v42 = vcombine.low %v711_v38, %v712_v39  ;;  %v714_v43 = vld [vmem:[%s9508_s0 + $0x18] sm:$0xff]  ;;  %v715_v45 = vld [vmem:[%s9508_s0 + $0x20] sm:$0xff]  ;;  %v716_v46 = vld [vmem:[%s9508_s0 + $0x28] sm:$0xff] }
  0x3b   : > { %v8407_v44 = vcombine.high %v713_v40, %v714_v43  ;;  %v8406_v49 = vcombine.low %v713_v40, %v714_v43  ;;  %v8409_v50 = vcombine.high %v715_v45, %v716_v46  ;;  %v717_v51 = vld [vmem:[%s9508_s0 + $0x30] sm:$0xff]  ;;  %v718_v52 = vld [vmem:[%s9508_s0 + $0x38] sm:$0xff]  ;;  %v8408_v55 = vcombine.low %v715_v45, %v716_v46  ;;  %v719_v57 = vld [vmem:[%s9508_s0 + $0x40] sm:$0xff] }
  0x3c   : > { %1390 = vperm.xlu1 %8868, %v1323_v36   ;;  %1366 = vperm.xlu0 %8867, %v1321_v37   ;;  %v1327_v53 = vld [vmem:[%s11919_s2 + $0x1c] sm:$0xf]  ;;  %v1326_v54 = vld [vmem:[%s11919_s2 + $0x18] sm:$0xf]  ;;  %v8411_v56 = vcombine.high %v717_v51, %v718_v52  ;;  %v720_v58 = vld [vmem:[%s9508_s0 + $0x48] sm:$0xff]  ;;  %v8410_v61 = vcombine.low %v717_v51, %v718_v52 }
  0x3d   : > { %1095 = vmatprep.subr.bf16.mxu0 %v8405_v41  ;;  %8808 = vmatprep.subr.bf16.mxu1 %v8405_v41  ;;  %v1329_v59 = vld [vmem:[%s11919_s2 + $0x24] sm:$0xf]  ;;  %v1328_v60 = vld [vmem:[%s11919_s2 + $0x20] sm:$0xf]  ;;  %v8413_v62 = vcombine.high %v719_v57, %v720_v58  ;;  %v721_v63 = vld [vmem:[%s9508_s0 + $0x50] sm:$0xff]  ;;  %v8412_v3 = vcombine.low %v719_v57, %v720_v58 }
  0x3e   : > { %1096 = vmatpush1.bf16.msra.mxu0 %v8404_v42  ;;  %8824 = vmatpush1.bf16.msra.mxu1 %v8404_v42  ;;  %v722_v0 = vld [vmem:[%s9508_s0 + $0x58] sm:$0xff]  ;;  %v1331_v1 = vld [vmem:[%s11919_s2 + $0x2c] sm:$0xf]  ;;  %v1330_v2 = vld [vmem:[%s11919_s2 + $0x28] sm:$0xf] }
  0x3f   : > { %1097 = vmatprep.subr.bf16.mxu0 %v8407_v44  ;;  %8809 = vmatprep.subr.bf16.mxu1 %v8407_v44  ;;  %v8415_v4 = vcombine.high %v721_v63, %v722_v0  ;;  %v1333_v5 = vld [vmem:[%s11919_s2 + $0x34] sm:$0xf]  ;;  %v723_v6 = vld [vmem:[%s9508_s0 + $0x60] sm:$0xff]  ;;  %v724_v7 = vld [vmem:[%s9508_s0 + $0x68] sm:$0xff]  ;;  %v8414_v10 = vcombine.low %v721_v63, %v722_v0 }
  0x40   : > { %1414 = vperm.xlu1 %8868, %v1325_v47   ;;  %1402 = vperm.xlu0 %8867, %v1324_v48   ;;  %v1332_v8 = vld [vmem:[%s11919_s2 + $0x30] sm:$0xf]  ;;  %v8903_v9 = vld [vmem:[%s11946_s19 + $0x4] ss:$8 sps:$4 sm:$0xff]   ;;  %v1335_v12 = vld [vmem:[%s11919_s2 + $0x3c] sm:$0xf]  ;;  %v8417_v13 = vcombine.high %v723_v6, %v724_v7  ;;  %v8416_v17 = vcombine.low %v723_v6, %v724_v7 }
  0x41   : > { %v8906_v11 = vld [vmem:[%s11946_s19 + $0x84] ss:$8 sps:$4 sm:$0xff]   ;;  %v725_v14 = vld [vmem:[%s9508_s0 + $0x70] sm:$0xff]  ;;  %v726_v15 = vld [vmem:[%s9508_s0 + $0x78] sm:$0xff]  ;;  %1127 = vmatprep.mubr.bf16.mxu0 %v8903_v9 }
  0x42   : > { %1098 = vmatpush1.bf16.msra.mxu0 %v8406_v49  ;;  %8825 = vmatpush1.bf16.msra.mxu1 %v8406_v49  ;;  %v1334_v16 = vld [vmem:[%s11919_s2 + $0x38] sm:$0xf]  ;;  %v1337_v18 = vld [vmem:[%s11919_s2 + $0x44] sm:$0xf]  ;;  %v8419_v19 = vcombine.high %v725_v14, %v726_v15  ;;  %v728_v21 = vld [vmem:[%s9508_s0 + $0x88] sm:$0xff]  ;;  %v8418_v23 = vcombine.low %v725_v14, %v726_v15 }
  0x43   : > { %1099 = vmatprep.subr.bf16.mxu0 %v8409_v50  ;;  %8810 = vmatprep.subr.bf16.mxu1 %v8409_v50  ;;  %v727_v20 = vld [vmem:[%s9508_s0 + $0x80] sm:$0xff]  ;;  %v1339_v24 = vld [vmem:[%s11919_s2 + $0x4c] sm:$0xf]  ;;  %v729_v26 = vld [vmem:[%s9508_s0 + $0x90] sm:$0xff] }
  0x44   : > { %1438 = vperm.xlu1 %8868, %v1327_v53   ;;  %1426 = vperm.xlu0 %8867, %v1326_v54   ;;  %v1336_v22 = vld [vmem:[%s11919_s2 + $0x40] sm:$0xf]  ;;  %v8421_v25 = vcombine.high %v727_v20, %v728_v21  ;;  %v1338_v28 = vld [vmem:[%s11919_s2 + $0x48] sm:$0xf]  ;;  %v8420_v29 = vcombine.low %v727_v20, %v728_v21  ;;  %v1341_v30 = vld [vmem:[%s11919_s2 + $0x54] sm:$0xf] }
  0x45   : > { %1207 = vmatprep.mubr.bf16.mxu1 %v8906_v11  ;;  %v730_v27 = vld [vmem:[%s9508_s0 + $0x98] sm:$0xff]  ;;  %v731_v32 = vld [vmem:[%s9508_s0 + $0xa0] sm:$0xff]  ;;  %v732_v33 = vld [vmem:[%s9508_s0 + $0xa8] sm:$0xff] }
  0x46   : > { %1100 = vmatpush1.bf16.msra.mxu0 %v8408_v55  ;;  %8826 = vmatpush1.bf16.msra.mxu1 %v8408_v55  ;;  %v8423_v31 = vcombine.high %v729_v26, %v730_v27  ;;  %v1340_v34 = vld [vmem:[%s11919_s2 + $0x50] sm:$0xf]  ;;  %v8422_v36 = vcombine.low %v729_v26, %v730_v27  ;;  %v1343_v37 = vld [vmem:[%s11919_s2 + $0x5c] sm:$0xf]  ;;  %v8425_v38 = vcombine.high %v731_v32, %v732_v33  ;;  %v1342_v41 = vld [vmem:[%s11919_s2 + $0x58] sm:$0xf] }
  0x47   : > { %1101 = vmatprep.subr.bf16.mxu0 %v8411_v56  ;;  %8811 = vmatprep.subr.bf16.mxu1 %v8411_v56  ;;  %v733_v39 = vld [vmem:[%s9508_s0 + $0xb0] sm:$0xff]  ;;  %v734_v40 = vld [vmem:[%s9508_s0 + $0xb8] sm:$0xff]  ;;  %v8424_v42 = vcombine.low %v731_v32, %v732_v33  ;;  %v1345_v43 = vld [vmem:[%s11919_s2 + $0x64] sm:$0xf] }
  0x48   : > { %1462 = vperm.xlu1 %8868, %v1329_v59   ;;  %1450 = vperm.xlu0 %8867, %v1328_v60   ;;  %v8427_v44 = vcombine.high %v733_v39, %v734_v40  ;;  %v735_v45 = vld [vmem:[%s9508_s0 + $0xc0] sm:$0xff]  ;;  %v736_v46 = vld [vmem:[%s9508_s0 + $0xc8] sm:$0xff]  ;;  %v8426_v48 = vcombine.low %v733_v39, %v734_v40  ;;  %v737_v51 = vld [vmem:[%s9508_s0 + $0xd0] sm:$0xff] }
  0x49   : > { %v1344_v47 = vld [vmem:[%s11919_s2 + $0x60] sm:$0xf]  ;;  %v1347_v49 = vld [vmem:[%s11919_s2 + $0x6c] sm:$0xf]  ;;  %v8429_v50 = vcombine.high %v735_v45, %v736_v46  ;;  %v1346_v53 = vld [vmem:[%s11919_s2 + $0x68] sm:$0xf]  ;;  %v8428_v54 = vcombine.low %v735_v45, %v736_v46 }
  0x4a   : > { %1102 = vmatpush1.bf16.msra.mxu0 %v8410_v61  ;;  %8827 = vmatpush1.bf16.msra.mxu1 %v8410_v61  ;;  %v738_v52 = vld [vmem:[%s9508_s0 + $0xd8] sm:$0xff]  ;;  %v739_v56 = vld [vmem:[%s9508_s0 + $0xe0] sm:$0xff]  ;;  %v740_v57 = vld [vmem:[%s9508_s0 + $0xe8] sm:$0xff] }
  0x4b   : > { %1103 = vmatprep.subr.bf16.mxu0 %v8413_v62  ;;  %8812 = vmatprep.subr.bf16.mxu1 %v8413_v62  ;;  %v8431_v55 = vcombine.high %v737_v51, %v738_v52  ;;  %v1349_v58 = vld [vmem:[%s11919_s2 + $0x74] sm:$0xf]  ;;  %v1348_v59 = vld [vmem:[%s11919_s2 + $0x70] sm:$0xf]  ;;  %v8430_v60 = vcombine.low %v737_v51, %v738_v52  ;;  %v8433_v61 = vcombine.high %v739_v56, %v740_v57  ;;  %v742_v63 = vld [vmem:[%s9508_s0 + $0xf8] sm:$0xff] }
  0x4c   : > { %1486 = vperm.xlu1 %8868, %v1331_v1   ;;  %1474 = vperm.xlu0 %8867, %v1330_v2   ;;  %v741_v62 = vld [vmem:[%s9508_s0 + $0xf0] sm:$0xff]  ;;  %v1351_v0 = vld [vmem:[%s11919_s2 + $0x7c] sm:$0xf]  ;;  %v8432_v2 = vcombine.low %v739_v56, %v740_v57  ;;  %v8901_v7 = vld [vmem:[%s11946_s19] ss:$8 sps:$4 sm:$0xff]  }
  0x4d   : > { %v1350_v1 = vld [vmem:[%s11919_s2 + $0x78] sm:$0xf]  ;;  %v8434_v6 = vcombine.low %v741_v62, %v742_v63  ;;  %v2316_v9 = vld [vmem:[%s11921_s4 + $0xc] sm:$0xf]  ;;  %v8907_v11 = vld [vmem:[%s11946_s19 + $0x14] ss:$8 sps:$4 sm:$0xff]  }
  0x4e   : > { %1104 = vmatpush1.bf16.msra.mxu0 %v8412_v3  ;;  %8828 = vmatpush1.bf16.msra.mxu1 %v8412_v3  ;;  %v8435_v3 = vcombine.high %v741_v62, %v742_v63  ;;  %v2317_v14 = vld [vmem:[%s11921_s4 + $0x10] sm:$0xf]  ;;  %v2320_v15 = vld [vmem:[%s11921_s4 + $0x1c] sm:$0xf]  ;;  %v8915_v20 = vld [vmem:[%s11946_s19 + $0xa4] ss:$8 sps:$4 sm:$0xff]  }
  0x4f   : > { %1105 = vmatprep.subr.bf16.mxu0 %v8415_v4  ;;  %8813 = vmatprep.subr.bf16.mxu1 %v8415_v4  ;;  %v2314_v4 = vld [vmem:[%s11921_s4 + $0x4] sm:$0xf]  ;;  %v8918_v26 = vld [vmem:[%s11946_s19 + $0xa0] ss:$8 sps:$4 sm:$0xff]   ;;  %v8919_v27 = vld [vmem:[%s11946_s19 + $0x34] ss:$8 sps:$4 sm:$0xff]  }
  0x50   : > { %1510 = vperm.xlu1 %8868, %v1333_v5   ;;  %1498 = vperm.xlu0 %8867, %v1332_v8   ;;  %v2313_v5 = vld [vmem:[%s11921_s4] sm:$0xf]  ;;  %v2322_v21 = vld [vmem:[%s11921_s4 + $0x24] sm:$0xf]  ;;  %v2327_v32 = vld [vmem:[%s11921_s4 + $0x38] sm:$0xf] }
  0x51   : > { %v8904_v8 = vld [vmem:[%s11946_s19 + $0x80] ss:$8 sps:$4 sm:$0xff]   ;;  %v8923_v33 = vld [vmem:[%s11946_s19 + $0x30] ss:$8 sps:$4 sm:$0xff]   ;;  %v2332_v40 = vld [vmem:[%s11921_s4 + $0x4c] sm:$0xf] }
  0x52   : > { %1106 = vmatpush1.bf16.msra.mxu0 %v8414_v10  ;;  %8829 = vmatpush1.bf16.msra.mxu1 %v8414_v10  ;;  %v2315_v10 = vld [vmem:[%s11921_s4 + $0x8] sm:$0xf]  ;;  %v2329_v39 = vld [vmem:[%s11921_s4 + $0x40] sm:$0xf]  ;;  %v8933_v45 = vld [vmem:[%s11946_s19 + $0xd4] ss:$8 sps:$4 sm:$0xff]  }
  0x53   : > { %1107 = vmatprep.subr.bf16.mxu0 %v8417_v13  ;;  %8814 = vmatprep.subr.bf16.mxu1 %v8417_v13  ;;  %v2318_v13 = vld [vmem:[%s11921_s4 + $0x14] sm:$0xf]  ;;  %v8936_v51 = vld [vmem:[%s11946_s19 + $0xd0] ss:$8 sps:$4 sm:$0xff]   ;;  %v8937_v52 = vld [vmem:[%s11946_s19 + $0x64] ss:$8 sps:$4 sm:$0xff]  }
  0x54   : > { %1534 = vperm.xlu1 %8868, %v1335_v12   ;;  %1522 = vperm.xlu0 %8867, %v1334_v16   ;;  %v8909_v12 = vld [vmem:[%s11946_s19 + $0x94] ss:$8 sps:$4 sm:$0xff]   ;;  %v2319_v16 = vld [vmem:[%s11921_s4 + $0x18] sm:$0xf]  ;;  %v2340_v56 = vld [vmem:[%s11921_s4 + $0x6c] sm:$0xf] }
  0x55   : > { %v2334_v46 = vld [vmem:[%s11921_s4 + $0x54] sm:$0xf]  ;;  %v2339_v57 = vld [vmem:[%s11921_s4 + $0x68] sm:$0xf]  ;;  %v2341_v63 = vld [vmem:[%s11921_s4 + $0x70] sm:$0xf] }
  0x56   : > { %1108 = vmatpush1.bf16.msra.mxu0 %v8416_v17  ;;  %8830 = vmatpush1.bf16.msra.mxu1 %v8416_v17  ;;  %v8911_v17 = vld [vmem:[%s11946_s19 + $0x10] ss:$8 sps:$4 sm:$0xff]   ;;  %v2342_v62 = vld [vmem:[%s11921_s4 + $0x74] sm:$0xf] }
  0x57   : > { %1109 = vmatprep.subr.bf16.mxu0 %v8419_v19  ;;  %8815 = vmatprep.subr.bf16.mxu1 %v8419_v19  ;;  %v8913_v19 = vld [vmem:[%s11946_s19 + $0x24] ss:$8 sps:$4 sm:$0xff]  }
  0x58   : > { %1558 = vperm.xlu1 %8868, %v1337_v18   ;;  %1546 = vperm.xlu0 %8867, %v1336_v22   ;;  %v8912_v18 = vld [vmem:[%s11946_s19 + $0x90] ss:$8 sps:$4 sm:$0xff]   ;;  %v2321_v22 = vld [vmem:[%s11921_s4 + $0x20] sm:$0xf] }
  0x5a   : > { %1110 = vmatpush1.bf16.msra.mxu0 %v8418_v23  ;;  %8831 = vmatpush1.bf16.msra.mxu1 %v8418_v23  ;;  %v2324_v23 = vld [vmem:[%s11921_s4 + $0x2c] sm:$0xf] }
  0x5b   : > { %1111 = vmatprep.subr.bf16.mxu0 %v8421_v25  ;;  %8816 = vmatprep.subr.bf16.mxu1 %v8421_v25  ;;  %v8917_v25 = vld [vmem:[%s11946_s19 + $0x20] ss:$8 sps:$4 sm:$0xff]  }
  0x5c   : > { %1582 = vperm.xlu1 %8868, %v1339_v24   ;;  %1570 = vperm.xlu0 %8867, %v1338_v28   ;;  %v2323_v24 = vld [vmem:[%s11921_s4 + $0x28] sm:$0xf]  ;;  %v8921_v28 = vld [vmem:[%s11946_s19 + $0xb4] ss:$8 sps:$4 sm:$0xff]  }
  0x5e   : > { %1112 = vmatpush1.bf16.msra.mxu0 %v8420_v29  ;;  %8832 = vmatpush1.bf16.msra.mxu1 %v8420_v29  ;;  %v2326_v29 = vld [vmem:[%s11921_s4 + $0x34] sm:$0xf] }
  0x5f   : > { %1113 = vmatprep.subr.bf16.mxu0 %v8423_v31  ;;  %8817 = vmatprep.subr.bf16.mxu1 %v8423_v31  ;;  %v2328_v31 = vld [vmem:[%s11921_s4 + $0x3c] sm:$0xf] }
  0x60   : > { %1606 = vperm.xlu1 %8868, %v1341_v30   ;;  %1594 = vperm.xlu0 %8867, %v1340_v34   ;;  %v2325_v30 = vld [vmem:[%s11921_s4 + $0x30] sm:$0xf] }
  0x61   : > { %v8924_v34 = vld [vmem:[%s11946_s19 + $0xb0] ss:$8 sps:$4 sm:$0xff]  }
  0x62   : > { %1114 = vmatpush1.bf16.msra.mxu0 %v8422_v36  ;;  %8833 = vmatpush1.bf16.msra.mxu1 %v8422_v36  ;;  %v8925_v36 = vld [vmem:[%s11946_s19 + $0x44] ss:$8 sps:$4 sm:$0xff]  }
  0x63   : > { %1115 = vmatprep.subr.bf16.mxu0 %v8425_v38  ;;  %8818 = vmatprep.subr.bf16.mxu1 %v8425_v38  ;;  %v2330_v38 = vld [vmem:[%s11921_s4 + $0x44] sm:$0xf] }
  0x64   : > { %1630 = vperm.xlu1 %8868, %v1343_v37   ;;  %1618 = vperm.xlu0 %8867, %v1342_v41   ;;  %v8927_v37 = vld [vmem:[%s11946_s19 + $0xc4] ss:$8 sps:$4 sm:$0xff]   ;;  %v2331_v41 = vld [vmem:[%s11921_s4 + $0x48] sm:$0xf] }
  0x66   : > { %1116 = vmatpush1.bf16.msra.mxu0 %v8424_v42  ;;  %8834 = vmatpush1.bf16.msra.mxu1 %v8424_v42  ;;  %v8929_v42 = vld [vmem:[%s11946_s19 + $0x40] ss:$8 sps:$4 sm:$0xff]  }
  0x67   : > { %1117 = vmatprep.subr.bf16.mxu0 %v8427_v44  ;;  %8819 = vmatprep.subr.bf16.mxu1 %v8427_v44  ;;  %v8931_v44 = vld [vmem:[%s11946_s19 + $0x54] ss:$8 sps:$4 sm:$0xff]  }
  0x68   : > { %1654 = vperm.xlu1 %8868, %v1345_v43   ;;  %1642 = vperm.xlu0 %8867, %v1344_v47   ;;  %v8930_v43 = vld [vmem:[%s11946_s19 + $0xc0] ss:$8 sps:$4 sm:$0xff]   ;;  %v2333_v47 = vld [vmem:[%s11921_s4 + $0x50] sm:$0xf] }
  0x6a   : > { %1118 = vmatpush1.bf16.msra.mxu0 %v8426_v48  ;;  %8835 = vmatpush1.bf16.msra.mxu1 %v8426_v48  ;;  %v2336_v48 = vld [vmem:[%s11921_s4 + $0x5c] sm:$0xf] }
  0x6b   : > { %1119 = vmatprep.subr.bf16.mxu0 %v8429_v50  ;;  %8820 = vmatprep.subr.bf16.mxu1 %v8429_v50  ;;  %v8935_v50 = vld [vmem:[%s11946_s19 + $0x50] ss:$8 sps:$4 sm:$0xff]  }
  0x6c   : > { %1678 = vperm.xlu1 %8868, %v1347_v49   ;;  %1666 = vperm.xlu0 %8867, %v1346_v53   ;;  %v2335_v49 = vld [vmem:[%s11921_s4 + $0x58] sm:$0xf]  ;;  %v8939_v53 = vld [vmem:[%s11946_s19 + $0xe4] ss:$8 sps:$4 sm:$0xff]  }
  0x6e   : > { %1120 = vmatpush1.bf16.msra.mxu0 %v8428_v54  ;;  %8836 = vmatpush1.bf16.msra.mxu1 %v8428_v54  ;;  %v2338_v54 = vld [vmem:[%s11921_s4 + $0x64] sm:$0xf] }
  0x6f   : > { %1121 = vmatprep.subr.bf16.mxu0 %v8431_v55  ;;  %8821 = vmatprep.subr.bf16.mxu1 %v8431_v55  ;;  %v2337_v55 = vld [vmem:[%s11921_s4 + $0x60] sm:$0xf] }
  0x70   : > { %1702 = vperm.xlu1 %8868, %v1349_v58   ;;  %1690 = vperm.xlu0 %8867, %v1348_v59   ;;  %v8941_v58 = vld [vmem:[%s11946_s19 + $0x60] ss:$8 sps:$4 sm:$0xff]  }
  0x71   : > { %v8942_v59 = vld [vmem:[%s11946_s19 + $0xe0] ss:$8 sps:$4 sm:$0xff]  }
  0x72   : > { %1122 = vmatpush1.bf16.msra.mxu0 %v8430_v60  ;;  %8837 = vmatpush1.bf16.msra.mxu1 %v8430_v60  ;;  %v8943_v60 = vld [vmem:[%s11946_s19 + $0x74] ss:$8 sps:$4 sm:$0xff]  }
  0x73   : > { %1123 = vmatprep.subr.bf16.mxu0 %v8433_v61  ;;  %8822 = vmatprep.subr.bf16.mxu1 %v8433_v61  ;;  %v8945_v61 = vld [vmem:[%s11946_s19 + $0xf4] ss:$8 sps:$4 sm:$0xff]  }
  0x74   : > { %1726 = vperm.xlu1 %8868, %v1351_v0   ;;  %1714 = vperm.xlu0 %8867, %v1350_v1   ;;  %v2344_v0 = vld [vmem:[%s11921_s4 + $0x7c] sm:$0xf]  ;;  %v2343_v1 = vld [vmem:[%s11921_s4 + $0x78] sm:$0xf] }
  0x76   : > { %1124 = vmatpush1.bf16.msra.mxu0 %v8432_v2  ;;  %8838 = vmatpush1.bf16.msra.mxu1 %v8432_v2  ;;  %v8947_v2 = vld [vmem:[%s11946_s19 + $0x70] ss:$8 sps:$4 sm:$0xff]  }
  0x77   : > { %1125 = vmatprep.subr.bf16.mxu0 %v8435_v3  ;;  %8823 = vmatprep.subr.bf16.mxu1 %v8435_v3  ;;  %v8948_v3 = vld [vmem:[%s11946_s19 + $0xf0] ss:$8 sps:$4 sm:$0xff]  }
  0x78   : > { %2359 = vperm.xlu1 %8868, %v2314_v4   ;;  %2347 = vperm.xlu0 %8867, %v2313_v5   ;;  %v3307_v4 = vld [vmem:[%s11923_s6 + $0x4] sm:$0xf]  ;;  %v3306_v5 = vld [vmem:[%s11923_s6] sm:$0xf] }
  0x7a   : > { %1126 = vmatpush1.bf16.msra.mxu0 %v8434_v6  ;;  %8839 = vmatpush1.bf16.msra.mxu1 %v8434_v6 }
  0x7c   : > { %2383 = vperm.xlu1 %8868, %v2316_v9   ;;  %2371 = vperm.xlu0 %8867, %v2315_v10   ;;  %v3308_v9 = vld [vmem:[%s11923_s6 + $0x8] sm:$0xf] }
  0x7d   : > { %1128 = vmatmul.mubr.bf16.vlgmr.msra.gmra.mrb[0].mxu0 %v8901_v7  ;;  %1208 = vmatmul.mubr.bf16.vlgmr.msra.gmra.mrb[0].mxu1 %v8904_v8  ;;  %v3309_v8 = vld [vmem:[%s11923_s6 + $0xc] sm:$0xf] }
  0x7e   : > { %1137 = vmatprep.mubr.bf16.mxu0 %v8907_v11  ;;  %1217 = vmatprep.mubr.bf16.mxu1 %v8909_v12  ;;  %v3311_v12 = vld [vmem:[%s11923_s6 + $0x14] sm:$0xf] }
  0x80   : > { %2407 = vperm.xlu1 %8868, %v2318_v13   ;;  %2395 = vperm.xlu0 %8867, %v2317_v14   ;;  %v3310_v13 = vld [vmem:[%s11923_s6 + $0x10] sm:$0xf] }
  0x84   : > { %2431 = vperm.xlu1 %8868, %v2320_v15   ;;  %2419 = vperm.xlu0 %8867, %v2319_v16   ;;  %v3313_v16 = vld [vmem:[%s11923_s6 + $0x1c] sm:$0xf] }
  0x85   : > { %1138 = vmatmul.mubr.bf16.gmra.mrb[4].mxu0 %v8911_v17  ;;  %1218 = vmatmul.mubr.bf16.gmra.mrb[4].mxu1 %v8912_v18  ;;  %v3312_v17 = vld [vmem:[%s11923_s6 + $0x18] sm:$0xf] }
  0x86   : > { %1147 = vmatprep.mubr.bf16.mxu0 %v8913_v19  ;;  %1227 = vmatprep.mubr.bf16.mxu1 %v8915_v20  ;;  %v3315_v20 = vld [vmem:[%s11923_s6 + $0x24] sm:$0xf] }
  0x88   : > { %2455 = vperm.xlu1 %8868, %v2322_v21   ;;  %2443 = vperm.xlu0 %8867, %v2321_v22   ;;  %v3314_v21 = vld [vmem:[%s11923_s6 + $0x20] sm:$0xf] }
  0x8c   : > { %2479 = vperm.xlu1 %8868, %v2324_v23   ;;  %2467 = vperm.xlu0 %8867, %v2323_v24   ;;  %v3317_v24 = vld [vmem:[%s11923_s6 + $0x2c] sm:$0xf] }
  0x8d   : > { %1148 = vmatmul.mubr.bf16.gmra.mrb[8].mxu0 %v8917_v25  ;;  %1228 = vmatmul.mubr.bf16.gmra.mrb[8].mxu1 %v8918_v26  ;;  %v3316_v25 = vld [vmem:[%s11923_s6 + $0x28] sm:$0xf] }
  0x8e   : > { %1157 = vmatprep.mubr.bf16.mxu0 %v8919_v27  ;;  %1237 = vmatprep.mubr.bf16.mxu1 %v8921_v28  ;;  %v3319_v28 = vld [vmem:[%s11923_s6 + $0x34] sm:$0xf] }
  0x90   : > { %2503 = vperm.xlu1 %8868, %v2326_v29   ;;  %2491 = vperm.xlu0 %8867, %v2325_v30   ;;  %v3318_v29 = vld [vmem:[%s11923_s6 + $0x30] sm:$0xf] }
  0x94   : > { %2527 = vperm.xlu1 %8868, %v2328_v31   ;;  %2515 = vperm.xlu0 %8867, %v2327_v32   ;;  %v3321_v32 = vld [vmem:[%s11923_s6 + $0x3c] sm:$0xf] }
  0x95   : > { %1158 = vmatmul.mubr.bf16.gmra.mrb[12].mxu0 %v8923_v33  ;;  %1238 = vmatmul.mubr.bf16.gmra.mrb[12].mxu1 %v8924_v34  ;;  %v3320_v33 = vld [vmem:[%s11923_s6 + $0x38] sm:$0xf] }
  0x96   : > { %1167 = vmatprep.mubr.bf16.mxu0 %v8925_v36  ;;  %1247 = vmatprep.mubr.bf16.mxu1 %v8927_v37  ;;  %v3323_v37 = vld [vmem:[%s11923_s6 + $0x44] sm:$0xf] }
  0x98   : > { %2551 = vperm.xlu1 %8868, %v2330_v38   ;;  %2539 = vperm.xlu0 %8867, %v2329_v39   ;;  %v3322_v38 = vld [vmem:[%s11923_s6 + $0x40] sm:$0xf] }
  0x9c   : > { %2575 = vperm.xlu1 %8868, %v2332_v40   ;;  %2563 = vperm.xlu0 %8867, %v2331_v41   ;;  %v3325_v41 = vld [vmem:[%s11923_s6 + $0x4c] sm:$0xf] }
  0x9d   : > { %1168 = vmatmul.mubr.bf16.gmra.mrb[16].mxu0 %v8929_v42  ;;  %1248 = vmatmul.mubr.bf16.gmra.mrb[16].mxu1 %v8930_v43  ;;  %v3324_v42 = vld [vmem:[%s11923_s6 + $0x48] sm:$0xf] }
  0x9e   : > { %1177 = vmatprep.mubr.bf16.mxu0 %v8931_v44  ;;  %1257 = vmatprep.mubr.bf16.mxu1 %v8933_v45  ;;  %v3327_v45 = vld [vmem:[%s11923_s6 + $0x54] sm:$0xf] }
  0xa0   : > { %2599 = vperm.xlu1 %8868, %v2334_v46   ;;  %2587 = vperm.xlu0 %8867, %v2333_v47   ;;  %v3326_v46 = vld [vmem:[%s11923_s6 + $0x50] sm:$0xf] }
  0xa4   : > { %2623 = vperm.xlu1 %8868, %v2336_v48   ;;  %2611 = vperm.xlu0 %8867, %v2335_v49   ;;  %v3329_v49 = vld [vmem:[%s11923_s6 + $0x5c] sm:$0xf] }
  0xa5   : > { %1178 = vmatmul.mubr.bf16.gmra.mrb[20].mxu0 %v8935_v50  ;;  %1258 = vmatmul.mubr.bf16.gmra.mrb[20].mxu1 %v8936_v51  ;;  %v3328_v50 = vld [vmem:[%s11923_s6 + $0x58] sm:$0xf] }
  0xa6   : > { %1187 = vmatprep.mubr.bf16.mxu0 %v8937_v52  ;;  %1267 = vmatprep.mubr.bf16.mxu1 %v8939_v53  ;;  %v3331_v53 = vld [vmem:[%s11923_s6 + $0x64] sm:$0xf] }
  0xa8   : > { %2647 = vperm.xlu1 %8868, %v2338_v54   ;;  %2635 = vperm.xlu0 %8867, %v2337_v55   ;;  %v3330_v54 = vld [vmem:[%s11923_s6 + $0x60] sm:$0xf] }
  0xac   : > { %2671 = vperm.xlu1 %8868, %v2340_v56   ;;  %2659 = vperm.xlu0 %8867, %v2339_v57   ;;  %v3333_v57 = vld [vmem:[%s11923_s6 + $0x6c] sm:$0xf] }
  0xad   : > { %1188 = vmatmul.mubr.bf16.gmra.mrb[24].mxu0 %v8941_v58  ;;  %1268 = vmatmul.mubr.bf16.gmra.mrb[24].mxu1 %v8942_v59  ;;  %v3332_v58 = vld [vmem:[%s11923_s6 + $0x68] sm:$0xf] }
  0xae   : > { %1197 = vmatprep.mubr.bf16.mxu0 %v8943_v60  ;;  %1277 = vmatprep.mubr.bf16.mxu1 %v8945_v61  ;;  %v3335_v61 = vld [vmem:[%s11923_s6 + $0x74] sm:$0xf] }
  0xb0   : > { %2695 = vperm.xlu1 %8868, %v2342_v62   ;;  %2683 = vperm.xlu0 %8867, %v2341_v63   ;;  %v3334_v62 = vld [vmem:[%s11923_s6 + $0x70] sm:$0xf] }
  0xb4   : > { %2719 = vperm.xlu1 %8868, %v2344_v0   ;;  %2707 = vperm.xlu0 %8867, %v2343_v1   ;;  %v3337_v1 = vld [vmem:[%s11923_s6 + $0x7c] sm:$0xf] }
  0xb5   : > { %1198 = vmatmul.mubr.bf16.gmra.mrb[28].mxu0 %v8947_v2  ;;  %1278 = vmatmul.mubr.bf16.gmra.mrb[28].mxu1 %v8948_v3  ;;  %v3336_v2 = vld [vmem:[%s11923_s6 + $0x78] sm:$0xf] }
  0xb7   : > { %v9824_v6 = vpop.permute.xlu1 %1378  ;;  %v9826_v7 = vpop.permute.xlu0 %1354 }
  0xb8   : > { %3352 = vperm.xlu1 %8868, %v3307_v4   ;;  %3340 = vperm.xlu0 %8867, %v3306_v5   ;;  %v4300_v5 = vld [vmem:[%s11925_s8 + $0x4] sm:$0xf] }
  0xbb   : > { %v9834_v10 = vpop.permute.xlu1 %1390  ;;  %v9836_v11 = vpop.permute.xlu0 %1366 }
  0xbc   : > { %3376 = vperm.xlu1 %8868, %v3309_v8   ;;  %3364 = vperm.xlu0 %8867, %v3308_v9   ;;  %v4299_v8 = vld [vmem:[%s11925_s8] sm:$0xf] }
  0xbf   : > { %v9844_v14 = vpop.permute.xlu1 %1414  ;;  %v9846_v15 = vpop.permute.xlu0 %1402 }
  0xc0   : > { %3400 = vperm.xlu1 %8868, %v3311_v12   ;;  %3388 = vperm.xlu0 %8867, %v3310_v13   ;;  %v4302_v13 = vld [vmem:[%s11925_s8 + $0xc] sm:$0xf] }
  0xc3   : > { %v9854_v18 = vpop.permute.xlu1 %1438  ;;  %v9856_v19 = vpop.permute.xlu0 %1426 }
  0xc4   : > { %3424 = vperm.xlu1 %8868, %v3313_v16   ;;  %3412 = vperm.xlu0 %8867, %v3312_v17   ;;  %v4301_v16 = vld [vmem:[%s11925_s8 + $0x8] sm:$0xf] }
  0xc7   : > { %v9864_v22 = vpop.permute.xlu1 %1462  ;;  %v9866_v23 = vpop.permute.xlu0 %1450 }
  0xc8   : > { %3448 = vperm.xlu1 %8868, %v3315_v20   ;;  %3436 = vperm.xlu0 %8867, %v3314_v21   ;;  %v4304_v21 = vld [vmem:[%s11925_s8 + $0x14] sm:$0xf] }
  0xcb   : > { %v9874_v26 = vpop.permute.xlu1 %1486  ;;  %v9876_v27 = vpop.permute.xlu0 %1474 }
  0xcc   : > { %3472 = vperm.xlu1 %8868, %v3317_v24   ;;  %3460 = vperm.xlu0 %8867, %v3316_v25   ;;  %v4303_v24 = vld [vmem:[%s11925_s8 + $0x10] sm:$0xf] }
  0xcf   : > { %v9884_v30 = vpop.permute.xlu1 %1510  ;;  %v9886_v31 = vpop.permute.xlu0 %1498 }
  0xd0   : > { %3496 = vperm.xlu1 %8868, %v3319_v28   ;;  %3484 = vperm.xlu0 %8867, %v3318_v29   ;;  %v4306_v29 = vld [vmem:[%s11925_s8 + $0x1c] sm:$0xf] }
  0xd3   : > { %v9894_v34 = vpop.permute.xlu1 %1534  ;;  %v9896_v36 = vpop.permute.xlu0 %1522 }
  0xd4   : > { %3520 = vperm.xlu1 %8868, %v3321_v32   ;;  %3508 = vperm.xlu0 %8867, %v3320_v33   ;;  %v4305_v32 = vld [vmem:[%s11925_s8 + $0x18] sm:$0xf] }
  0xd7   : > { %v9904_v39 = vpop.permute.xlu1 %1558  ;;  %v9906_v40 = vpop.permute.xlu0 %1546 }
  0xd8   : > { %3544 = vperm.xlu1 %8868, %v3323_v37   ;;  %3532 = vperm.xlu0 %8867, %v3322_v38   ;;  %v4308_v38 = vld [vmem:[%s11925_s8 + $0x24] sm:$0xf] }
  0xdb   : > { %v9914_v43 = vpop.permute.xlu1 %1582  ;;  %v9916_v44 = vpop.permute.xlu0 %1570 }
  0xdc   : > { %3568 = vperm.xlu1 %8868, %v3325_v41   ;;  %3556 = vperm.xlu0 %8867, %v3324_v42   ;;  %v4307_v41 = vld [vmem:[%s11925_s8 + $0x20] sm:$0xf] }
  0xdf   : > { %v9924_v47 = vpop.permute.xlu1 %1606  ;;  %v9926_v48 = vpop.permute.xlu0 %1594 }
  0xe0   : > { %3592 = vperm.xlu1 %8868, %v3327_v45   ;;  %3580 = vperm.xlu0 %8867, %v3326_v46   ;;  %v4310_v46 = vld [vmem:[%s11925_s8 + $0x2c] sm:$0xf] }
  0xe3   : > { %v9934_v51 = vpop.permute.xlu1 %1630  ;;  %v9936_v52 = vpop.permute.xlu0 %1618 }
  0xe4   : > { %3616 = vperm.xlu1 %8868, %v3329_v49   ;;  %3604 = vperm.xlu0 %8867, %v3328_v50   ;;  %v4309_v49 = vld [vmem:[%s11925_s8 + $0x28] sm:$0xf] }
  0xe7   : > { %v9944_v55 = vpop.permute.xlu1 %1654  ;;  %v9946_v56 = vpop.permute.xlu0 %1642 }
  0xe8   : > { %3640 = vperm.xlu1 %8868, %v3331_v53   ;;  %3628 = vperm.xlu0 %8867, %v3330_v54   ;;  %v4312_v54 = vld [vmem:[%s11925_s8 + $0x34] sm:$0xf] }
  0xeb   : > { %v9954_v59 = vpop.permute.xlu1 %1678  ;;  %v9956_v60 = vpop.permute.xlu0 %1666 }
  0xec   : > { %3664 = vperm.xlu1 %8868, %v3333_v57   ;;  %3652 = vperm.xlu0 %8867, %v3332_v58   ;;  %v4311_v57 = vld [vmem:[%s11925_s8 + $0x30] sm:$0xf] }
  0xef   : > { %v9964_v63 = vpop.permute.xlu1 %1702  ;;  %v9966_v0 = vpop.permute.xlu0 %1690 }
  0xf0   : > { %3688 = vperm.xlu1 %8868, %v3335_v61   ;;  %3676 = vperm.xlu0 %8867, %v3334_v62   ;;  %v4314_v62 = vld [vmem:[%s11925_s8 + $0x3c] sm:$0xf] }
  0xf3   : > { %v9974_v3 = vpop.permute.xlu1 %1726  ;;  %v9976_v4 = vpop.permute.xlu0 %1714 }
  0xf4   : > { %3712 = vperm.xlu1 %8868, %v3337_v1   ;;  %3700 = vperm.xlu0 %8867, %v3336_v2   ;;  %v4313_v1 = vld [vmem:[%s11925_s8 + $0x38] sm:$0xf] }
  0xf7   : > { %v9984_v9 = vpop.permute.xlu1 %2359  ;;  %v9986_v12 = vpop.permute.xlu0 %2347 }
  0xf8   : > { %11947 = vst [vmem:[#allocation4_spill] sm:$0xff] %v9984_v9  ;;  %11948 = vst [vmem:[#allocation5_spill] sm:$0xff] %v9986_v12  ;;  %4345 = vperm.xlu1 %8868, %v4300_v5   ;;  %4333 = vperm.xlu0 %8867, %v4299_v8   ;;  %v4316_v8 = vld [vmem:[%s11925_s8 + $0x44] sm:$0xf] }
  0xf9   : > { %v6646_v9 = vld [vmem:[%s11929_s12 + $0x24] sm:$0xf] }
  0xfb   : > { %v9994_v17 = vpop.permute.xlu1 %2383  ;;  %v9996_v20 = vpop.permute.xlu0 %2371 }
  0xfc   : > { %11949 = vst [vmem:[#allocation6_spill] sm:$0xff] %v9994_v17  ;;  %11950 = vst [vmem:[#allocation7_spill] sm:$0xff] %v9996_v20  ;;  %4369 = vperm.xlu1 %8868, %v4302_v13   ;;  %4357 = vperm.xlu0 %8867, %v4301_v16   ;;  %v4315_v13 = vld [vmem:[%s11925_s8 + $0x40] sm:$0xf]  ;;  %v6642_v17 = vld [vmem:[%s11929_s12 + $0x14] sm:$0xf] }
  0xff   : > { %v10004_v25 = vpop.permute.xlu1 %2407  ;;  %v10006_v28 = vpop.permute.xlu0 %2395 }
 0x100   : > { %11951 = vst [vmem:[#allocation8_spill] sm:$0xff] %v10004_v25  ;;  %11952 = vst [vmem:[#allocation9_spill] sm:$0xff] %v10006_v28  ;;  %4393 = vperm.xlu1 %8868, %v4304_v21   ;;  %4381 = vperm.xlu0 %8867, %v4303_v24   ;;  %v4318_v24 = vld [vmem:[%s11925_s8 + $0x4c] sm:$0xf] }
 0x103   : > { %v10014_v33 = vpop.permute.xlu1 %2431  ;;  %v10016_v37 = vpop.permute.xlu0 %2419 }
 0x104   : > { %11953 = vst [vmem:[#allocation10_spill] sm:$0xff] %v10014_v33  ;;  %11954 = vst [vmem:[#allocation11_spill] sm:$0xff] %v10016_v37  ;;  %4417 = vperm.xlu1 %8868, %v4306_v29   ;;  %4405 = vperm.xlu0 %8867, %v4305_v32   ;;  %v4317_v29 = vld [vmem:[%s11925_s8 + $0x48] sm:$0xf] }
 0x107   : > { %v10024_v42 = vpop.permute.xlu1 %2455  ;;  %v10026_v45 = vpop.permute.xlu0 %2443 }
 0x108   : > { %11955 = vst [vmem:[#allocation12_spill] sm:$0xff] %v10024_v42  ;;  %11956 = vst [vmem:[#allocation13_spill] sm:$0xff] %v10026_v45  ;;  %4441 = vperm.xlu1 %8868, %v4308_v38   ;;  %4429 = vperm.xlu0 %8867, %v4307_v41   ;;  %v4320_v41 = vld [vmem:[%s11925_s8 + $0x54] sm:$0xf] }
 0x10b   : > { %v10034_v50 = vpop.permute.xlu1 %2479  ;;  %v10036_v53 = vpop.permute.xlu0 %2467 }
 0x10c   : > { %11957 = vst [vmem:[#allocation14_spill] sm:$0xff] %v10034_v50  ;;  %11958 = vst [vmem:[#allocation15_spill] sm:$0xff] %v10036_v53  ;;  %4465 = vperm.xlu1 %8868, %v4310_v46   ;;  %4453 = vperm.xlu0 %8867, %v4309_v49   ;;  %v4319_v46 = vld [vmem:[%s11925_s8 + $0x50] sm:$0xf] }
 0x10f   : > { %v10044_v58 = vpop.permute.xlu1 %2503  ;;  %v10046_v61 = vpop.permute.xlu0 %2491 }
 0x110   : > { %11959 = vst [vmem:[#allocation16_spill] sm:$0xff] %v10044_v58  ;;  %11960 = vst [vmem:[#allocation17_spill] sm:$0xff] %v10046_v61  ;;  %4489 = vperm.xlu1 %8868, %v4312_v54   ;;  %4477 = vperm.xlu0 %8867, %v4311_v57   ;;  %v4322_v57 = vld [vmem:[%s11925_s8 + $0x5c] sm:$0xf]  ;;  %v5663_v61 = vld [vmem:[%s11927_s10 + $0x4c] sm:$0xf] }
 0x113   : > { %v10054_v2 = vpop.permute.xlu1 %2527  ;;  %v10056_v5 = vpop.permute.xlu0 %2515 }
 0x114   : > { %11961 = vst [vmem:[#allocation18_spill] sm:$0xff] %v10054_v2  ;;  %11962 = vst [vmem:[#allocation19_spill] sm:$0xff] %v10056_v5  ;;  %4513 = vperm.xlu1 %8868, %v4314_v62   ;;  %4501 = vperm.xlu0 %8867, %v4313_v1   ;;  %v4321_v62 = vld [vmem:[%s11925_s8 + $0x58] sm:$0xf] }
 0x117   : > { %v10064_v16 = vpop.permute.xlu1 %2551  ;;  %v10066_v21 = vpop.permute.xlu0 %2539 }
 0x118   : > { %11963 = vst [vmem:[#allocation20_spill] sm:$0xff] %v10064_v16  ;;  %11964 = vst [vmem:[#allocation21_spill] sm:$0xff] %v10066_v21  ;;  %4537 = vperm.xlu1 %8868, %v4316_v8   ;;  %4525 = vperm.xlu0 %8867, %v4315_v13   ;;  %v4324_v13 = vld [vmem:[%s11925_s8 + $0x64] sm:$0xf] }
 0x11b   : > { %v10074_v32 = vpop.permute.xlu1 %2575  ;;  %v10076_v38 = vpop.permute.xlu0 %2563 }
 0x11c   : > { %11965 = vst [vmem:[#allocation22_spill] sm:$0xff] %v10074_v32  ;;  %11966 = vst [vmem:[#allocation23_spill] sm:$0xff] %v10076_v38  ;;  %4561 = vperm.xlu1 %8868, %v4318_v24   ;;  %4549 = vperm.xlu0 %8867, %v4317_v29   ;;  %v4323_v24 = vld [vmem:[%s11925_s8 + $0x60] sm:$0xf] }
 0x11f   : > { %v10084_v49 = vpop.permute.xlu1 %2599  ;;  %v10086_v54 = vpop.permute.xlu0 %2587 }
 0x120   : > { %11967 = vst [vmem:[#allocation24_spill] sm:$0xff] %v10084_v49  ;;  %11968 = vst [vmem:[#allocation25_spill] sm:$0xff] %v10086_v54  ;;  %4585 = vperm.xlu1 %8868, %v4320_v41   ;;  %4573 = vperm.xlu0 %8867, %v4319_v46   ;;  %v4326_v46 = vld [vmem:[%s11925_s8 + $0x6c] sm:$0xf] }
 0x123   : > { %v10094_v1 = vpop.permute.xlu1 %2623  ;;  %v10096_v8 = vpop.permute.xlu0 %2611 }
 0x124   : > { %11969 = vst [vmem:[#allocation26_spill] sm:$0xff] %v10094_v1  ;;  %11970 = vst [vmem:[#allocation27_spill] sm:$0xff] %v10096_v8  ;;  %4609 = vperm.xlu1 %8868, %v4322_v57   ;;  %4597 = vperm.xlu0 %8867, %v4321_v62   ;;  %v4325_v57 = vld [vmem:[%s11925_s8 + $0x68] sm:$0xf]  ;;  %v11938_v1 = vlaneseq }
 0x127   : > { %v10104_v29 = vpop.permute.xlu1 %2647  ;;  %v10106_v41 = vpop.permute.xlu0 %2635 }
 0x128   : > { %11971 = vst [vmem:[#allocation28_spill] sm:$0xff] %v10104_v29  ;;  %11972 = vst [vmem:[#allocation29_spill] sm:$0xff] %v10106_v41  ;;  %4633 = vperm.xlu1 %8868, %v4324_v13   ;;  %4621 = vperm.xlu0 %8867, %v4323_v24   ;;  %v4328_v41 = vld [vmem:[%s11925_s8 + $0x74] sm:$0xf]  ;;  %v4327_v13 = vld [vmem:[%s11925_s8 + $0x70] sm:$0xf] }
 0x12b   : > { %v10114_v62 = vpop.permute.xlu1 %2671  ;;  %v10116_v35 = vpop.permute.xlu0 %2659 }
 0x12c   : > { %11973 = vst [vmem:[#allocation30_spill] sm:$0xff] %v10114_v62  ;;  %11974 = vst [vmem:[#allocation31_spill] sm:$0xff] %v10116_v35  ;;  %4657 = vperm.xlu1 %8868, %v4326_v46   ;;  %4645 = vperm.xlu0 %8867, %v4325_v57   ;;  %v4330_v35 = vld [vmem:[%s11925_s8 + $0x7c] sm:$0xf]  ;;  %v4329_v46 = vld [vmem:[%s11925_s8 + $0x78] sm:$0xf] }
 0x12f   : > { %v10124_v24 = vpop.permute.xlu1 %2695  ;;  %v10126_v29 = vpop.permute.xlu0 %2683 }
 0x130   : > { %11975 = vst [vmem:[#allocation32_spill] sm:$0xff] %v10124_v24  ;;  %11976 = vst [vmem:[#allocation33_spill] sm:$0xff] %v10126_v29  ;;  %4681 = vperm.xlu1 %8868, %v4328_v41   ;;  %4669 = vperm.xlu0 %8867, %v4327_v13   ;;  %v8951_v29 = vld [vmem:[%s11920_s3 + $0x4] ss:$8 sps:$4 sm:$0xff]   ;;  %v5644_v13 = vld [vmem:[%s11927_s10] sm:$0xf] }
 0x131   : > { %v5645_v41 = vld [vmem:[%s11927_s10 + $0x4] sm:$0xf]  ;;  %2120 = vmatprep.mubr.bf16.mxu1 %v8951_v29  ;;  %v5649_v29 = vld [vmem:[%s11927_s10 + $0x14] sm:$0xf] }
 0x133   : > { %v10134_v57 = vpop.permute.xlu1 %2719  ;;  %v10136_v62 = vpop.permute.xlu0 %2707 }
 0x134   : > { %11977 = vst [vmem:[#allocation34_spill] sm:$0xff] %v10134_v57  ;;  %11978 = vst [vmem:[#allocation35_spill] sm:$0xff] %v10136_v62  ;;  %4705 = vperm.xlu1 %8868, %v4330_v35   ;;  %4693 = vperm.xlu0 %8867, %v4329_v46   ;;  %v5647_v35 = vld [vmem:[%s11927_s10 + $0xc] sm:$0xf]  ;;  %v5646_v46 = vld [vmem:[%s11927_s10 + $0x8] sm:$0xf] }
 0x137   : > { %v10147_v24 = vpop.permute.xlu1 %3352  ;;  %v10149_v57 = vpop.permute.xlu0 %3340 }
 0x138   : > { %11979 = vst [vmem:[#allocation36_spill] sm:$0xff] %v10147_v24  ;;  %11980 = vst [vmem:[#allocation37_spill] sm:$0xff] %v10149_v57  ;;  %5690 = vperm.xlu1 %8868, %v5645_v41   ;;  %5678 = vperm.xlu0 %8867, %v5644_v13   ;;  %v5648_v41 = vld [vmem:[%s11927_s10 + $0x10] sm:$0xf]  ;;  %v9294_v24 = vmov 839922192  }
 0x13b   : > { %v10157_v62 = vpop.permute.xlu1 %3376  ;;  %v10159_v8 = vpop.permute.xlu0 %3364 }
 0x13c   : > { %11981 = vst [vmem:[#allocation38_spill] sm:$0xff] %v10157_v62  ;;  %11982 = vst [vmem:[#allocation39_spill] sm:$0xff] %v10159_v8  ;;  %5714 = vperm.xlu1 %8868, %v5647_v35   ;;  %5702 = vperm.xlu0 %8867, %v5646_v46   ;;  %v1358_v62 = vunpack.c.l.s4 %v9294_v24  ;;  %v5651_v35 = vld [vmem:[%s11927_s10 + $0x1c] sm:$0xf]  ;;  %v5650_v46 = vld [vmem:[%s11927_s10 + $0x18] sm:$0xf] }
 0x13d   : > { %v5653_v24 = vld [vmem:[%s11927_s10 + $0x24] sm:$0xf] }
 0x13f   : > { %v10167_v13 = vpop.permute.xlu1 %3400  ;;  %v10169_v57 = vpop.permute.xlu0 %3388 }
 0x140   : > { %11983 = vst [vmem:[#allocation40_spill] sm:$0xff] %v10167_v13  ;;  %11984 = vst [vmem:[#allocation41_spill] sm:$0xff] %v10169_v57  ;;  %5738 = vperm.xlu1 %8868, %v5649_v29   ;;  %5726 = vperm.xlu0 %8867, %v5648_v41   ;;  %v1359_v57 = vunpack.c.0.s8 %v1358_v62  ;;  %v10182_v29 = vshrl.u32 %v11938_v1, 7  ;;  %v5652_v41 = vld [vmem:[%s11927_s10 + $0x20] sm:$0xf] }
 0x141   : > { %v5655_v62 = vld [vmem:[%s11927_s10 + $0x2c] sm:$0xf]  ;;  %v5656_v1 = vld [vmem:[%s11927_s10 + $0x30] sm:$0xf]  ;;  %v5658_v13 = vld [vmem:[%s11927_s10 + $0x38] sm:$0xf] }
 0x142   : > { %11987 = vst [vmem:[#allocation44_spill] sm:$0xff] %v10182_v29 }
 0x143   : > { %v10177_v8 = vpop.permute.xlu1 %3424  ;;  %v10179_v54 = vpop.permute.xlu0 %3412 }
 0x144   : > { %11985 = vst [vmem:[#allocation42_spill] sm:$0xff] %v10177_v8  ;;  %11986 = vst [vmem:[#allocation43_spill] sm:$0xff] %v10179_v54  ;;  %5762 = vperm.xlu1 %8868, %v5651_v35   ;;  %5750 = vperm.xlu0 %8867, %v5650_v46   ;;  %v10191_v8 = vsub.s32 %v1359_v57, %v10182_v29  ;;  %v5654_v46 = vld [vmem:[%s11927_s10 + $0x28] sm:$0xf] }
 0x146   : > { %v1375_v57 = vrot.slane %v9836_v11, %v10191_v8  ;;  %v5659_v11 = vld [vmem:[%s11927_s10 + $0x3c] sm:$0xf]  ;;  %v1387_v32 = vrot.slane %v9824_v6, %v10191_v8  ;;  %v1399_v21 = vrot.slane %v9834_v10, %v10191_v8  ;;  %v11994_v10 = vmov 0  }
 0x147   : > { %v10193_v54 = vpop.permute.xlu1 %3448  ;;  %v10195_v35 = vpop.permute.xlu0 %3436 }
 0x148   : > { %5786 = vperm.xlu1 %8868, %v5653_v24   ;;  %5774 = vperm.xlu0 %8867, %v5652_v41   ;;  %11988 = vst [vmem:[#allocation45_spill] sm:$0xff] %v10193_v54  ;;  %11989 = vst [vmem:[#allocation46_spill] sm:$0xff] %v10195_v35  ;;  %v1363_v24 = vrot.slane %v9826_v7, %v10191_v8  ;;  %v5657_v41 = vld [vmem:[%s11927_s10 + $0x34] sm:$0xf] }
 0x14a   : > { %v8436_v7 = vcombine.low %v1363_v24, %v1375_v57 }
 0x14b   : > { %v10213_v29 = vpop.permute.xlu1 %3472  ;;  %v10215_v35 = vpop.permute.xlu0 %3460 }
 0x14c   : > { %5810 = vperm.xlu1 %8868, %v5655_v62   ;;  %5798 = vperm.xlu0 %8867, %v5654_v46   ;;  %11990 = vst [vmem:[#allocation47_spill] sm:$0xff] %v10213_v29  ;;  %11991 = vst [vmem:[#allocation48_spill] sm:$0xff] %v10215_v35 }
 0x150   : > { %v1129_v62 = vpop.f32.mrb[0].mxu0  ;;  %5834 = vperm.xlu1 %8868, %v5657_v41   ;;  %5822 = vperm.xlu0 %8867, %v5656_v1   ;;  %v10217_v46 = vpop.f32.mrb[0].mxu1  ;;  %v8437_v1 = vcombine.low %v1387_v32, %v1399_v21  ;;  %v1423_v32 = vrot.slane %v9844_v14, %v10191_v8 }
 0x151   : > { %v1131_v54 = vpop.f32.mrb[1].mxu0  ;;  %v10225_v49 = vpop.f32.mrb[1].mxu1 }
 0x152   : > { %v1133_v29 = vpop.f32.mrb[2].mxu0  ;;  %v10227_v38 = vpop.f32.mrb[2].mxu1 }
 0x153   : > { %v1288_v35 = vpack.c.bf16 %v1133_v29, %v1129_v62  ;;  %v1135_v41 = vpop.f32.mrb[3].mxu0  ;;  %v10231_v57 = vpop.f32.mrb[3].mxu1  ;;  %v5661_v29 = vld [vmem:[%s11927_s10 + $0x44] sm:$0xf]  ;;  %v5660_v62 = vld [vmem:[%s11927_s10 + $0x40] sm:$0xf] }
 0x154   : > { %v1289_v24 = vpack.c.bf16 %v1135_v41, %v1131_v54  ;;  %5858 = vperm.xlu1 %8868, %v5659_v11   ;;  %5846 = vperm.xlu0 %8867, %v5658_v13   ;;  %v10245_v11 = vpop.permute.xlu1 %3496  ;;  %v10247_v41 = vpop.permute.xlu0 %3484 }
 0x155   : > { %v1832_v16 = vadd.bf16 %v8436_v7, %v1288_v35  ;;  %11992 = vst [vmem:[#allocation49_spill] sm:$0xff] %v10245_v11  ;;  %11993 = vst [vmem:[#allocation50_spill] sm:$0xff] %v10247_v41  ;;  %v1411_v41 = vrot.slane %v9846_v15, %v10191_v8 }
 0x156   : > { %v1833_v13 = vadd.bf16 %v8436_v7, %v1289_v24  ;;  %v5662_v7 = vld [vmem:[%s11927_s10 + $0x48] sm:$0xf] }
 0x157   : > { %v1864_v5 = vmax.bf16 %v11994_v10, %v1832_v16 }
 0x158   : > { %v1139_v6 = vpop.f32.mrb[4].mxu0  ;;  %5882 = vperm.xlu1 %8868, %v5661_v29   ;;  %5870 = vperm.xlu0 %8867, %v5660_v62   ;;  %v1865_v35 = vmax.bf16 %v11994_v10, %v1833_v13  ;;  %v10257_v24 = vpop.f32.mrb[4].mxu1 }
 0x159   : > { %v1141_v2 = vpop.f32.mrb[5].mxu0  ;;  %v10259_v29 = vpop.f32.mrb[5].mxu1 }
 0x15a   : > { %v1143_v54 = vpop.f32.mrb[6].mxu0  ;;  %2088 = vmatprep.subr.bf16.mxu1 %v1865_v35  ;;  %v10261_v16 = vpop.f32.mrb[6].mxu1  ;;  %v5665_v35 = vld [vmem:[%s11927_s10 + $0x54] sm:$0xf] }
 0x15b   : > { %v1290_v62 = vpack.c.bf16 %v1143_v54, %v1139_v6  ;;  %v1145_v13 = vpop.f32.mrb[7].mxu0  ;;  %2089 = vmatpush1.bf16.msra.mxu1 %v1864_v5  ;;  %v5664_v5 = vld [vmem:[%s11927_s10 + $0x50] sm:$0xf]  ;;  %v10279_v6 = vpop.permute.xlu1 %3520 }
 0x15c   : > { %v1291_v21 = vpack.c.bf16 %v1145_v13, %v1141_v2  ;;  %5906 = vperm.xlu1 %8868, %v5663_v61   ;;  %5894 = vperm.xlu0 %8867, %v5662_v7   ;;  %v10275_v2 = vpop.f32.mrb[7].mxu1  ;;  %11995 = vst [vmem:[#allocation51_spill] sm:$0xff] %v10279_v6  ;;  %v10281_v15 = vpop.permute.xlu0 %3508  ;;  %v8438_v13 = vcombine.low %v1411_v41, %v1423_v32 }
 0x15d   : > { %v1834_v11 = vadd.bf16 %v8437_v1, %v1290_v62  ;;  %11996 = vst [vmem:[#allocation52_spill] sm:$0xff] %v10281_v15  ;;  %v1447_v32 = vrot.slane %v9854_v18, %v10191_v8  ;;  %v1435_v15 = vrot.slane %v9856_v19, %v10191_v8 }
 0x15e   : > { %v1835_v54 = vadd.bf16 %v8437_v1, %v1291_v21  ;;  %v5667_v1 = vld [vmem:[%s11927_s10 + $0x5c] sm:$0xf]  ;;  %v5666_v21 = vld [vmem:[%s11927_s10 + $0x58] sm:$0xf] }
 0x15f   : > { %v1866_v58 = vmax.bf16 %v11994_v10, %v1834_v11 }
 0x160   : > { %v1149_v7 = vpop.f32.mrb[8].mxu0  ;;  %5930 = vperm.xlu1 %8868, %v5665_v35   ;;  %5918 = vperm.xlu0 %8867, %v5664_v5   ;;  %v1867_v62 = vmax.bf16 %v11994_v10, %v1835_v54  ;;  %v10285_v61 = vpop.f32.mrb[8].mxu1 }
 0x161   : > { %v1151_v53 = vpop.f32.mrb[9].mxu0  ;;  %v10293_v35 = vpop.f32.mrb[9].mxu1 }
 0x162   : > { %v1153_v14 = vpop.f32.mrb[10].mxu0  ;;  %2090 = vmatprep.subr.bf16.mxu1 %v1867_v62  ;;  %v10295_v11 = vpop.f32.mrb[10].mxu1 }
 0x163   : > { %v1292_v5 = vpack.c.bf16 %v1153_v14, %v1149_v7  ;;  %v1155_v54 = vpop.f32.mrb[11].mxu0  ;;  %2091 = vmatpush1.bf16.msra.mxu1 %v1866_v58  ;;  %v10303_v50 = vpop.f32.mrb[11].mxu1  ;;  %v5668_v58 = vld [vmem:[%s11927_s10 + $0x60] sm:$0xf] }
 0x164   : > { %v1293_v41 = vpack.c.bf16 %v1155_v54, %v1151_v53  ;;  %5954 = vperm.xlu1 %8868, %v5667_v1   ;;  %5942 = vperm.xlu0 %8867, %v5666_v21   ;;  %v5669_v53 = vld [vmem:[%s11927_s10 + $0x64] sm:$0xf]  ;;  %v10313_v7 = vpop.permute.xlu1 %3544  ;;  %v10315_v19 = vpop.permute.xlu0 %3532 }
 0x165   : > { %v1836_v6 = vadd.bf16 %v8438_v13, %v1292_v5  ;;  %11997 = vst [vmem:[#allocation53_spill] sm:$0xff] %v10313_v7  ;;  %11998 = vst [vmem:[#allocation54_spill] sm:$0xff] %v10315_v19  ;;  %v8439_v5 = vcombine.low %v1435_v15, %v1447_v32 }
 0x166   : > { %v1837_v14 = vadd.bf16 %v8438_v13, %v1293_v41  ;;  %v5671_v13 = vld [vmem:[%s11927_s10 + $0x6c] sm:$0xf]  ;;  %v5670_v41 = vld [vmem:[%s11927_s10 + $0x68] sm:$0xf] }
 0x167   : > { %v1868_v54 = vmax.bf16 %v11994_v10, %v1836_v6 }
 0x168   : > { %v1159_v1 = vpop.f32.mrb[12].mxu0  ;;  %5978 = vperm.xlu1 %8868, %v5669_v53   ;;  %5966 = vperm.xlu0 %8867, %v5668_v58   ;;  %v1869_v21 = vmax.bf16 %v11994_v10, %v1837_v14  ;;  %v10319_v62 = vpop.f32.mrb[12].mxu1 }
 0x169   : > { %v1161_v45 = vpop.f32.mrb[13].mxu0  ;;  %v10327_v18 = vpop.f32.mrb[13].mxu1 }
 0x16a   : > { %v1163_v53 = vpop.f32.mrb[14].mxu0  ;;  %2092 = vmatprep.subr.bf16.mxu1 %v1869_v21  ;;  %v10329_v14 = vpop.f32.mrb[14].mxu1  ;;  %v5672_v21 = vld [vmem:[%s11927_s10 + $0x70] sm:$0xf] }
 0x16b   : > { %v1294_v58 = vpack.c.bf16 %v1163_v53, %v1159_v1  ;;  %v1165_v15 = vpop.f32.mrb[15].mxu0  ;;  %2093 = vmatpush1.bf16.msra.mxu1 %v1868_v54  ;;  %v10333_v19 = vpop.f32.mrb[15].mxu1  ;;  %v5673_v1 = vld [vmem:[%s11927_s10 + $0x74] sm:$0xf] }
 0x16c   : > { %v1295_v32 = vpack.c.bf16 %v1165_v15, %v1161_v45  ;;  %6002 = vperm.xlu1 %8868, %v5671_v13   ;;  %5990 = vperm.xlu0 %8867, %v5670_v41   ;;  %v1471_v45 = vrot.slane %v9864_v22, %v10191_v8  ;;  %v1459_v13 = vrot.slane %v9866_v23, %v10191_v8  ;;  %v10347_v41 = vpop.permute.xlu1 %3568  ;;  %v10350_v15 = vpop.permute.xlu0 %3556  ;;  %v5675_v22 = vld [vmem:[%s11927_s10 + $0x7c] sm:$0xf]  ;;  %v5674_v23 = vld [vmem:[%s11927_s10 + $0x78] sm:$0xf] }
 0x16d   : > { %v1838_v7 = vadd.bf16 %v8439_v5, %v1294_v58  ;;  %11999 = vst [vmem:[#allocation55_spill] sm:$0xff] %v10347_v41  ;;  %12000 = vst [vmem:[#allocation56_spill] sm:$0xff] %v10350_v15 }
 0x16e   : > { %v1839_v54 = vadd.bf16 %v8439_v5, %v1295_v32 }
 0x16f   : > { %v1870_v6 = vmax.bf16 %v11994_v10, %v1838_v7 }
 0x170   : > { %v1169_v53 = vpop.f32.mrb[16].mxu0  ;;  %6026 = vperm.xlu1 %8868, %v5673_v1   ;;  %6014 = vperm.xlu0 %8867, %v5672_v21   ;;  %v1871_v58 = vmax.bf16 %v11994_v10, %v1839_v54  ;;  %v10353_v42 = vpop.f32.mrb[16].mxu1  ;;  %v8440_v54 = vcombine.low %v1459_v13, %v1471_v45 }
 0x171   : > { %v1171_v5 = vpop.f32.mrb[17].mxu0  ;;  %v10361_v32 = vpop.f32.mrb[17].mxu1 }
 0x172   : > { %2094 = vmatprep.subr.bf16.mxu1 %v1871_v58  ;;  %v1173_v1 = vpop.f32.mrb[18].mxu0  ;;  %v10363_v21 = vpop.f32.mrb[18].mxu1  ;;  %v6638_v58 = vld [vmem:[%s11929_s12 + $0x4] sm:$0xf] }
 0x173   : > { %2095 = vmatpush1.bf16.msra.mxu1 %v1870_v6  ;;  %v1296_v7 = vpack.c.bf16 %v1173_v1, %v1169_v53  ;;  %v1175_v41 = vpop.f32.mrb[19].mxu0  ;;  %v10367_v37 = vpop.f32.mrb[19].mxu1  ;;  %v6637_v6 = vld [vmem:[%s11929_s12] sm:$0xf]  ;;  %v1495_v53 = vrot.slane %v9874_v26, %v10191_v8 }
 0x174   : > { %6050 = vperm.xlu1 %8868, %v5675_v22   ;;  %6038 = vperm.xlu0 %8867, %v5674_v23   ;;  %v1297_v33 = vpack.c.bf16 %v1175_v41, %v1171_v5  ;;  %v1483_v22 = vrot.slane %v9876_v27, %v10191_v8  ;;  %v10383_v5 = vpop.permute.xlu1 %3592  ;;  %v10385_v1 = vpop.permute.xlu0 %3580  ;;  %v6639_v27 = vld [vmem:[%s11929_s12 + $0x8] sm:$0xf] }
 0x175   : > { %v1840_v45 = vadd.bf16 %v8440_v54, %v1296_v7  ;;  %12001 = vst [vmem:[#allocation57_spill] sm:$0xff] %v10383_v5  ;;  %12002 = vst [vmem:[#allocation58_spill] sm:$0xff] %v10385_v1 }
 0x176   : > { %v1841_v13 = vadd.bf16 %v8440_v54, %v1297_v33  ;;  %v6640_v33 = vld [vmem:[%s11929_s12 + $0xc] sm:$0xf]  ;;  %v8441_v28 = vcombine.low %v1483_v22, %v1495_v53  ;;  %v6641_v53 = vld [vmem:[%s11929_s12 + $0x10] sm:$0xf] }
 0x177   : > { %v1872_v26 = vmax.bf16 %v11994_v10, %v1840_v45 }
 0x178   : > { %v1179_v41 = vpop.f32.mrb[20].mxu0  ;;  %v10381_v23 = vpop.f32.mrb[20].mxu1  ;;  %6683 = vperm.xlu1 %8868, %v6638_v58   ;;  %6671 = vperm.xlu0 %8867, %v6637_v6   ;;  %v1873_v15 = vmax.bf16 %v11994_v10, %v1841_v13 }
 0x179   : > { %v1181_v54 = vpop.f32.mrb[21].mxu0  ;;  %v10392_v7 = vpop.f32.mrb[21].mxu1 }
 0x17a   : > { %v1183_v58 = vpop.f32.mrb[22].mxu0  ;;  %v10397_v6 = vpop.f32.mrb[22].mxu1  ;;  %2096 = vmatprep.subr.bf16.mxu1 %v1873_v15 }
 0x17b   : > { %v1298_v1 = vpack.c.bf16 %v1183_v58, %v1179_v41  ;;  %v1185_v5 = vpop.f32.mrb[23].mxu0  ;;  %v10401_v25 = vpop.f32.mrb[23].mxu1  ;;  %2097 = vmatpush1.bf16.msra.mxu1 %v1872_v26  ;;  %v1519_v41 = vrot.slane %v9884_v30, %v10191_v8 }
 0x17c   : > { %6707 = vperm.xlu1 %8868, %v6640_v33   ;;  %v1299_v45 = vpack.c.bf16 %v1185_v5, %v1181_v54  ;;  %6695 = vperm.xlu0 %8867, %v6639_v27   ;;  %v1507_v5 = vrot.slane %v9886_v31, %v10191_v8  ;;  %v10417_v54 = vpop.permute.xlu1 %3616  ;;  %v10419_v27 = vpop.permute.xlu0 %3604  ;;  %v6643_v31 = vld [vmem:[%s11929_s12 + $0x18] sm:$0xf] }
 0x17d   : > { %v1842_v15 = vadd.bf16 %v8441_v28, %v1298_v1  ;;  %12004 = vst [vmem:[#allocation60_spill] sm:$0xff] %v10417_v54  ;;  %12005 = vst [vmem:[#allocation61_spill] sm:$0xff] %v10419_v27 }
 0x17e   : > { %v1843_v22 = vadd.bf16 %v8441_v28, %v1299_v45  ;;  %v6644_v28 = vld [vmem:[%s11929_s12 + $0x1c] sm:$0xf] }
 0x17f   : > { %v1874_v30 = vmax.bf16 %v11994_v10, %v1842_v15 }
 0x180   : > { %v1189_v33 = vpop.f32.mrb[24].mxu0  ;;  %v10415_v26 = vpop.f32.mrb[24].mxu1  ;;  %6731 = vperm.xlu1 %8868, %v6642_v17   ;;  %6719 = vperm.xlu0 %8867, %v6641_v53   ;;  %v1875_v1 = vmax.bf16 %v11994_v10, %v1843_v22  ;;  %v8442_v53 = vcombine.low %v1507_v5, %v1519_v41  ;;  %v6645_v41 = vld [vmem:[%s11929_s12 + $0x20] sm:$0xf]  ;;  %v1567_v5 = vrot.slane %v9904_v39, %v10191_v8 }
 0x181   : > { %12003 = vst [vmem:[#allocation59_spill] sm:$0xff] %v10415_v26  ;;  %v1191_v58 = vpop.f32.mrb[25].mxu0  ;;  %v10426_v45 = vpop.f32.mrb[25].mxu1 }
 0x182   : > { %v1193_v17 = vpop.f32.mrb[26].mxu0  ;;  %v10431_v13 = vpop.f32.mrb[26].mxu1  ;;  %2098 = vmatprep.subr.bf16.mxu1 %v1875_v1 }
 0x183   : > { %12006 = vst [vmem:[#allocation62_spill] sm:$0xff] %v10431_v13  ;;  %v1300_v20 = vpack.c.bf16 %v1193_v17, %v1189_v33  ;;  %v1195_v27 = vpop.f32.mrb[27].mxu0  ;;  %v10435_v54 = vpop.f32.mrb[27].mxu1  ;;  %2099 = vmatpush1.bf16.msra.mxu1 %v1874_v30  ;;  %v1555_v33 = vrot.slane %v9906_v40, %v10191_v8  ;;  %v6648_v40 = vld [vmem:[%s11929_s12 + $0x2c] sm:$0xf] }
 0x184   : > { %6755 = vperm.xlu1 %8868, %v6644_v28   ;;  %v1301_v15 = vpack.c.bf16 %v1195_v27, %v1191_v58  ;;  %6743 = vperm.xlu0 %8867, %v6643_v31   ;;  %v10449_v27 = vpop.permute.xlu1 %3640  ;;  %v10451_v28 = vpop.permute.xlu0 %3628  ;;  %v1543_v58 = vrot.slane %v9894_v34, %v10191_v8  ;;  %v6647_v34 = vld [vmem:[%s11929_s12 + $0x28] sm:$0xf] }
 0x185   : > { %v1844_v1 = vadd.bf16 %v8442_v53, %v1300_v20  ;;  %12007 = vst [vmem:[#allocation63_spill] sm:$0xff] %v10449_v27  ;;  %12008 = vst [vmem:[#allocation64_spill] sm:$0xff] %v10451_v28  ;;  %v1531_v20 = vrot.slane %v9896_v36, %v10191_v8  ;;  %v8444_v36 = vcombine.low %v1555_v33, %v1567_v5  ;;  %v6650_v33 = vld [vmem:[%s11929_s12 + $0x34] sm:$0xf] }
 0x186   : > { %v1845_v30 = vadd.bf16 %v8442_v53, %v1301_v15 }
 0x187   : > { %v1876_v22 = vmax.bf16 %v11994_v10, %v1844_v1  ;;  %v8443_v28 = vcombine.low %v1531_v20, %v1543_v58  ;;  %v1615_v58 = vrot.slane %v9924_v47, %v10191_v8  ;;  %v1603_v20 = vrot.slane %v9926_v48, %v10191_v8  ;;  %v6652_v48 = vld [vmem:[%s11929_s12 + $0x3c] sm:$0xf] }
 0x188   : > { %v1199_v31 = vpop.f32.mrb[28].mxu0  ;;  %v10457_v17 = vpop.f32.mrb[28].mxu1  ;;  %6779 = vperm.xlu1 %8868, %v6646_v9   ;;  %6767 = vperm.xlu0 %8867, %v6645_v41   ;;  %v1877_v39 = vmax.bf16 %v11994_v10, %v1845_v30  ;;  %v1591_v9 = vrot.slane %v9914_v43, %v10191_v8  ;;  %v1579_v41 = vrot.slane %v9916_v44, %v10191_v8 }
 0x189   : > { %v1201_v53 = vpop.f32.mrb[29].mxu0  ;;  %v10464_v15 = vpop.f32.mrb[29].mxu1 }
 0x18a   : > { %v1203_v30 = vpop.f32.mrb[30].mxu0  ;;  %v10473_v12 = vpop.f32.mrb[30].mxu1  ;;  %2100 = vmatprep.subr.bf16.mxu1 %v1877_v39  ;;  %v8445_v39 = vcombine.low %v1579_v41, %v1591_v9  ;;  %v12011_v41 = vpack.c.bf16 %v10275_v2, %v10259_v29  ;;  %v12012_v29 = vpack.c.bf16 %v10261_v16, %v10257_v24  ;;  %v1651_v24 = vrot.slane %v9946_v56, %v10191_v8 }
 0x18b   : > { %v1302_v1 = vpack.c.bf16 %v1203_v30, %v1199_v31  ;;  %v1205_v26 = vpop.f32.mrb[31].mxu0  ;;  %v10477_v13 = vpop.f32.mrb[31].mxu1  ;;  %2101 = vmatpush1.bf16.msra.mxu1 %v1876_v22  ;;  %v8446_v30 = vcombine.low %v1603_v20, %v1615_v58  ;;  %v12013_v20 = vpack.c.bf16 %v10303_v50, %v10293_v35  ;;  %v12014_v35 = vpack.c.bf16 %v10295_v11, %v10285_v61  ;;  %v6658_v11 = vld [vmem:[%s11929_s12 + $0x54] sm:$0xf] }
 0x18c   : > { %6803 = vperm.xlu1 %8868, %v6648_v40   ;;  %v10479_v5 = vpop.permute.xlu0 %3652  ;;  %v1303_v43 = vpack.c.bf16 %v1205_v26, %v1201_v53  ;;  %v1319_v44 = vpack.c.bf16 %v10477_v13, %v10464_v15  ;;  %6791 = vperm.xlu0 %8867, %v6647_v34   ;;  %v10490_v31 = vpop.permute.xlu1 %3664  ;;  %v6649_v26 = vld [vmem:[%s11929_s12 + $0x30] sm:$0xf]  ;;  %v12009_v40 = vpack.c.bf16 %v10231_v57, %v10225_v49  ;;  %v6651_v49 = vld [vmem:[%s11929_s12 + $0x38] sm:$0xf] }
 0x18d   : > { %v1846_v22 = vadd.bf16 %v8443_v28, %v1302_v1  ;;  %v12010_v1 = vpack.c.bf16 %v10227_v38, %v10217_v46  ;;  %v1639_v57 = vrot.slane %v9934_v51, %v10191_v8  ;;  %v6654_v51 = vld [vmem:[%s11929_s12 + $0x44] sm:$0xf]  ;;  %v1850_v2 = vadd.bf16 %v8445_v39, %v12012_v29  ;;  %v6665_v13 = vld [vmem:[%s11929_s12 + $0x70] sm:$0xf] }
 0x18e   : > { %v1849_v53 = vadd.bf16 %v8444_v36, %v12009_v40  ;;  %v1847_v34 = vadd.bf16 %v8443_v28, %v1303_v43  ;;  %v1627_v28 = vrot.slane %v9936_v52, %v10191_v8  ;;  %v1851_v43 = vadd.bf16 %v8445_v39, %v12011_v41  ;;  %v6656_v39 = vld [vmem:[%s11929_s12 + $0x4c] sm:$0xf] }
 0x18f   : > { %v1848_v27 = vadd.bf16 %v8444_v36, %v12010_v1  ;;  %v1878_v9 = vmax.bf16 %v11994_v10, %v1846_v22  ;;  %v6653_v36 = vld [vmem:[%s11929_s12 + $0x40] sm:$0xf]  ;;  %v1853_v22 = vadd.bf16 %v8446_v30, %v12013_v20  ;;  %v1882_v50 = vmax.bf16 %v11994_v10, %v1850_v2 }
 0x190   : > { %6827 = vperm.xlu1 %8868, %v6650_v33   ;;  %6815 = vperm.xlu0 %8867, %v6649_v26   ;;  %v1879_v47 = vmax.bf16 %v11994_v10, %v1847_v34  ;;  %v10516_v33 = vpop.permute.xlu0 %3676  ;;  %v1881_v38 = vmax.bf16 %v11994_v10, %v1849_v53  ;;  %v10519_v46 = vpop.permute.xlu1 %3688  ;;  %v8447_v58 = vcombine.low %v1627_v28, %v1639_v57 }
 0x191   : > { %v1880_v52 = vmax.bf16 %v11994_v10, %v1848_v27  ;;  %v1883_v26 = vmax.bf16 %v11994_v10, %v1851_v43  ;;  %v1663_v27 = vrot.slane %v9944_v55, %v10191_v8  ;;  %v1852_v40 = vadd.bf16 %v8446_v30, %v12014_v35  ;;  %v6655_v55 = vld [vmem:[%s11929_s12 + $0x48] sm:$0xf] }
 0x192   : > { %2102 = vmatprep.subr.bf16.mxu1 %v1879_v47  ;;  %v12015_v56 = vpack.c.bf16 %v10333_v19, %v10327_v18  ;;  %v1885_v47 = vmax.bf16 %v11994_v10, %v1853_v22  ;;  %v1687_v1 = vrot.slane %v9954_v59, %v10191_v8  ;;  %v1675_v61 = vrot.slane %v9956_v60, %v10191_v8 }
 0x193   : > { %2103 = vmatpush1.bf16.msra.mxu1 %v1878_v9  ;;  %v1884_v18 = vmax.bf16 %v11994_v10, %v1852_v40  ;;  %v12016_v19 = vpack.c.bf16 %v10329_v14, %v10319_v62  ;;  %v6657_v9 = vld [vmem:[%s11929_s12 + $0x50] sm:$0xf]  ;;  %v12017_v59 = vpack.c.bf16 %v10367_v37, %v10361_v32  ;;  %v1711_v62 = vrot.slane %v9964_v63, %v10191_v8  ;;  %v6660_v37 = vld [vmem:[%s11929_s12 + $0x5c] sm:$0xf] }
 0x194   : > { %6851 = vperm.xlu1 %8868, %v6652_v48   ;;  %2104 = vmatprep.subr.bf16.mxu1 %v1881_v38  ;;  %v10539_v16 = vpop.permute.xlu0 %3700  ;;  %v10548_v53 = vpop.permute.xlu1 %3712  ;;  %v1855_v34 = vadd.bf16 %v8447_v58, %v12015_v56  ;;  %v8448_v48 = vcombine.low %v1651_v24, %v1663_v27  ;;  %v8449_v41 = vcombine.low %v1675_v61, %v1687_v1  ;;  %v12022_v24 = vld [vmem:[#allocation62_spill] sm:$0xff]  ;;  %v6668_v61 = vld [vmem:[%s11929_s12 + $0x7c] sm:$0xf] }
 0x195   : > { %6839 = vperm.xlu0 %8867, %v6651_v49   ;;  %v1854_v30 = vadd.bf16 %v8447_v58, %v12016_v19  ;;  %v1699_v14 = vrot.slane %v9966_v0, %v10191_v8  ;;  %v12018_v43 = vpack.c.bf16 %v10363_v21, %v10353_v42  ;;  %v12019_v63 = vpack.c.bf16 %v10401_v25, %v10392_v7  ;;  %v6662_v25 = vld [vmem:[%s11929_s12 + $0x64] sm:$0xf]  ;;  %v8952_v19 = vld [vmem:[%s11920_s3 + $0x14] ss:$8 sps:$4 sm:$0xff]  }
 0x196   : > { %v1857_v60 = vadd.bf16 %v8448_v48, %v12017_v59  ;;  %v1887_v57 = vmax.bf16 %v11994_v10, %v1855_v34  ;;  %v1735_v2 = vrot.slane %v9974_v3, %v10191_v8  ;;  %v1723_v42 = vrot.slane %v9976_v4, %v10191_v8  ;;  %v6661_v3 = vld [vmem:[%s11929_s12 + $0x60] sm:$0xf]  ;;  %v6666_v34 = vld [vmem:[%s11929_s12 + $0x74] sm:$0xf] }
 0x197   : > { %2105 = vmatpush1.bf16.msra.mxu1 %v1880_v52  ;;  %v1886_v32 = vmax.bf16 %v11994_v10, %v1854_v30  ;;  %v1856_v38 = vadd.bf16 %v8448_v48, %v12018_v43  ;;  %v1859_v0 = vadd.bf16 %v8449_v41, %v12019_v63  ;;  %v8450_v29 = vcombine.low %v1699_v14, %v1711_v62  ;;  %v7631_v30 = vld [vmem:[%s11931_s14 + $0x4] sm:$0xf]  ;;  %v8954_v62 = vld [vmem:[%s11920_s3 + $0x10] ss:$8 sps:$4 sm:$0xff]  }
 0x198   : > { %6875 = vperm.xlu1 %8868, %v6654_v51   ;;  %2106 = vmatprep.subr.bf16.mxu1 %v1883_v26  ;;  %v10574_v49 = vpop.permute.xlu0 %4333  ;;  %v10577_v28 = vpop.permute.xlu1 %4345  ;;  %v6659_v51 = vld [vmem:[%s11929_s12 + $0x58] sm:$0xf]  ;;  %v1889_v52 = vmax.bf16 %v11994_v10, %v1857_v60  ;;  %v12021_v4 = vpack.c.bf16 %v10435_v54, %v10426_v45  ;;  %v8451_v27 = vcombine.low %v1723_v42, %v1735_v2  ;;  %v6663_v54 = vld [vmem:[%s11929_s12 + $0x68] sm:$0xf]  ;;  %v8955_v14 = vld [vmem:[%s11920_s3 + $0x24] ss:$8 sps:$4 sm:$0xff]  }
 0x199   : > { %6863 = vperm.xlu0 %8867, %v6653_v36   ;;  %v1888_v7 = vmax.bf16 %v11994_v10, %v1856_v38  ;;  %v12020_v36 = vpack.c.bf16 %v10397_v6, %v10381_v23  ;;  %v1891_v26 = vmax.bf16 %v11994_v10, %v1859_v0  ;;  %v6664_v23 = vld [vmem:[%s11929_s12 + $0x6c] sm:$0xf]  ;;  %v12025_v48 = vpack.c.bf16 %v10473_v12, %v10457_v17  ;;  %v6667_v17 = vld [vmem:[%s11929_s12 + $0x78] sm:$0xf]  ;;  %v7634_v38 = vld [vmem:[%s11931_s14 + $0x10] sm:$0xf] }
 0x19a   : > { %v1861_v22 = vadd.bf16 %v8450_v29, %v12021_v4  ;;  %v1863_v40 = vadd.bf16 %v8451_v27, %v1319_v44  ;;  %v7636_v63 = vld [vmem:[%s11931_s14 + $0x18] sm:$0xf]  ;;  %v8958_v2 = vld [vmem:[%s11920_s3 + $0x34] ss:$8 sps:$4 sm:$0xff]   ;;  %v7639_v42 = vld [vmem:[%s11931_s14 + $0x24] sm:$0xf] }
 0x19b   : > { %2107 = vmatpush1.bf16.msra.mxu1 %v1882_v50  ;;  %v1858_v58 = vadd.bf16 %v8449_v41, %v12020_v36  ;;  %v1862_v1 = vadd.bf16 %v8451_v27, %v12025_v48  ;;  %v7632_v41 = vld [vmem:[%s11931_s14 + $0x8] sm:$0xf]  ;;  %v7641_v36 = vld [vmem:[%s11931_s14 + $0x2c] sm:$0xf]  ;;  %v8960_v4 = vld [vmem:[%s11920_s3 + $0x30] ss:$8 sps:$4 sm:$0xff]  }
 0x19c   : > { %6899 = vperm.xlu1 %8868, %v6656_v39   ;;  %2108 = vmatprep.subr.bf16.mxu1 %v1885_v47  ;;  %v10601_v21 = vpop.permute.xlu0 %4357  ;;  %v10610_v20 = vpop.permute.xlu1 %4369  ;;  %v12023_v39 = vld [vmem:[#allocation59_spill] sm:$0xff]  ;;  %v1895_v15 = vmax.bf16 %v11994_v10, %v1863_v40  ;;  %v7642_v27 = vld [vmem:[%s11931_s14 + $0x30] sm:$0xf]  ;;  %v7647_v40 = vld [vmem:[%s11931_s14 + $0x44] sm:$0xf] }
 0x19d   : > { %6887 = vperm.xlu0 %8867, %v6655_v55   ;;  %v1890_v6 = vmax.bf16 %v11994_v10, %v1858_v58  ;;  %v12024_v50 = vpack.c.bf16 %v12022_v24, %v12023_v39  ;;  %v1893_v55 = vmax.bf16 %v11994_v10, %v1861_v22  ;;  %v1894_v12 = vmax.bf16 %v11994_v10, %v1862_v1  ;;  %v8961_v22 = vld [vmem:[%s11920_s3 + $0x44] ss:$8 sps:$4 sm:$0xff]   ;;  %v7645_v24 = vld [vmem:[%s11931_s14 + $0x3c] sm:$0xf]  ;;  %v7644_v39 = vld [vmem:[%s11931_s14 + $0x38] sm:$0xf] }
 0x19e   : > { %v7648_v48 = vld [vmem:[%s11931_s14 + $0x48] sm:$0xf] }
 0x19f   : > { %2109 = vmatpush1.bf16.msra.mxu1 %v1884_v18  ;;  %v1860_v35 = vadd.bf16 %v8450_v29, %v12024_v50  ;;  %v8949_v18 = vld [vmem:[%s11920_s3] ss:$8 sps:$4 sm:$0xff]  }
 0x1a0   : > { %6923 = vperm.xlu1 %8868, %v6658_v11   ;;  %2110 = vmatprep.subr.bf16.mxu1 %v1887_v57  ;;  %v10629_v45 = vpop.permute.xlu0 %4381  ;;  %v10635_v56 = vpop.permute.xlu1 %4393  ;;  %v7633_v57 = vld [vmem:[%s11931_s14 + $0xc] sm:$0xf]  ;;  %v8963_v50 = vld [vmem:[%s11920_s3 + $0x40] ss:$8 sps:$4 sm:$0xff]  }
 0x1a1   : > { %6911 = vperm.xlu0 %8867, %v6657_v9   ;;  %v1892_v47 = vmax.bf16 %v11994_v10, %v1860_v35  ;;  %v7630_v9 = vld [vmem:[%s11931_s14] sm:$0xf]  ;;  %v8964_v35 = vld [vmem:[%s11920_s3 + $0x54] ss:$8 sps:$4 sm:$0xff]  }
 0x1a3   : > { %2111 = vmatpush1.bf16.msra.mxu1 %v1886_v32  ;;  %v7635_v32 = vld [vmem:[%s11931_s14 + $0x14] sm:$0xf] }
 0x1a4   : > { %6947 = vperm.xlu1 %8868, %v6660_v37   ;;  %2112 = vmatprep.subr.bf16.mxu1 %v1889_v52  ;;  %v10648_v44 = vpop.permute.xlu0 %4405  ;;  %v10653_v11 = vpop.permute.xlu1 %4417  ;;  %v8957_v52 = vld [vmem:[%s11920_s3 + $0x20] ss:$8 sps:$4 sm:$0xff]  }
 0x1a5   : > { %6935 = vperm.xlu0 %8867, %v6659_v51   ;;  %v7637_v51 = vld [vmem:[%s11931_s14 + $0x1c] sm:$0xf] }
 0x1a7   : > { %2113 = vmatpush1.bf16.msra.mxu1 %v1888_v7 }
 0x1a8   : > { %6971 = vperm.xlu1 %8868, %v6662_v25   ;;  %2114 = vmatprep.subr.bf16.mxu1 %v1891_v26  ;;  %v10671_v59 = vpop.permute.xlu0 %4429  ;;  %v10673_v60 = vpop.permute.xlu1 %4441  ;;  %v7638_v25 = vld [vmem:[%s11931_s14 + $0x20] sm:$0xf]  ;;  %v7643_v26 = vld [vmem:[%s11931_s14 + $0x34] sm:$0xf] }
 0x1a9   : > { %6959 = vperm.xlu0 %8867, %v6661_v3   ;;  %v7640_v3 = vld [vmem:[%s11931_s14 + $0x28] sm:$0xf] }
 0x1ab   : > { %2115 = vmatpush1.bf16.msra.mxu1 %v1890_v6 }
 0x1ac   : > { %6995 = vperm.xlu1 %8868, %v6664_v23   ;;  %2116 = vmatprep.subr.bf16.mxu1 %v1893_v55  ;;  %v10687_v37 = vpop.permute.xlu0 %4453  ;;  %v10692_v43 = vpop.permute.xlu1 %4465 }
 0x1ad   : > { %6983 = vperm.xlu0 %8867, %v6663_v54  }
 0x1af   : > { %2117 = vmatpush1.bf16.msra.mxu1 %v1892_v47  ;;  %v7649_v47 = vld [vmem:[%s11931_s14 + $0x4c] sm:$0xf] }
 0x1b0   : > { %7019 = vperm.xlu1 %8868, %v6666_v34   ;;  %2118 = vmatprep.subr.bf16.mxu1 %v1895_v15  ;;  %v10703_v0 = vpop.permute.xlu0 %4477  ;;  %v10708_v29 = vpop.permute.xlu1 %4489  ;;  %v7646_v34 = vld [vmem:[%s11931_s14 + $0x40] sm:$0xf] }
 0x1b1   : > { %7007 = vperm.xlu0 %8867, %v6665_v13   ;;  %v8966_v13 = vld [vmem:[%s11920_s3 + $0x50] ss:$8 sps:$4 sm:$0xff]  }
 0x1b3   : > { %2119 = vmatpush1.bf16.msra.mxu1 %v1894_v12  ;;  %v7651_v12 = vld [vmem:[%s11931_s14 + $0x54] sm:$0xf] }
 0x1b4   : > { %7043 = vperm.xlu1 %8868, %v6668_v61   ;;  %v10719_v7 = vpop.permute.xlu0 %4501  ;;  %v10724_v58 = vpop.permute.xlu1 %4513  ;;  %v8967_v61 = vld [vmem:[%s11920_s3 + $0x64] ss:$8 sps:$4 sm:$0xff]  }
 0x1b5   : > { %7031 = vperm.xlu0 %8867, %v6667_v17   ;;  %v7650_v17 = vld [vmem:[%s11931_s14 + $0x50] sm:$0xf] }
 0x1b6   : > { %2121 = vmatmul.mubr.bf16.vlgmr.msra.gmra.mrb[32].mxu1 %v8949_v18 }
 0x1b7   : > { %2130 = vmatprep.mubr.bf16.mxu1 %v8952_v19  ;;  %v7653_v19 = vld [vmem:[%s11931_s14 + $0x5c] sm:$0xf] }
 0x1b8   : > { %7676 = vperm.xlu1 %8868, %v7631_v30   ;;  %v10741_v23 = vpop.permute.xlu0 %4525  ;;  %v10743_v6 = vpop.permute.xlu1 %4537 }
 0x1b9   : > { %7664 = vperm.xlu0 %8867, %v7630_v9   ;;  %v7652_v9 = vld [vmem:[%s11931_s14 + $0x58] sm:$0xf] }
 0x1bc   : > { %7700 = vperm.xlu1 %8868, %v7633_v57   ;;  %v10757_v54 = vpop.permute.xlu0 %4549  ;;  %v10762_v55 = vpop.permute.xlu1 %4561  ;;  %v8969_v57 = vld [vmem:[%s11920_s3 + $0x60] ss:$8 sps:$4 sm:$0xff]  }
 0x1bd   : > { %7688 = vperm.xlu0 %8867, %v7632_v41   ;;  %v8970_v41 = vld [vmem:[%s11920_s3 + $0x74] ss:$8 sps:$4 sm:$0xff]  }
 0x1be   : > { %2131 = vmatmul.mubr.bf16.gmra.mrb[36].mxu1 %v8954_v62  ;;  %v7655_v62 = vld [vmem:[%s11931_s14 + $0x64] sm:$0xf] }
 0x1bf   : > { %2140 = vmatprep.mubr.bf16.mxu1 %v8955_v14  ;;  %v7654_v14 = vld [vmem:[%s11931_s14 + $0x60] sm:$0xf] }
 0x1c0   : > { %7724 = vperm.xlu1 %8868, %v7635_v32   ;;  %v10773_v1 = vpop.permute.xlu0 %4573  ;;  %v10778_v15 = vpop.permute.xlu1 %4585 }
 0x1c1   : > { %7712 = vperm.xlu0 %8867, %v7634_v38  }
 0x1c4   : > { %7748 = vperm.xlu1 %8868, %v7637_v51   ;;  %v10789_v18 = vpop.permute.xlu0 %4597  ;;  %v10794_v30 = vpop.permute.xlu1 %4609  ;;  %v7657_v51 = vld [vmem:[%s11931_s14 + $0x6c] sm:$0xf] }
 0x1c5   : > { %7736 = vperm.xlu0 %8867, %v7636_v63   ;;  %v7656_v63 = vld [vmem:[%s11931_s14 + $0x68] sm:$0xf] }
 0x1c6   : > { %2141 = vmatmul.mubr.bf16.gmra.mrb[40].mxu1 %v8957_v52  ;;  %v8972_v52 = vld [vmem:[%s11920_s3 + $0x70] ss:$8 sps:$4 sm:$0xff]  }
 0x1c7   : > { %2150 = vmatprep.mubr.bf16.mxu1 %v8958_v2  ;;  %v8973_v2 = vld [vmem:[%s11920_s3 + $0x84] ss:$8 sps:$4 sm:$0xff]  }
 0x1c8   : > { %7772 = vperm.xlu1 %8868, %v7639_v42   ;;  %v10811_v32 = vpop.permute.xlu0 %4621  ;;  %v10813_v38 = vpop.permute.xlu1 %4633 }
 0x1c9   : > { %7760 = vperm.xlu0 %8867, %v7638_v25   ;;  %v7659_v25 = vld [vmem:[%s11931_s14 + $0x74] sm:$0xf] }
 0x1cc   : > { %7796 = vperm.xlu1 %8868, %v7641_v36   ;;  %v10827_v42 = vpop.permute.xlu0 %4645  ;;  %v10832_v36 = vpop.permute.xlu1 %4657 }
 0x1cd   : > { %7784 = vperm.xlu0 %8867, %v7640_v3   ;;  %v7658_v3 = vld [vmem:[%s11931_s14 + $0x70] sm:$0xf] }
 0x1ce   : > { %2151 = vmatmul.mubr.bf16.gmra.mrb[44].mxu1 %v8960_v4  ;;  %v7661_v4 = vld [vmem:[%s11931_s14 + $0x7c] sm:$0xf] }
 0x1cf   : > { %2160 = vmatprep.mubr.bf16.mxu1 %v8961_v22  ;;  %v7660_v22 = vld [vmem:[%s11931_s14 + $0x78] sm:$0xf] }
 0x1d0   : > { %7820 = vperm.xlu1 %8868, %v7643_v26   ;;  %v10843_v26 = vpop.permute.xlu0 %4669 }
 0x1d1   : > { %7808 = vperm.xlu0 %8867, %v7642_v27   ;;  %v8975_v27 = vld [vmem:[%s11920_s3 + $0x80] ss:$8 sps:$4 sm:$0xff]  }
 0x1d4   : > { %7844 = vperm.xlu1 %8868, %v7645_v24   ;;  %v10848_v24 = vpop.permute.xlu1 %4681 }
 0x1d5   : > { %7832 = vperm.xlu0 %8867, %v7644_v39   ;;  %v8976_v39 = vld [vmem:[%s11920_s3 + $0x94] ss:$8 sps:$4 sm:$0xff]  }
 0x1d6   : > { %2161 = vmatmul.mubr.bf16.gmra.mrb[48].mxu1 %v8963_v50  ;;  %v8207_v50 = vld [vmem:[#allocation2] sm:$0x1] }
 0x1d7   : > { %2170 = vmatprep.mubr.bf16.mxu1 %v8964_v35  ;;  %v10853_v35 = vpop.permute.xlu0 %4693 }
 0x1d8   : > { %7868 = vperm.xlu1 %8868, %v7647_v40   ;;  %v8978_v40 = vld [vmem:[%s11920_s3 + $0x90] ss:$8 sps:$4 sm:$0xff]  }
 0x1d9   : > { %7856 = vperm.xlu0 %8867, %v7646_v34   ;;  %v8979_v34 = vld [vmem:[%s11920_s3 + $0xa4] ss:$8 sps:$4 sm:$0xff]  }
 0x1dc   : > { %7892 = vperm.xlu1 %8868, %v7649_v47   ;;  %v8981_v47 = vld [vmem:[%s11920_s3 + $0xa0] ss:$8 sps:$4 sm:$0xff]  }
 0x1dd   : > { %7880 = vperm.xlu0 %8867, %v7648_v48   ;;  %v8982_v48 = vld [vmem:[%s11920_s3 + $0xb4] ss:$8 sps:$4 sm:$0xff]  }
 0x1de   : > { %2171 = vmatmul.mubr.bf16.gmra.mrb[52].mxu1 %v8966_v13  ;;  %v8984_v13 = vld [vmem:[%s11920_s3 + $0xb0] ss:$8 sps:$4 sm:$0xff]  }
 0x1df   : > { %2180 = vmatprep.mubr.bf16.mxu1 %v8967_v61  ;;  %v8985_v61 = vld [vmem:[%s11920_s3 + $0xc4] ss:$8 sps:$4 sm:$0xff]  }
 0x1e0   : > { %7916 = vperm.xlu1 %8868, %v7651_v12   ;;  %v8987_v12 = vld [vmem:[%s11920_s3 + $0xc0] ss:$8 sps:$4 sm:$0xff]  }
 0x1e1   : > { %7904 = vperm.xlu0 %8867, %v7650_v17   ;;  %v8988_v17 = vld [vmem:[%s11920_s3 + $0xd4] ss:$8 sps:$4 sm:$0xff]  }
 0x1e4   : > { %7940 = vperm.xlu1 %8868, %v7653_v19   ;;  %v8990_v19 = vld [vmem:[%s11920_s3 + $0xd0] ss:$8 sps:$4 sm:$0xff]  }
 0x1e5   : > { %7928 = vperm.xlu0 %8867, %v7652_v9   ;;  %v8991_v9 = vld [vmem:[%s11920_s3 + $0xe4] ss:$8 sps:$4 sm:$0xff]  }
 0x1e6   : > { %2181 = vmatmul.mubr.bf16.gmra.mrb[56].mxu1 %v8969_v57  ;;  %v8993_v57 = vld [vmem:[%s11920_s3 + $0xe0] ss:$8 sps:$4 sm:$0xff]  }
 0x1e7   : > { %2190 = vmatprep.mubr.bf16.mxu1 %v8970_v41  ;;  %v8994_v41 = vld [vmem:[%s11920_s3 + $0xf4] ss:$8 sps:$4 sm:$0xff]  }
 0x1e8   : > { %7964 = vperm.xlu1 %8868, %v7655_v62   ;;  %v8996_v62 = vld [vmem:[%s11920_s3 + $0xf0] ss:$8 sps:$4 sm:$0xff]  }
 0x1e9   : > { %7952 = vperm.xlu0 %8867, %v7654_v14   ;;  %v12026_v14 = vld [vmem:[#allocation4_spill] sm:$0xff] }
 0x1ec   : > { %7988 = vperm.xlu1 %8868, %v7657_v51   ;;  %v2368_v51 = vrot.slane %v12026_v14, %v10191_v8 }
 0x1ed   : > { %7976 = vperm.xlu0 %8867, %v7656_v63   ;;  %v12027_v63 = vld [vmem:[#allocation5_spill] sm:$0xff] }
 0x1ee   : > { %2191 = vmatmul.mubr.bf16.gmra.mrb[60].mxu1 %v8972_v52  ;;  %v2356_v52 = vrot.slane %v12027_v63, %v10191_v8 }
 0x1ef   : > { %2200 = vmatprep.mubr.bf16.mxu1 %v8973_v2 }
 0x1f0   : > { %8012 = vperm.xlu1 %8868, %v7659_v25  }
 0x1f1   : > { %8000 = vperm.xlu0 %8867, %v7658_v3  }
 0x1f4   : > { %8036 = vperm.xlu1 %8868, %v7661_v4   ;;  %v8484_v4 = vcombine.low %v2356_v52, %v2368_v51 }
 0x1f5   : > { %8024 = vperm.xlu0 %8867, %v7660_v22  }
 0x1f6   : > { %2201 = vmatmul.mubr.bf16.gmra.mrb[64].mxu1 %v8975_v27 }
 0x1f7   : > { %2210 = vmatprep.mubr.bf16.mxu1 %v8976_v39  ;;  %v8999_v39 = vld [vmem:[%s11922_s5 + $0x4] ss:$8 sps:$4 sm:$0xff]  }
 0x1f8   : > { %3113 = vmatprep.mubr.bf16.mxu0 %v8999_v39 }
 0x1f9   : > { %8210 = vperm.xlu0 %8867, %v8207_v50  }
 0x1fe   : > { %2211 = vmatmul.mubr.bf16.gmra.mrb[68].mxu1 %v8978_v40 }
 0x1ff   : > { %2220 = vmatprep.mubr.bf16.mxu1 %v8979_v34 }
 0x206   : > { %2221 = vmatmul.mubr.bf16.gmra.mrb[72].mxu1 %v8981_v47  ;;  %v12028_v47 = vld [vmem:[#allocation6_spill] sm:$0xff] }
 0x207   : > { %2230 = vmatprep.mubr.bf16.mxu1 %v8982_v48  ;;  %v2392_v48 = vrot.slane %v12028_v47, %v10191_v8 }
 0x20e   : > { %2231 = vmatmul.mubr.bf16.gmra.mrb[76].mxu1 %v8984_v13  ;;  %v12029_v13 = vld [vmem:[#allocation7_spill] sm:$0xff] }
 0x20f   : > { %2240 = vmatprep.mubr.bf16.mxu1 %v8985_v61  ;;  %v2380_v61 = vrot.slane %v12029_v13, %v10191_v8 }
 0x216   : > { %2241 = vmatmul.mubr.bf16.gmra.mrb[80].mxu1 %v8987_v12 }
 0x217   : > { %2250 = vmatprep.mubr.bf16.mxu1 %v8988_v17 }
 0x21e   : > { %2251 = vmatmul.mubr.bf16.gmra.mrb[84].mxu1 %v8990_v19 }
 0x21f   : > { %2260 = vmatprep.mubr.bf16.mxu1 %v8991_v9 }
 0x226   : > { %2261 = vmatmul.mubr.bf16.gmra.mrb[88].mxu1 %v8993_v57 }
 0x227   : > { %2270 = vmatprep.mubr.bf16.mxu1 %v8994_v41  ;;  %v8485_v41 = vcombine.low %v2380_v61, %v2392_v48 }
 0x22e   : > { %2271 = vmatmul.mubr.bf16.gmra.mrb[92].mxu1 %v8996_v62 }
 0x289   : > { %v2122_v2 = vpop.f32.mrb[32].mxu1 }
 0x28a   : > { %v2124_v25 = vpop.f32.mrb[33].mxu1 }
 0x28b   : > { %v2126_v3 = vpop.f32.mrb[34].mxu1 }
 0x28c   : > { %v2281_v22 = vpack.c.bf16 %v2126_v3, %v2122_v2  ;;  %v2128_v27 = vpop.f32.mrb[35].mxu1  ;;  %v12030_v2 = vld [vmem:[#allocation8_spill] sm:$0xff]  ;;  %v12031_v3 = vld [vmem:[#allocation9_spill] sm:$0xff] }
 0x28d   : > { %v2282_v50 = vpack.c.bf16 %v2128_v27, %v2124_v25  ;;  %v2416_v25 = vrot.slane %v12030_v2, %v10191_v8 }
 0x28e   : > { %v2825_v40 = vadd.bf16 %v8484_v4, %v2281_v22 }
 0x28f   : > { %v2826_v34 = vadd.bf16 %v8484_v4, %v2282_v50  ;;  %v2404_v4 = vrot.slane %v12031_v3, %v10191_v8 }
 0x290   : > { %v2857_v19 = vmax.bf16 %v11994_v10, %v2825_v40 }
 0x291   : > { %v2132_v12 = vpop.f32.mrb[36].mxu1  ;;  %v2858_v17 = vmax.bf16 %v11994_v10, %v2826_v34  ;;  %v8486_v34 = vcombine.low %v2404_v4, %v2416_v25 }
 0x292   : > { %v2134_v9 = vpop.f32.mrb[37].mxu1 }
 0x293   : > { %v2136_v57 = vpop.f32.mrb[38].mxu1  ;;  %3081 = vmatprep.subr.bf16.mxu0 %v2858_v17  ;;  %v12032_v17 = vld [vmem:[#allocation10_spill] sm:$0xff] }
 0x294   : > { %v2283_v62 = vpack.c.bf16 %v2136_v57, %v2132_v12  ;;  %v2138_v14 = vpop.f32.mrb[39].mxu1  ;;  %3082 = vmatpush1.bf16.msra.mxu0 %v2857_v19  ;;  %v2440_v19 = vrot.slane %v12032_v17, %v10191_v8 }
 0x295   : > { %v2284_v51 = vpack.c.bf16 %v2138_v14, %v2134_v9  ;;  %v12033_v9 = vld [vmem:[#allocation11_spill] sm:$0xff] }
 0x296   : > { %v2827_v63 = vadd.bf16 %v8485_v41, %v2283_v62  ;;  %v2428_v57 = vrot.slane %v12033_v9, %v10191_v8 }
 0x297   : > { %v2828_v52 = vadd.bf16 %v8485_v41, %v2284_v51 }
 0x298   : > { %v2859_v39 = vmax.bf16 %v11994_v10, %v2827_v63 }
 0x299   : > { %v2142_v22 = vpop.f32.mrb[40].mxu1  ;;  %v2860_v27 = vmax.bf16 %v11994_v10, %v2828_v52  ;;  %v8487_v52 = vcombine.low %v2428_v57, %v2440_v19 }
 0x29a   : > { %v2144_v50 = vpop.f32.mrb[41].mxu1 }
 0x29b   : > { %v2146_v40 = vpop.f32.mrb[42].mxu1  ;;  %3083 = vmatprep.subr.bf16.mxu0 %v2860_v27  ;;  %v12034_v27 = vld [vmem:[#allocation12_spill] sm:$0xff] }
 0x29c   : > { %v2285_v47 = vpack.c.bf16 %v2146_v40, %v2142_v22  ;;  %v2148_v48 = vpop.f32.mrb[43].mxu1  ;;  %3084 = vmatpush1.bf16.msra.mxu0 %v2859_v39  ;;  %v2464_v39 = vrot.slane %v12034_v27, %v10191_v8 }
 0x29d   : > { %v2286_v13 = vpack.c.bf16 %v2148_v48, %v2144_v50  ;;  %v12035_v50 = vld [vmem:[#allocation13_spill] sm:$0xff] }
 0x29e   : > { %v2829_v61 = vadd.bf16 %v8486_v34, %v2285_v47  ;;  %v2452_v40 = vrot.slane %v12035_v50, %v10191_v8 }
 0x29f   : > { %v2830_v12 = vadd.bf16 %v8486_v34, %v2286_v13 }
 0x2a0   : > { %v2861_v14 = vmax.bf16 %v11994_v10, %v2829_v61 }
 0x2a1   : > { %v2152_v41 = vpop.f32.mrb[44].mxu1  ;;  %v2862_v62 = vmax.bf16 %v11994_v10, %v2830_v12  ;;  %v8488_v12 = vcombine.low %v2452_v40, %v2464_v39 }
 0x2a2   : > { %v2154_v51 = vpop.f32.mrb[45].mxu1 }
 0x2a3   : > { %v2156_v63 = vpop.f32.mrb[46].mxu1  ;;  %3085 = vmatprep.subr.bf16.mxu0 %v2862_v62  ;;  %v12036_v62 = vld [vmem:[#allocation14_spill] sm:$0xff] }
 0x2a4   : > { %v2287_v2 = vpack.c.bf16 %v2156_v63, %v2152_v41  ;;  %v2158_v25 = vpop.f32.mrb[47].mxu1  ;;  %3086 = vmatpush1.bf16.msra.mxu0 %v2861_v14  ;;  %v2488_v14 = vrot.slane %v12036_v62, %v10191_v8 }
 0x2a5   : > { %v2288_v3 = vpack.c.bf16 %v2158_v25, %v2154_v51  ;;  %v12037_v51 = vld [vmem:[#allocation15_spill] sm:$0xff] }
 0x2a6   : > { %v2831_v4 = vadd.bf16 %v8487_v52, %v2287_v2  ;;  %v2476_v63 = vrot.slane %v12037_v51, %v10191_v8 }
 0x2a7   : > { %v2832_v22 = vadd.bf16 %v8487_v52, %v2288_v3 }
 0x2a8   : > { %v2863_v48 = vmax.bf16 %v11994_v10, %v2831_v4 }
 0x2a9   : > { %v2162_v34 = vpop.f32.mrb[48].mxu1  ;;  %v2864_v47 = vmax.bf16 %v11994_v10, %v2832_v22  ;;  %v8489_v22 = vcombine.low %v2476_v63, %v2488_v14 }
 0x2aa   : > { %v2164_v13 = vpop.f32.mrb[49].mxu1 }
 0x2ab   : > { %v2166_v61 = vpop.f32.mrb[50].mxu1  ;;  %3087 = vmatprep.subr.bf16.mxu0 %v2864_v47  ;;  %v12038_v47 = vld [vmem:[#allocation16_spill] sm:$0xff] }
 0x2ac   : > { %v2289_v17 = vpack.c.bf16 %v2166_v61, %v2162_v34  ;;  %v2168_v19 = vpop.f32.mrb[51].mxu1  ;;  %3088 = vmatpush1.bf16.msra.mxu0 %v2863_v48  ;;  %v2512_v48 = vrot.slane %v12038_v47, %v10191_v8 }
 0x2ad   : > { %v2290_v9 = vpack.c.bf16 %v2168_v19, %v2164_v13  ;;  %v12039_v13 = vld [vmem:[#allocation17_spill] sm:$0xff] }
 0x2ae   : > { %v2833_v57 = vadd.bf16 %v8488_v12, %v2289_v17  ;;  %v2500_v61 = vrot.slane %v12039_v13, %v10191_v8 }
 0x2af   : > { %v2834_v41 = vadd.bf16 %v8488_v12, %v2290_v9 }
 0x2b0   : > { %v2865_v25 = vmax.bf16 %v11994_v10, %v2833_v57 }
 0x2b1   : > { %v2172_v52 = vpop.f32.mrb[52].mxu1  ;;  %v2866_v2 = vmax.bf16 %v11994_v10, %v2834_v41  ;;  %v8490_v41 = vcombine.low %v2500_v61, %v2512_v48 }
 0x2b2   : > { %v2174_v3 = vpop.f32.mrb[53].mxu1 }
 0x2b3   : > { %v2176_v4 = vpop.f32.mrb[54].mxu1  ;;  %3089 = vmatprep.subr.bf16.mxu0 %v2866_v2  ;;  %v12040_v2 = vld [vmem:[#allocation18_spill] sm:$0xff] }
 0x2b4   : > { %v2291_v27 = vpack.c.bf16 %v2176_v4, %v2172_v52  ;;  %v2178_v39 = vpop.f32.mrb[55].mxu1  ;;  %3090 = vmatpush1.bf16.msra.mxu0 %v2865_v25  ;;  %v2536_v25 = vrot.slane %v12040_v2, %v10191_v8 }
 0x2b5   : > { %v2292_v50 = vpack.c.bf16 %v2178_v39, %v2174_v3  ;;  %v12041_v3 = vld [vmem:[#allocation19_spill] sm:$0xff] }
 0x2b6   : > { %v2835_v40 = vadd.bf16 %v8489_v22, %v2291_v27  ;;  %v2524_v4 = vrot.slane %v12041_v3, %v10191_v8 }
 0x2b7   : > { %v2836_v34 = vadd.bf16 %v8489_v22, %v2292_v50 }
 0x2b8   : > { %v2867_v19 = vmax.bf16 %v11994_v10, %v2835_v40 }
 0x2b9   : > { %v2182_v12 = vpop.f32.mrb[56].mxu1  ;;  %v2868_v17 = vmax.bf16 %v11994_v10, %v2836_v34  ;;  %v8491_v34 = vcombine.low %v2524_v4, %v2536_v25 }
 0x2ba   : > { %v2184_v9 = vpop.f32.mrb[57].mxu1 }
 0x2bb   : > { %v2186_v57 = vpop.f32.mrb[58].mxu1  ;;  %3091 = vmatprep.subr.bf16.mxu0 %v2868_v17  ;;  %v12042_v17 = vld [vmem:[#allocation20_spill] sm:$0xff] }
 0x2bc   : > { %v2293_v62 = vpack.c.bf16 %v2186_v57, %v2182_v12  ;;  %v2188_v14 = vpop.f32.mrb[59].mxu1  ;;  %3092 = vmatpush1.bf16.msra.mxu0 %v2867_v19  ;;  %v2560_v19 = vrot.slane %v12042_v17, %v10191_v8 }
 0x2bd   : > { %v2294_v51 = vpack.c.bf16 %v2188_v14, %v2184_v9  ;;  %v12043_v9 = vld [vmem:[#allocation21_spill] sm:$0xff] }
 0x2be   : > { %v2837_v63 = vadd.bf16 %v8490_v41, %v2293_v62  ;;  %v2548_v57 = vrot.slane %v12043_v9, %v10191_v8 }
 0x2bf   : > { %v2838_v52 = vadd.bf16 %v8490_v41, %v2294_v51 }
 0x2c0   : > { %v2869_v39 = vmax.bf16 %v11994_v10, %v2837_v63 }
 0x2c1   : > { %v2192_v22 = vpop.f32.mrb[60].mxu1  ;;  %v2870_v27 = vmax.bf16 %v11994_v10, %v2838_v52  ;;  %v8492_v52 = vcombine.low %v2548_v57, %v2560_v19 }
 0x2c2   : > { %v2194_v50 = vpop.f32.mrb[61].mxu1 }
 0x2c3   : > { %v2196_v40 = vpop.f32.mrb[62].mxu1  ;;  %3093 = vmatprep.subr.bf16.mxu0 %v2870_v27  ;;  %v12044_v27 = vld [vmem:[#allocation22_spill] sm:$0xff] }
 0x2c4   : > { %v2295_v47 = vpack.c.bf16 %v2196_v40, %v2192_v22  ;;  %v2198_v48 = vpop.f32.mrb[63].mxu1  ;;  %3094 = vmatpush1.bf16.msra.mxu0 %v2869_v39  ;;  %v2584_v39 = vrot.slane %v12044_v27, %v10191_v8 }
 0x2c5   : > { %v2296_v13 = vpack.c.bf16 %v2198_v48, %v2194_v50  ;;  %v12045_v50 = vld [vmem:[#allocation23_spill] sm:$0xff] }
 0x2c6   : > { %v2839_v61 = vadd.bf16 %v8491_v34, %v2295_v47  ;;  %v2572_v40 = vrot.slane %v12045_v50, %v10191_v8 }
 0x2c7   : > { %v2840_v12 = vadd.bf16 %v8491_v34, %v2296_v13 }
 0x2c8   : > { %v2871_v14 = vmax.bf16 %v11994_v10, %v2839_v61 }
 0x2c9   : > { %v2202_v41 = vpop.f32.mrb[64].mxu1  ;;  %v2872_v62 = vmax.bf16 %v11994_v10, %v2840_v12  ;;  %v8493_v12 = vcombine.low %v2572_v40, %v2584_v39 }
 0x2ca   : > { %v2204_v51 = vpop.f32.mrb[65].mxu1 }
 0x2cb   : > { %v2206_v63 = vpop.f32.mrb[66].mxu1  ;;  %3095 = vmatprep.subr.bf16.mxu0 %v2872_v62  ;;  %v12046_v62 = vld [vmem:[#allocation24_spill] sm:$0xff] }
 0x2cc   : > { %v2297_v2 = vpack.c.bf16 %v2206_v63, %v2202_v41  ;;  %v2208_v25 = vpop.f32.mrb[67].mxu1  ;;  %3096 = vmatpush1.bf16.msra.mxu0 %v2871_v14  ;;  %v2608_v14 = vrot.slane %v12046_v62, %v10191_v8 }
 0x2cd   : > { %v2298_v3 = vpack.c.bf16 %v2208_v25, %v2204_v51  ;;  %v12047_v51 = vld [vmem:[#allocation25_spill] sm:$0xff] }
 0x2ce   : > { %v2841_v4 = vadd.bf16 %v8492_v52, %v2297_v2  ;;  %v2596_v63 = vrot.slane %v12047_v51, %v10191_v8 }
 0x2cf   : > { %v2842_v22 = vadd.bf16 %v8492_v52, %v2298_v3 }
 0x2d0   : > { %v2873_v48 = vmax.bf16 %v11994_v10, %v2841_v4 }
 0x2d1   : > { %v2212_v34 = vpop.f32.mrb[68].mxu1  ;;  %v2874_v47 = vmax.bf16 %v11994_v10, %v2842_v22  ;;  %v8494_v22 = vcombine.low %v2596_v63, %v2608_v14 }
 0x2d2   : > { %v2214_v13 = vpop.f32.mrb[69].mxu1 }
 0x2d3   : > { %v2216_v61 = vpop.f32.mrb[70].mxu1  ;;  %3097 = vmatprep.subr.bf16.mxu0 %v2874_v47  ;;  %v12048_v47 = vld [vmem:[#allocation26_spill] sm:$0xff] }
 0x2d4   : > { %v2299_v17 = vpack.c.bf16 %v2216_v61, %v2212_v34  ;;  %v2218_v19 = vpop.f32.mrb[71].mxu1  ;;  %3098 = vmatpush1.bf16.msra.mxu0 %v2873_v48  ;;  %v2632_v48 = vrot.slane %v12048_v47, %v10191_v8 }
 0x2d5   : > { %v2300_v9 = vpack.c.bf16 %v2218_v19, %v2214_v13  ;;  %v12049_v13 = vld [vmem:[#allocation27_spill] sm:$0xff] }
 0x2d6   : > { %v2843_v57 = vadd.bf16 %v8493_v12, %v2299_v17  ;;  %v2620_v61 = vrot.slane %v12049_v13, %v10191_v8 }
 0x2d7   : > { %v2844_v41 = vadd.bf16 %v8493_v12, %v2300_v9 }
 0x2d8   : > { %v2875_v25 = vmax.bf16 %v11994_v10, %v2843_v57 }
 0x2d9   : > { %v2222_v52 = vpop.f32.mrb[72].mxu1  ;;  %v2876_v2 = vmax.bf16 %v11994_v10, %v2844_v41  ;;  %v8495_v41 = vcombine.low %v2620_v61, %v2632_v48 }
 0x2da   : > { %v2224_v3 = vpop.f32.mrb[73].mxu1 }
 0x2db   : > { %v2226_v4 = vpop.f32.mrb[74].mxu1  ;;  %3099 = vmatprep.subr.bf16.mxu0 %v2876_v2  ;;  %v12050_v2 = vld [vmem:[#allocation28_spill] sm:$0xff] }
 0x2dc   : > { %v2301_v27 = vpack.c.bf16 %v2226_v4, %v2222_v52  ;;  %v2228_v39 = vpop.f32.mrb[75].mxu1  ;;  %3100 = vmatpush1.bf16.msra.mxu0 %v2875_v25  ;;  %v2656_v25 = vrot.slane %v12050_v2, %v10191_v8 }
 0x2dd   : > { %v2302_v50 = vpack.c.bf16 %v2228_v39, %v2224_v3  ;;  %v12051_v3 = vld [vmem:[#allocation29_spill] sm:$0xff] }
 0x2de   : > { %v2845_v40 = vadd.bf16 %v8494_v22, %v2301_v27  ;;  %v2644_v4 = vrot.slane %v12051_v3, %v10191_v8 }
 0x2df   : > { %v2846_v34 = vadd.bf16 %v8494_v22, %v2302_v50 }
 0x2e0   : > { %v2877_v19 = vmax.bf16 %v11994_v10, %v2845_v40 }
 0x2e1   : > { %v2232_v12 = vpop.f32.mrb[76].mxu1  ;;  %v2878_v17 = vmax.bf16 %v11994_v10, %v2846_v34  ;;  %v8496_v34 = vcombine.low %v2644_v4, %v2656_v25 }
 0x2e2   : > { %v2234_v9 = vpop.f32.mrb[77].mxu1 }
 0x2e3   : > { %v2236_v57 = vpop.f32.mrb[78].mxu1  ;;  %3101 = vmatprep.subr.bf16.mxu0 %v2878_v17  ;;  %v12052_v17 = vld [vmem:[#allocation30_spill] sm:$0xff] }
 0x2e4   : > { %v2303_v62 = vpack.c.bf16 %v2236_v57, %v2232_v12  ;;  %v2238_v14 = vpop.f32.mrb[79].mxu1  ;;  %3102 = vmatpush1.bf16.msra.mxu0 %v2877_v19  ;;  %v2680_v19 = vrot.slane %v12052_v17, %v10191_v8 }
 0x2e5   : > { %v2304_v51 = vpack.c.bf16 %v2238_v14, %v2234_v9  ;;  %v12053_v9 = vld [vmem:[#allocation31_spill] sm:$0xff] }
 0x2e6   : > { %v2847_v63 = vadd.bf16 %v8495_v41, %v2303_v62  ;;  %v2668_v57 = vrot.slane %v12053_v9, %v10191_v8 }
 0x2e7   : > { %v2848_v52 = vadd.bf16 %v8495_v41, %v2304_v51 }
 0x2e8   : > { %v2879_v39 = vmax.bf16 %v11994_v10, %v2847_v63 }
 0x2e9   : > { %v2242_v22 = vpop.f32.mrb[80].mxu1  ;;  %v2880_v27 = vmax.bf16 %v11994_v10, %v2848_v52  ;;  %v8497_v52 = vcombine.low %v2668_v57, %v2680_v19 }
 0x2ea   : > { %v2244_v50 = vpop.f32.mrb[81].mxu1 }
 0x2eb   : > { %v2246_v40 = vpop.f32.mrb[82].mxu1  ;;  %3103 = vmatprep.subr.bf16.mxu0 %v2880_v27  ;;  %v12054_v27 = vld [vmem:[#allocation32_spill] sm:$0xff] }
 0x2ec   : > { %v2305_v47 = vpack.c.bf16 %v2246_v40, %v2242_v22  ;;  %v2248_v48 = vpop.f32.mrb[83].mxu1  ;;  %3104 = vmatpush1.bf16.msra.mxu0 %v2879_v39  ;;  %v2704_v39 = vrot.slane %v12054_v27, %v10191_v8 }
 0x2ed   : > { %v2306_v13 = vpack.c.bf16 %v2248_v48, %v2244_v50  ;;  %v12055_v50 = vld [vmem:[#allocation33_spill] sm:$0xff] }
 0x2ee   : > { %v2849_v61 = vadd.bf16 %v8496_v34, %v2305_v47  ;;  %v2692_v40 = vrot.slane %v12055_v50, %v10191_v8 }
 0x2ef   : > { %v2850_v12 = vadd.bf16 %v8496_v34, %v2306_v13 }
 0x2f0   : > { %v2881_v14 = vmax.bf16 %v11994_v10, %v2849_v61 }
 0x2f1   : > { %v2252_v41 = vpop.f32.mrb[84].mxu1  ;;  %v2882_v62 = vmax.bf16 %v11994_v10, %v2850_v12  ;;  %v8498_v12 = vcombine.low %v2692_v40, %v2704_v39 }
 0x2f2   : > { %v2254_v51 = vpop.f32.mrb[85].mxu1 }
 0x2f3   : > { %v2256_v63 = vpop.f32.mrb[86].mxu1  ;;  %3105 = vmatprep.subr.bf16.mxu0 %v2882_v62  ;;  %v12056_v62 = vld [vmem:[#allocation34_spill] sm:$0xff] }
 0x2f4   : > { %v2307_v2 = vpack.c.bf16 %v2256_v63, %v2252_v41  ;;  %v2258_v25 = vpop.f32.mrb[87].mxu1  ;;  %3106 = vmatpush1.bf16.msra.mxu0 %v2881_v14  ;;  %v2728_v14 = vrot.slane %v12056_v62, %v10191_v8  ;;  %v9011_v62 = vld [vmem:[%s11922_s5 + $0x40] ss:$8 sps:$4 sm:$0xff]  }
 0x2f5   : > { %v2308_v3 = vpack.c.bf16 %v2258_v25, %v2254_v51  ;;  %v12057_v51 = vld [vmem:[#allocation35_spill] sm:$0xff] }
 0x2f6   : > { %v2851_v4 = vadd.bf16 %v8497_v52, %v2307_v2  ;;  %v2716_v63 = vrot.slane %v12057_v51, %v10191_v8  ;;  %v9014_v51 = vld [vmem:[%s11922_s5 + $0x50] ss:$8 sps:$4 sm:$0xff]  }
 0x2f7   : > { %v2852_v22 = vadd.bf16 %v8497_v52, %v2308_v3 }
 0x2f8   : > { %v2883_v48 = vmax.bf16 %v11994_v10, %v2851_v4 }
 0x2f9   : > { %v2262_v34 = vpop.f32.mrb[88].mxu1  ;;  %v2884_v47 = vmax.bf16 %v11994_v10, %v2852_v22  ;;  %v8499_v22 = vcombine.low %v2716_v63, %v2728_v14  ;;  %v9012_v14 = vld [vmem:[%s11922_s5 + $0x54] ss:$8 sps:$4 sm:$0xff]   ;;  %v9015_v63 = vld [vmem:[%s11922_s5 + $0x64] ss:$8 sps:$4 sm:$0xff]  }
 0x2fa   : > { %v2264_v13 = vpop.f32.mrb[89].mxu1 }
 0x2fb   : > { %v2266_v61 = vpop.f32.mrb[90].mxu1  ;;  %3107 = vmatprep.subr.bf16.mxu0 %v2884_v47 }
 0x2fc   : > { %v2309_v17 = vpack.c.bf16 %v2266_v61, %v2262_v34  ;;  %v2268_v19 = vpop.f32.mrb[91].mxu1  ;;  %3108 = vmatpush1.bf16.msra.mxu0 %v2883_v48  ;;  %v9000_v61 = vld [vmem:[%s11922_s5 + $0x14] ss:$8 sps:$4 sm:$0xff]  }
 0x2fd   : > { %v2310_v9 = vpack.c.bf16 %v2268_v19, %v2264_v13  ;;  %v8997_v13 = vld [vmem:[%s11922_s5] ss:$8 sps:$4 sm:$0xff]  }
 0x2fe   : > { %v2853_v57 = vadd.bf16 %v8498_v12, %v2309_v17  ;;  %v9003_v17 = vld [vmem:[%s11922_s5 + $0x24] ss:$8 sps:$4 sm:$0xff]   ;;  %v9005_v19 = vld [vmem:[%s11922_s5 + $0x20] ss:$8 sps:$4 sm:$0xff]  }
 0x2ff   : > { %v2854_v41 = vadd.bf16 %v8498_v12, %v2310_v9  ;;  %v9002_v12 = vld [vmem:[%s11922_s5 + $0x10] ss:$8 sps:$4 sm:$0xff]   ;;  %v9006_v9 = vld [vmem:[%s11922_s5 + $0x34] ss:$8 sps:$4 sm:$0xff]  }
 0x300   : > { %v2885_v25 = vmax.bf16 %v11994_v10, %v2853_v57  ;;  %v9008_v57 = vld [vmem:[%s11922_s5 + $0x30] ss:$8 sps:$4 sm:$0xff]  }
 0x301   : > { %v2272_v52 = vpop.f32.mrb[92].mxu1  ;;  %v2886_v2 = vmax.bf16 %v11994_v10, %v2854_v41  ;;  %v9009_v41 = vld [vmem:[%s11922_s5 + $0x44] ss:$8 sps:$4 sm:$0xff]  }
 0x302   : > { %v2274_v3 = vpop.f32.mrb[93].mxu1 }
 0x303   : > { %v2276_v4 = vpop.f32.mrb[94].mxu1  ;;  %3109 = vmatprep.subr.bf16.mxu0 %v2886_v2  ;;  %v9018_v2 = vld [vmem:[%s11922_s5 + $0x74] ss:$8 sps:$4 sm:$0xff]  }
 0x304   : > { %v2311_v27 = vpack.c.bf16 %v2276_v4, %v2272_v52  ;;  %v2278_v39 = vpop.f32.mrb[95].mxu1  ;;  %3110 = vmatpush1.bf16.msra.mxu0 %v2885_v25  ;;  %v9017_v52 = vld [vmem:[%s11922_s5 + $0x60] ss:$8 sps:$4 sm:$0xff]   ;;  %v9020_v25 = vld [vmem:[%s11922_s5 + $0x70] ss:$8 sps:$4 sm:$0xff]  }
 0x305   : > { %v2312_v50 = vpack.c.bf16 %v2278_v39, %v2274_v3  ;;  %v9021_v3 = vld [vmem:[%s11922_s5 + $0x84] ss:$8 sps:$4 sm:$0xff]   ;;  %v9023_v4 = vld [vmem:[%s11922_s5 + $0x80] ss:$8 sps:$4 sm:$0xff]  }
 0x306   : > { %v2855_v40 = vadd.bf16 %v8499_v22, %v2311_v27  ;;  %v9026_v27 = vld [vmem:[%s11922_s5 + $0x90] ss:$8 sps:$4 sm:$0xff]   ;;  %v9027_v39 = vld [vmem:[%s11922_s5 + $0xa4] ss:$8 sps:$4 sm:$0xff]  }
 0x307   : > { %v2856_v34 = vadd.bf16 %v8499_v22, %v2312_v50  ;;  %v9024_v22 = vld [vmem:[%s11922_s5 + $0x94] ss:$8 sps:$4 sm:$0xff]   ;;  %v9029_v50 = vld [vmem:[%s11922_s5 + $0xa0] ss:$8 sps:$4 sm:$0xff]  }
 0x308   : > { %v2887_v48 = vmax.bf16 %v11994_v10, %v2855_v40  ;;  %v9030_v40 = vld [vmem:[%s11922_s5 + $0xb4] ss:$8 sps:$4 sm:$0xff]  }
 0x309   : > { %v2888_v47 = vmax.bf16 %v11994_v10, %v2856_v34  ;;  %v9032_v34 = vld [vmem:[%s11922_s5 + $0xb0] ss:$8 sps:$4 sm:$0xff]  }
 0x30b   : > { %3111 = vmatprep.subr.bf16.mxu0 %v2888_v47  ;;  %v9033_v47 = vld [vmem:[%s11922_s5 + $0xc4] ss:$8 sps:$4 sm:$0xff]  }
 0x30c   : > { %3112 = vmatpush1.bf16.msra.mxu0 %v2887_v48  ;;  %v9035_v48 = vld [vmem:[%s11922_s5 + $0xc0] ss:$8 sps:$4 sm:$0xff]  }
 0x30f   : > { %3114 = vmatmul.mubr.bf16.vlgmr.msra.gmra.mrb[32].mxu0 %v8997_v13  ;;  %v9036_v13 = vld [vmem:[%s11922_s5 + $0xd4] ss:$8 sps:$4 sm:$0xff]  }
 0x310   : > { %3123 = vmatprep.mubr.bf16.mxu0 %v9000_v61  ;;  %v9038_v61 = vld [vmem:[%s11922_s5 + $0xd0] ss:$8 sps:$4 sm:$0xff]  }
 0x317   : > { %3124 = vmatmul.mubr.bf16.gmra.mrb[36].mxu0 %v9002_v12  ;;  %v9039_v12 = vld [vmem:[%s11922_s5 + $0xe4] ss:$8 sps:$4 sm:$0xff]  }
 0x318   : > { %3133 = vmatprep.mubr.bf16.mxu0 %v9003_v17  ;;  %v9041_v17 = vld [vmem:[%s11922_s5 + $0xe0] ss:$8 sps:$4 sm:$0xff]  }
 0x31f   : > { %3134 = vmatmul.mubr.bf16.gmra.mrb[40].mxu0 %v9005_v19  ;;  %v9042_v19 = vld [vmem:[%s11922_s5 + $0xf4] ss:$8 sps:$4 sm:$0xff]  }
 0x320   : > { %3143 = vmatprep.mubr.bf16.mxu0 %v9006_v9  ;;  %v9044_v9 = vld [vmem:[%s11922_s5 + $0xf0] ss:$8 sps:$4 sm:$0xff]  }
 0x327   : > { %3144 = vmatmul.mubr.bf16.gmra.mrb[44].mxu0 %v9008_v57  ;;  %v12058_v57 = vld [vmem:[#allocation36_spill] sm:$0xff] }
 0x328   : > { %3153 = vmatprep.mubr.bf16.mxu0 %v9009_v41  ;;  %v3361_v41 = vrot.slane %v12058_v57, %v10191_v8 }
 0x32f   : > { %3154 = vmatmul.mubr.bf16.gmra.mrb[48].mxu0 %v9011_v62  ;;  %v12059_v62 = vld [vmem:[#allocation37_spill] sm:$0xff] }
 0x330   : > { %3163 = vmatprep.mubr.bf16.mxu0 %v9012_v14  ;;  %v3349_v14 = vrot.slane %v12059_v62, %v10191_v8 }
 0x337   : > { %3164 = vmatmul.mubr.bf16.gmra.mrb[52].mxu0 %v9014_v51 }
 0x338   : > { %3173 = vmatprep.mubr.bf16.mxu0 %v9015_v63 }
 0x33f   : > { %3174 = vmatmul.mubr.bf16.gmra.mrb[56].mxu0 %v9017_v52 }
 0x340   : > { %3183 = vmatprep.mubr.bf16.mxu0 %v9018_v2  ;;  %v8532_v2 = vcombine.low %v3349_v14, %v3361_v41 }
 0x347   : > { %3184 = vmatmul.mubr.bf16.gmra.mrb[60].mxu0 %v9020_v25 }
 0x348   : > { %3193 = vmatprep.mubr.bf16.mxu0 %v9021_v3 }
 0x34f   : > { %3194 = vmatmul.mubr.bf16.gmra.mrb[64].mxu0 %v9023_v4  ;;  %v9047_v4 = vld [vmem:[%s11924_s7 + $0x4] ss:$8 sps:$4 sm:$0xff]  }
 0x350   : > { %3203 = vmatprep.mubr.bf16.mxu0 %v9024_v22  ;;  %4106 = vmatprep.mubr.bf16.mxu1 %v9047_v4 }
 0x357   : > { %3204 = vmatmul.mubr.bf16.gmra.mrb[68].mxu0 %v9026_v27 }
 0x358   : > { %3213 = vmatprep.mubr.bf16.mxu0 %v9027_v39 }
 0x35f   : > { %3214 = vmatmul.mubr.bf16.gmra.mrb[72].mxu0 %v9029_v50  ;;  %v12060_v50 = vld [vmem:[#allocation38_spill] sm:$0xff] }
 0x360   : > { %3223 = vmatprep.mubr.bf16.mxu0 %v9030_v40  ;;  %v3385_v40 = vrot.slane %v12060_v50, %v10191_v8 }
 0x367   : > { %3224 = vmatmul.mubr.bf16.gmra.mrb[76].mxu0 %v9032_v34  ;;  %v12061_v34 = vld [vmem:[#allocation39_spill] sm:$0xff] }
 0x368   : > { %3233 = vmatprep.mubr.bf16.mxu0 %v9033_v47  ;;  %v3373_v47 = vrot.slane %v12061_v34, %v10191_v8 }
 0x36f   : > { %3234 = vmatmul.mubr.bf16.gmra.mrb[80].mxu0 %v9035_v48 }
 0x370   : > { %3243 = vmatprep.mubr.bf16.mxu0 %v9036_v13 }
 0x377   : > { %3244 = vmatmul.mubr.bf16.gmra.mrb[84].mxu0 %v9038_v61 }
 0x378   : > { %3253 = vmatprep.mubr.bf16.mxu0 %v9039_v12 }
 0x37f   : > { %3254 = vmatmul.mubr.bf16.gmra.mrb[88].mxu0 %v9041_v17 }
 0x380   : > { %3263 = vmatprep.mubr.bf16.mxu0 %v9042_v19  ;;  %v8533_v19 = vcombine.low %v3373_v47, %v3385_v40 }
 0x387   : > { %3264 = vmatmul.mubr.bf16.gmra.mrb[92].mxu0 %v9044_v9 }
 0x3e2   : > { %v3115_v51 = vpop.f32.mrb[32].mxu0 }
 0x3e3   : > { %v3117_v63 = vpop.f32.mrb[33].mxu0 }
 0x3e4   : > { %v3119_v52 = vpop.f32.mrb[34].mxu0 }
 0x3e5   : > { %v3274_v25 = vpack.c.bf16 %v3119_v52, %v3115_v51  ;;  %v3121_v3 = vpop.f32.mrb[35].mxu0  ;;  %v12062_v51 = vld [vmem:[#allocation40_spill] sm:$0xff]  ;;  %v12063_v52 = vld [vmem:[#allocation41_spill] sm:$0xff] }
 0x3e6   : > { %v3275_v22 = vpack.c.bf16 %v3121_v3, %v3117_v63  ;;  %v3409_v63 = vrot.slane %v12062_v51, %v10191_v8 }
 0x3e7   : > { %v3818_v27 = vadd.bf16 %v8532_v2, %v3274_v25 }
 0x3e8   : > { %v3819_v39 = vadd.bf16 %v8532_v2, %v3275_v22  ;;  %v3397_v2 = vrot.slane %v12063_v52, %v10191_v8 }
 0x3e9   : > { %v3850_v61 = vmax.bf16 %v11994_v10, %v3818_v27 }
 0x3ea   : > { %v3125_v48 = vpop.f32.mrb[36].mxu0  ;;  %v3851_v13 = vmax.bf16 %v11994_v10, %v3819_v39  ;;  %v8534_v39 = vcombine.low %v3397_v2, %v3409_v63 }
 0x3eb   : > { %v3127_v12 = vpop.f32.mrb[37].mxu0 }
 0x3ec   : > { %v3129_v17 = vpop.f32.mrb[38].mxu0  ;;  %4074 = vmatprep.subr.bf16.mxu1 %v3851_v13  ;;  %v12064_v13 = vld [vmem:[#allocation42_spill] sm:$0xff] }
 0x3ed   : > { %v3276_v9 = vpack.c.bf16 %v3129_v17, %v3125_v48  ;;  %v3131_v57 = vpop.f32.mrb[39].mxu0  ;;  %4075 = vmatpush1.bf16.msra.mxu1 %v3850_v61  ;;  %v3433_v61 = vrot.slane %v12064_v13, %v10191_v8 }
 0x3ee   : > { %v3277_v41 = vpack.c.bf16 %v3131_v57, %v3127_v12  ;;  %v12065_v12 = vld [vmem:[#allocation43_spill] sm:$0xff] }
 0x3ef   : > { %v3820_v62 = vadd.bf16 %v8533_v19, %v3276_v9  ;;  %v3421_v17 = vrot.slane %v12065_v12, %v10191_v8 }
 0x3f0   : > { %v3821_v14 = vadd.bf16 %v8533_v19, %v3277_v41 }
 0x3f1   : > { %v3852_v4 = vmax.bf16 %v11994_v10, %v3820_v62 }
 0x3f2   : > { %v3135_v25 = vpop.f32.mrb[40].mxu0  ;;  %v3853_v3 = vmax.bf16 %v11994_v10, %v3821_v14  ;;  %v8535_v14 = vcombine.low %v3421_v17, %v3433_v61 }
 0x3f3   : > { %v3137_v22 = vpop.f32.mrb[41].mxu0 }
 0x3f4   : > { %v3139_v27 = vpop.f32.mrb[42].mxu0  ;;  %4076 = vmatprep.subr.bf16.mxu1 %v3853_v3  ;;  %v12066_v3 = vld [vmem:[#allocation45_spill] sm:$0xff] }
 0x3f5   : > { %v3278_v50 = vpack.c.bf16 %v3139_v27, %v3135_v25  ;;  %v3141_v40 = vpop.f32.mrb[43].mxu0  ;;  %4077 = vmatpush1.bf16.msra.mxu1 %v3852_v4  ;;  %v3457_v4 = vrot.slane %v12066_v3, %v10191_v8 }
 0x3f6   : > { %v3279_v34 = vpack.c.bf16 %v3141_v40, %v3137_v22  ;;  %v12067_v22 = vld [vmem:[#allocation46_spill] sm:$0xff] }
 0x3f7   : > { %v3822_v47 = vadd.bf16 %v8534_v39, %v3278_v50  ;;  %v3445_v27 = vrot.slane %v12067_v22, %v10191_v8 }
 0x3f8   : > { %v3823_v48 = vadd.bf16 %v8534_v39, %v3279_v34 }
 0x3f9   : > { %v3854_v57 = vmax.bf16 %v11994_v10, %v3822_v47 }
 0x3fa   : > { %v3145_v19 = vpop.f32.mrb[44].mxu0  ;;  %v3855_v9 = vmax.bf16 %v11994_v10, %v3823_v48  ;;  %v8536_v48 = vcombine.low %v3445_v27, %v3457_v4 }
 0x3fb   : > { %v3147_v41 = vpop.f32.mrb[45].mxu0 }
 0x3fc   : > { %v3149_v62 = vpop.f32.mrb[46].mxu0  ;;  %4078 = vmatprep.subr.bf16.mxu1 %v3855_v9  ;;  %v12068_v9 = vld [vmem:[#allocation47_spill] sm:$0xff] }
 0x3fd   : > { %v3280_v51 = vpack.c.bf16 %v3149_v62, %v3145_v19  ;;  %v3151_v63 = vpop.f32.mrb[47].mxu0  ;;  %4079 = vmatpush1.bf16.msra.mxu1 %v3854_v57  ;;  %v3481_v57 = vrot.slane %v12068_v9, %v10191_v8 }
 0x3fe   : > { %v3281_v52 = vpack.c.bf16 %v3151_v63, %v3147_v41  ;;  %v12069_v41 = vld [vmem:[#allocation48_spill] sm:$0xff] }
 0x3ff   : > { %v3824_v2 = vadd.bf16 %v8535_v14, %v3280_v51  ;;  %v3469_v62 = vrot.slane %v12069_v41, %v10191_v8 }
 0x400   : > { %v3825_v25 = vadd.bf16 %v8535_v14, %v3281_v52 }
 0x401   : > { %v3856_v40 = vmax.bf16 %v11994_v10, %v3824_v2 }
 0x402   : > { %v3155_v39 = vpop.f32.mrb[48].mxu0  ;;  %v3857_v50 = vmax.bf16 %v11994_v10, %v3825_v25  ;;  %v8537_v25 = vcombine.low %v3469_v62, %v3481_v57 }
 0x403   : > { %v3157_v34 = vpop.f32.mrb[49].mxu0 }
 0x404   : > { %v3159_v47 = vpop.f32.mrb[50].mxu0  ;;  %4080 = vmatprep.subr.bf16.mxu1 %v3857_v50  ;;  %v12070_v50 = vld [vmem:[#allocation49_spill] sm:$0xff] }
 0x405   : > { %v3282_v13 = vpack.c.bf16 %v3159_v47, %v3155_v39  ;;  %v3161_v61 = vpop.f32.mrb[51].mxu0  ;;  %4081 = vmatpush1.bf16.msra.mxu1 %v3856_v40  ;;  %v3505_v40 = vrot.slane %v12070_v50, %v10191_v8 }
 0x406   : > { %v3283_v12 = vpack.c.bf16 %v3161_v61, %v3157_v34  ;;  %v12071_v34 = vld [vmem:[#allocation50_spill] sm:$0xff] }
 0x407   : > { %v3826_v17 = vadd.bf16 %v8536_v48, %v3282_v13  ;;  %v3493_v47 = vrot.slane %v12071_v34, %v10191_v8 }
 0x408   : > { %v3827_v19 = vadd.bf16 %v8536_v48, %v3283_v12 }
 0x409   : > { %v3858_v63 = vmax.bf16 %v11994_v10, %v3826_v17 }
 0x40a   : > { %v3165_v14 = vpop.f32.mrb[52].mxu0  ;;  %v3859_v51 = vmax.bf16 %v11994_v10, %v3827_v19  ;;  %v8538_v19 = vcombine.low %v3493_v47, %v3505_v40 }
 0x40b   : > { %v3167_v52 = vpop.f32.mrb[53].mxu0 }
 0x40c   : > { %v3169_v2 = vpop.f32.mrb[54].mxu0  ;;  %4082 = vmatprep.subr.bf16.mxu1 %v3859_v51  ;;  %v12072_v51 = vld [vmem:[#allocation51_spill] sm:$0xff] }
 0x40d   : > { %v3284_v3 = vpack.c.bf16 %v3169_v2, %v3165_v14  ;;  %v3171_v4 = vpop.f32.mrb[55].mxu0  ;;  %4083 = vmatpush1.bf16.msra.mxu1 %v3858_v63  ;;  %v3529_v63 = vrot.slane %v12072_v51, %v10191_v8 }
 0x40e   : > { %v3285_v22 = vpack.c.bf16 %v3171_v4, %v3167_v52  ;;  %v12073_v52 = vld [vmem:[#allocation52_spill] sm:$0xff] }
 0x40f   : > { %v3828_v27 = vadd.bf16 %v8537_v25, %v3284_v3  ;;  %v3517_v2 = vrot.slane %v12073_v52, %v10191_v8 }
 0x410   : > { %v3829_v39 = vadd.bf16 %v8537_v25, %v3285_v22 }
 0x411   : > { %v3860_v61 = vmax.bf16 %v11994_v10, %v3828_v27 }
 0x412   : > { %v3175_v48 = vpop.f32.mrb[56].mxu0  ;;  %v3861_v13 = vmax.bf16 %v11994_v10, %v3829_v39  ;;  %v8539_v39 = vcombine.low %v3517_v2, %v3529_v63 }
 0x413   : > { %v3177_v12 = vpop.f32.mrb[57].mxu0 }
 0x414   : > { %v3179_v17 = vpop.f32.mrb[58].mxu0  ;;  %4084 = vmatprep.subr.bf16.mxu1 %v3861_v13  ;;  %v12074_v13 = vld [vmem:[#allocation53_spill] sm:$0xff] }
 0x415   : > { %v3286_v9 = vpack.c.bf16 %v3179_v17, %v3175_v48  ;;  %v3181_v57 = vpop.f32.mrb[59].mxu0  ;;  %4085 = vmatpush1.bf16.msra.mxu1 %v3860_v61  ;;  %v3553_v61 = vrot.slane %v12074_v13, %v10191_v8 }
 0x416   : > { %v3287_v41 = vpack.c.bf16 %v3181_v57, %v3177_v12  ;;  %v12075_v12 = vld [vmem:[#allocation54_spill] sm:$0xff] }
 0x417   : > { %v3830_v62 = vadd.bf16 %v8538_v19, %v3286_v9  ;;  %v3541_v17 = vrot.slane %v12075_v12, %v10191_v8 }
 0x418   : > { %v3831_v14 = vadd.bf16 %v8538_v19, %v3287_v41 }
 0x419   : > { %v3862_v4 = vmax.bf16 %v11994_v10, %v3830_v62 }
 0x41a   : > { %v3185_v25 = vpop.f32.mrb[60].mxu0  ;;  %v3863_v3 = vmax.bf16 %v11994_v10, %v3831_v14  ;;  %v8540_v14 = vcombine.low %v3541_v17, %v3553_v61 }
 0x41b   : > { %v3187_v22 = vpop.f32.mrb[61].mxu0 }
 0x41c   : > { %v3189_v27 = vpop.f32.mrb[62].mxu0  ;;  %4086 = vmatprep.subr.bf16.mxu1 %v3863_v3  ;;  %v12076_v3 = vld [vmem:[#allocation55_spill] sm:$0xff] }
 0x41d   : > { %v3288_v50 = vpack.c.bf16 %v3189_v27, %v3185_v25  ;;  %v3191_v40 = vpop.f32.mrb[63].mxu0  ;;  %4087 = vmatpush1.bf16.msra.mxu1 %v3862_v4  ;;  %v3577_v4 = vrot.slane %v12076_v3, %v10191_v8 }
 0x41e   : > { %v3289_v34 = vpack.c.bf16 %v3191_v40, %v3187_v22  ;;  %v12077_v22 = vld [vmem:[#allocation56_spill] sm:$0xff] }
 0x41f   : > { %v3832_v47 = vadd.bf16 %v8539_v39, %v3288_v50  ;;  %v3565_v27 = vrot.slane %v12077_v22, %v10191_v8 }
 0x420   : > { %v3833_v48 = vadd.bf16 %v8539_v39, %v3289_v34 }
 0x421   : > { %v3864_v57 = vmax.bf16 %v11994_v10, %v3832_v47 }
 0x422   : > { %v3195_v19 = vpop.f32.mrb[64].mxu0  ;;  %v3865_v9 = vmax.bf16 %v11994_v10, %v3833_v48  ;;  %v8541_v48 = vcombine.low %v3565_v27, %v3577_v4 }
 0x423   : > { %v3197_v41 = vpop.f32.mrb[65].mxu0 }
 0x424   : > { %v3199_v62 = vpop.f32.mrb[66].mxu0  ;;  %4088 = vmatprep.subr.bf16.mxu1 %v3865_v9  ;;  %v12078_v9 = vld [vmem:[#allocation57_spill] sm:$0xff] }
 0x425   : > { %v3290_v51 = vpack.c.bf16 %v3199_v62, %v3195_v19  ;;  %v3201_v63 = vpop.f32.mrb[67].mxu0  ;;  %4089 = vmatpush1.bf16.msra.mxu1 %v3864_v57  ;;  %v3601_v57 = vrot.slane %v12078_v9, %v10191_v8 }
 0x426   : > { %v3291_v52 = vpack.c.bf16 %v3201_v63, %v3197_v41  ;;  %v12079_v41 = vld [vmem:[#allocation58_spill] sm:$0xff] }
 0x427   : > { %v3834_v2 = vadd.bf16 %v8540_v14, %v3290_v51  ;;  %v3589_v62 = vrot.slane %v12079_v41, %v10191_v8 }
 0x428   : > { %v3835_v25 = vadd.bf16 %v8540_v14, %v3291_v52 }
 0x429   : > { %v3866_v40 = vmax.bf16 %v11994_v10, %v3834_v2 }
 0x42a   : > { %v3205_v39 = vpop.f32.mrb[68].mxu0  ;;  %v3867_v50 = vmax.bf16 %v11994_v10, %v3835_v25  ;;  %v8542_v25 = vcombine.low %v3589_v62, %v3601_v57 }
 0x42b   : > { %v3207_v34 = vpop.f32.mrb[69].mxu0 }
 0x42c   : > { %v3209_v47 = vpop.f32.mrb[70].mxu0  ;;  %4090 = vmatprep.subr.bf16.mxu1 %v3867_v50  ;;  %v12080_v50 = vld [vmem:[#allocation60_spill] sm:$0xff] }
 0x42d   : > { %v3292_v13 = vpack.c.bf16 %v3209_v47, %v3205_v39  ;;  %v3211_v61 = vpop.f32.mrb[71].mxu0  ;;  %4091 = vmatpush1.bf16.msra.mxu1 %v3866_v40  ;;  %v3625_v40 = vrot.slane %v12080_v50, %v10191_v8 }
 0x42e   : > { %v3293_v12 = vpack.c.bf16 %v3211_v61, %v3207_v34  ;;  %v12081_v34 = vld [vmem:[#allocation61_spill] sm:$0xff] }
 0x42f   : > { %v3836_v17 = vadd.bf16 %v8541_v48, %v3292_v13  ;;  %v3613_v47 = vrot.slane %v12081_v34, %v10191_v8 }
 0x430   : > { %v3837_v19 = vadd.bf16 %v8541_v48, %v3293_v12 }
 0x431   : > { %v3868_v63 = vmax.bf16 %v11994_v10, %v3836_v17 }
 0x432   : > { %v3215_v14 = vpop.f32.mrb[72].mxu0  ;;  %v3869_v51 = vmax.bf16 %v11994_v10, %v3837_v19  ;;  %v8543_v19 = vcombine.low %v3613_v47, %v3625_v40 }
 0x433   : > { %v3217_v52 = vpop.f32.mrb[73].mxu0 }
 0x434   : > { %v3219_v2 = vpop.f32.mrb[74].mxu0  ;;  %4092 = vmatprep.subr.bf16.mxu1 %v3869_v51  ;;  %v12082_v51 = vld [vmem:[#allocation63_spill] sm:$0xff] }
 0x435   : > { %v3294_v3 = vpack.c.bf16 %v3219_v2, %v3215_v14  ;;  %v3221_v4 = vpop.f32.mrb[75].mxu0  ;;  %4093 = vmatpush1.bf16.msra.mxu1 %v3868_v63  ;;  %v3649_v63 = vrot.slane %v12082_v51, %v10191_v8 }
 0x436   : > { %v3295_v22 = vpack.c.bf16 %v3221_v4, %v3217_v52  ;;  %v12083_v52 = vld [vmem:[#allocation64_spill] sm:$0xff] }
 0x437   : > { %v3838_v27 = vadd.bf16 %v8542_v25, %v3294_v3  ;;  %v3637_v2 = vrot.slane %v12083_v52, %v10191_v8 }
 0x438   : > { %v3839_v39 = vadd.bf16 %v8542_v25, %v3295_v22 }
 0x439   : > { %v3870_v61 = vmax.bf16 %v11994_v10, %v3838_v27 }
 0x43a   : > { %v3225_v48 = vpop.f32.mrb[76].mxu0  ;;  %v3871_v13 = vmax.bf16 %v11994_v10, %v3839_v39  ;;  %v8544_v39 = vcombine.low %v3637_v2, %v3649_v63 }
 0x43b   : > { %v3227_v12 = vpop.f32.mrb[77].mxu0 }
 0x43c   : > { %v3229_v17 = vpop.f32.mrb[78].mxu0  ;;  %4094 = vmatprep.subr.bf16.mxu1 %v3871_v13  ;;  %v3673_v13 = vrot.slane %v10490_v31, %v10191_v8  ;;  %v3697_v31 = vrot.slane %v10519_v46, %v10191_v8  ;;  %v3721_v46 = vrot.slane %v10548_v53, %v10191_v8 }
 0x43d   : > { %v3296_v9 = vpack.c.bf16 %v3229_v17, %v3225_v48  ;;  %v3231_v57 = vpop.f32.mrb[79].mxu0  ;;  %4095 = vmatpush1.bf16.msra.mxu1 %v3870_v61  ;;  %v3661_v61 = vrot.slane %v10479_v5, %v10191_v8  ;;  %v3685_v5 = vrot.slane %v10516_v33, %v10191_v8  ;;  %v3709_v33 = vrot.slane %v10539_v16, %v10191_v8  ;;  %v9045_v16 = vld [vmem:[%s11924_s7] ss:$8 sps:$4 sm:$0xff]  }
 0x43e   : > { %v3297_v41 = vpack.c.bf16 %v3231_v57, %v3227_v12 }
 0x43f   : > { %v3840_v62 = vadd.bf16 %v8543_v19, %v3296_v9 }
 0x440   : > { %v3841_v14 = vadd.bf16 %v8543_v19, %v3297_v41  ;;  %v8545_v41 = vcombine.low %v3661_v61, %v3673_v13 }
 0x441   : > { %v3872_v4 = vmax.bf16 %v11994_v10, %v3840_v62 }
 0x442   : > { %v3235_v25 = vpop.f32.mrb[80].mxu0  ;;  %v3873_v3 = vmax.bf16 %v11994_v10, %v3841_v14 }
 0x443   : > { %v3237_v22 = vpop.f32.mrb[81].mxu0 }
 0x444   : > { %v3239_v27 = vpop.f32.mrb[82].mxu0  ;;  %4096 = vmatprep.subr.bf16.mxu1 %v3873_v3 }
 0x445   : > { %v3298_v50 = vpack.c.bf16 %v3239_v27, %v3235_v25  ;;  %v3241_v40 = vpop.f32.mrb[83].mxu0  ;;  %4097 = vmatpush1.bf16.msra.mxu1 %v3872_v4  ;;  %v8546_v27 = vcombine.low %v3685_v5, %v3697_v31  ;;  %v9051_v31 = vld [vmem:[%s11924_s7 + $0x24] ss:$8 sps:$4 sm:$0xff]   ;;  %v9053_v5 = vld [vmem:[%s11924_s7 + $0x20] ss:$8 sps:$4 sm:$0xff]  }
 0x446   : > { %v3299_v34 = vpack.c.bf16 %v3241_v40, %v3237_v22 }
 0x447   : > { %v3842_v47 = vadd.bf16 %v8544_v39, %v3298_v50 }
 0x448   : > { %v3843_v48 = vadd.bf16 %v8544_v39, %v3299_v34 }
 0x449   : > { %v3874_v19 = vmax.bf16 %v11994_v10, %v3842_v47 }
 0x44a   : > { %v3245_v12 = vpop.f32.mrb[84].mxu0  ;;  %v3875_v17 = vmax.bf16 %v11994_v10, %v3843_v48 }
 0x44b   : > { %v3247_v9 = vpop.f32.mrb[85].mxu0 }
 0x44c   : > { %v3249_v57 = vpop.f32.mrb[86].mxu0  ;;  %4098 = vmatprep.subr.bf16.mxu1 %v3875_v17 }
 0x44d   : > { %v3300_v62 = vpack.c.bf16 %v3249_v57, %v3245_v12  ;;  %v3251_v14 = vpop.f32.mrb[87].mxu0  ;;  %4099 = vmatpush1.bf16.msra.mxu1 %v3874_v19  ;;  %v8547_v19 = vcombine.low %v3709_v33, %v3721_v46  ;;  %v9071_v46 = vld [vmem:[%s11924_s7 + $0x80] ss:$8 sps:$4 sm:$0xff]   ;;  %v9072_v33 = vld [vmem:[%s11924_s7 + $0x94] ss:$8 sps:$4 sm:$0xff]  }
 0x44e   : > { %v3301_v51 = vpack.c.bf16 %v3251_v14, %v3247_v9 }
 0x44f   : > { %v3844_v63 = vadd.bf16 %v8545_v41, %v3300_v62 }
 0x450   : > { %v3845_v52 = vadd.bf16 %v8545_v41, %v3301_v51 }
 0x451   : > { %v3876_v3 = vmax.bf16 %v11994_v10, %v3844_v63  ;;  %v9048_v63 = vld [vmem:[%s11924_s7 + $0x14] ss:$8 sps:$4 sm:$0xff]  }
 0x452   : > { %v3255_v2 = vpop.f32.mrb[88].mxu0  ;;  %v3877_v25 = vmax.bf16 %v11994_v10, %v3845_v52  ;;  %v9050_v52 = vld [vmem:[%s11924_s7 + $0x10] ss:$8 sps:$4 sm:$0xff]  }
 0x453   : > { %v3257_v4 = vpop.f32.mrb[89].mxu0 }
 0x454   : > { %v3259_v22 = vpop.f32.mrb[90].mxu0  ;;  %4100 = vmatprep.subr.bf16.mxu1 %v3877_v25  ;;  %v9056_v25 = vld [vmem:[%s11924_s7 + $0x30] ss:$8 sps:$4 sm:$0xff]  }
 0x455   : > { %v3302_v39 = vpack.c.bf16 %v3259_v22, %v3255_v2  ;;  %v3261_v50 = vpop.f32.mrb[91].mxu0  ;;  %4101 = vmatpush1.bf16.msra.mxu1 %v3876_v3  ;;  %v9054_v2 = vld [vmem:[%s11924_s7 + $0x34] ss:$8 sps:$4 sm:$0xff]   ;;  %v9057_v3 = vld [vmem:[%s11924_s7 + $0x44] ss:$8 sps:$4 sm:$0xff]  }
 0x456   : > { %v3303_v40 = vpack.c.bf16 %v3261_v50, %v3257_v4  ;;  %v9059_v4 = vld [vmem:[%s11924_s7 + $0x40] ss:$8 sps:$4 sm:$0xff]   ;;  %v9060_v22 = vld [vmem:[%s11924_s7 + $0x54] ss:$8 sps:$4 sm:$0xff]  }
 0x457   : > { %v3846_v34 = vadd.bf16 %v8546_v27, %v3302_v39  ;;  %v9063_v39 = vld [vmem:[%s11924_s7 + $0x64] ss:$8 sps:$4 sm:$0xff]   ;;  %v9065_v50 = vld [vmem:[%s11924_s7 + $0x60] ss:$8 sps:$4 sm:$0xff]  }
 0x458   : > { %v3847_v47 = vadd.bf16 %v8546_v27, %v3303_v40  ;;  %v9062_v27 = vld [vmem:[%s11924_s7 + $0x50] ss:$8 sps:$4 sm:$0xff]   ;;  %v9066_v40 = vld [vmem:[%s11924_s7 + $0x74] ss:$8 sps:$4 sm:$0xff]  }
 0x459   : > { %v3878_v61 = vmax.bf16 %v11994_v10, %v3846_v34  ;;  %v9068_v34 = vld [vmem:[%s11924_s7 + $0x70] ss:$8 sps:$4 sm:$0xff]  }
 0x45a   : > { %v3265_v48 = vpop.f32.mrb[92].mxu0  ;;  %v3879_v13 = vmax.bf16 %v11994_v10, %v3847_v47  ;;  %v9069_v47 = vld [vmem:[%s11924_s7 + $0x84] ss:$8 sps:$4 sm:$0xff]  }
 0x45b   : > { %v3267_v12 = vpop.f32.mrb[93].mxu0 }
 0x45c   : > { %v3269_v17 = vpop.f32.mrb[94].mxu0  ;;  %4102 = vmatprep.subr.bf16.mxu1 %v3879_v13  ;;  %v9075_v13 = vld [vmem:[%s11924_s7 + $0xa4] ss:$8 sps:$4 sm:$0xff]  }
 0x45d   : > { %v3304_v9 = vpack.c.bf16 %v3269_v17, %v3265_v48  ;;  %v3271_v57 = vpop.f32.mrb[95].mxu0  ;;  %4103 = vmatpush1.bf16.msra.mxu1 %v3878_v61  ;;  %v9074_v48 = vld [vmem:[%s11924_s7 + $0x90] ss:$8 sps:$4 sm:$0xff]   ;;  %v9077_v61 = vld [vmem:[%s11924_s7 + $0xa0] ss:$8 sps:$4 sm:$0xff]  }
 0x45e   : > { %v3305_v41 = vpack.c.bf16 %v3271_v57, %v3267_v12  ;;  %v9078_v12 = vld [vmem:[%s11924_s7 + $0xb4] ss:$8 sps:$4 sm:$0xff]   ;;  %v9080_v17 = vld [vmem:[%s11924_s7 + $0xb0] ss:$8 sps:$4 sm:$0xff]  }
 0x45f   : > { %v3848_v62 = vadd.bf16 %v8547_v19, %v3304_v9  ;;  %v9083_v9 = vld [vmem:[%s11924_s7 + $0xc0] ss:$8 sps:$4 sm:$0xff]   ;;  %v9084_v57 = vld [vmem:[%s11924_s7 + $0xd4] ss:$8 sps:$4 sm:$0xff]  }
 0x460   : > { %v3849_v14 = vadd.bf16 %v8547_v19, %v3305_v41  ;;  %v9081_v19 = vld [vmem:[%s11924_s7 + $0xc4] ss:$8 sps:$4 sm:$0xff]   ;;  %v9086_v41 = vld [vmem:[%s11924_s7 + $0xd0] ss:$8 sps:$4 sm:$0xff]  }
 0x461   : > { %v3880_v51 = vmax.bf16 %v11994_v10, %v3848_v62  ;;  %v9087_v62 = vld [vmem:[%s11924_s7 + $0xe4] ss:$8 sps:$4 sm:$0xff]  }
 0x462   : > { %v3881_v53 = vmax.bf16 %v11994_v10, %v3849_v14  ;;  %v9089_v14 = vld [vmem:[%s11924_s7 + $0xe0] ss:$8 sps:$4 sm:$0xff]  }
 0x464   : > { %4104 = vmatprep.subr.bf16.mxu1 %v3881_v53  ;;  %v9090_v53 = vld [vmem:[%s11924_s7 + $0xf4] ss:$8 sps:$4 sm:$0xff]  }
 0x465   : > { %4105 = vmatpush1.bf16.msra.mxu1 %v3880_v51  ;;  %v9092_v51 = vld [vmem:[%s11924_s7 + $0xf0] ss:$8 sps:$4 sm:$0xff]  }
 0x468   : > { %4107 = vmatmul.mubr.bf16.vlgmr.msra.gmra.mrb[96].mxu1 %v9045_v16  ;;  %v4354_v16 = vrot.slane %v10577_v28, %v10191_v8 }
 0x469   : > { %4116 = vmatprep.mubr.bf16.mxu1 %v9048_v63  ;;  %v4342_v63 = vrot.slane %v10574_v49, %v10191_v8 }
 0x470   : > { %4117 = vmatmul.mubr.bf16.gmra.mrb[100].mxu1 %v9050_v52 }
 0x471   : > { %4126 = vmatprep.mubr.bf16.mxu1 %v9051_v31 }
 0x478   : > { %4127 = vmatmul.mubr.bf16.gmra.mrb[104].mxu1 %v9053_v5 }
 0x479   : > { %4136 = vmatprep.mubr.bf16.mxu1 %v9054_v2  ;;  %v8580_v2 = vcombine.low %v4342_v63, %v4354_v16 }
 0x480   : > { %4137 = vmatmul.mubr.bf16.gmra.mrb[108].mxu1 %v9056_v25 }
 0x481   : > { %4146 = vmatprep.mubr.bf16.mxu1 %v9057_v3 }
 0x488   : > { %4147 = vmatmul.mubr.bf16.gmra.mrb[112].mxu1 %v9059_v4 }
 0x489   : > { %4156 = vmatprep.mubr.bf16.mxu1 %v9060_v22 }
 0x490   : > { %4157 = vmatmul.mubr.bf16.gmra.mrb[116].mxu1 %v9062_v27 }
 0x491   : > { %4166 = vmatprep.mubr.bf16.mxu1 %v9063_v39  ;;  %v4378_v39 = vrot.slane %v10610_v20, %v10191_v8 }
 0x498   : > { %4167 = vmatmul.mubr.bf16.gmra.mrb[120].mxu1 %v9065_v50  ;;  %v4366_v50 = vrot.slane %v10601_v21, %v10191_v8  ;;  %v9237_v21 = vld [vmem:[%s9508_s0] sm:$0xff] }
 0x499   : > { %4176 = vmatprep.mubr.bf16.mxu1 %v9066_v40 }
 0x4a0   : > { %4177 = vmatmul.mubr.bf16.gmra.mrb[124].mxu1 %v9068_v34 }
 0x4a1   : > { %4186 = vmatprep.mubr.bf16.mxu1 %v9069_v47  ;;  %v9095_v47 = vld [vmem:[%s11926_s9 + $0x4] ss:$8 sps:$4 sm:$0xff]  }
 0x4a2   : > { %5451 = vmatprep.mubr.bf16.mxu0 %v9095_v47  ;;  %v4426_v47 = vrot.slane %v10653_v11, %v10191_v8  ;;  %v9241_v11 = vld [vmem:[%s9508_s0 + $0x20] sm:$0xff] }
 0x4a8   : > { %4187 = vmatmul.mubr.bf16.gmra.mrb[128].mxu1 %v9071_v46 }
 0x4a9   : > { %4196 = vmatprep.mubr.bf16.mxu1 %v9072_v33 }
 0x4b0   : > { %4197 = vmatmul.mubr.bf16.gmra.mrb[132].mxu1 %v9074_v48 }
 0x4b1   : > { %4206 = vmatprep.mubr.bf16.mxu1 %v9075_v13  ;;  %v8581_v13 = vcombine.low %v4366_v50, %v4378_v39  ;;  %v9240_v50 = vld [vmem:[%s9508_s0 + $0x18] sm:$0xff] }
 0x4b8   : > { %4207 = vmatmul.mubr.bf16.gmra.mrb[136].mxu1 %v9077_v61 }
 0x4b9   : > { %4216 = vmatprep.mubr.bf16.mxu1 %v9078_v12 }
 0x4c0   : > { %4217 = vmatmul.mubr.bf16.gmra.mrb[140].mxu1 %v9080_v17 }
 0x4c1   : > { %4226 = vmatprep.mubr.bf16.mxu1 %v9081_v19  ;;  %v9238_v19 = vld [vmem:[%s9508_s0 + $0x8] sm:$0xff] }
 0x4c8   : > { %4227 = vmatmul.mubr.bf16.gmra.mrb[144].mxu1 %v9083_v9 }
 0x4c9   : > { %4236 = vmatprep.mubr.bf16.mxu1 %v9084_v57 }
 0x4d0   : > { %4237 = vmatmul.mubr.bf16.gmra.mrb[148].mxu1 %v9086_v41 }
 0x4d1   : > { %4246 = vmatprep.mubr.bf16.mxu1 %v9087_v62 }
 0x4d8   : > { %4247 = vmatmul.mubr.bf16.gmra.mrb[152].mxu1 %v9089_v14 }
 0x4d9   : > { %4256 = vmatprep.mubr.bf16.mxu1 %v9090_v53  ;;  %v4402_v53 = vrot.slane %v10635_v56, %v10191_v8  ;;  %v9239_v56 = vld [vmem:[%s9508_s0 + $0x10] sm:$0xff] }
 0x4e0   : > { %4257 = vmatmul.mubr.bf16.gmra.mrb[156].mxu1 %v9092_v51  ;;  %v4390_v51 = vrot.slane %v10629_v45, %v10191_v8 }
 0x53b   : > { %v4108_v52 = vpop.f32.mrb[96].mxu1 }
 0x53c   : > { %v4110_v31 = vpop.f32.mrb[97].mxu1 }
 0x53d   : > { %v4112_v5 = vpop.f32.mrb[98].mxu1 }
 0x53e   : > { %v4267_v25 = vpack.c.bf16 %v4112_v5, %v4108_v52  ;;  %v4114_v3 = vpop.f32.mrb[99].mxu1 }
 0x53f   : > { %v4268_v4 = vpack.c.bf16 %v4114_v3, %v4110_v31  ;;  %v8582_v3 = vcombine.low %v4390_v51, %v4402_v53 }
 0x540   : > { %v4811_v22 = vadd.bf16 %v8580_v2, %v4267_v25 }
 0x541   : > { %v4812_v27 = vadd.bf16 %v8580_v2, %v4268_v4 }
 0x542   : > { %v4843_v28 = vmax.bf16 %v11994_v10, %v4811_v22 }
 0x543   : > { %v4844_v49 = vmax.bf16 %v11994_v10, %v4812_v27  ;;  %v4118_v40 = vpop.f32.mrb[100].mxu1 }
 0x544   : > { %v4120_v34 = vpop.f32.mrb[101].mxu1 }
 0x545   : > { %v8596_v46 = vcombine.low %v4843_v28, %v4844_v49  ;;  %v8597_v33 = vcombine.high %v4843_v28, %v4844_v49  ;;  %v4122_v48 = vpop.f32.mrb[102].mxu1 }
 0x546   : > { %v4269_v61 = vpack.c.bf16 %v4122_v48, %v4118_v40  ;;  %v4124_v20 = vpop.f32.mrb[103].mxu1 }
 0x547   : > { %v4270_v12 = vpack.c.bf16 %v4124_v20, %v4120_v34  ;;  %v5035_v17 = vadd.bf16 %v9237_v21, %v8596_v46  ;;  %v5036_v9 = vadd.bf16 %v9238_v19, %v8597_v33  ;;  %v4414_v46 = vrot.slane %v10648_v44, %v10191_v8 }
 0x548   : > { %v4813_v57 = vadd.bf16 %v8581_v13, %v4269_v61 }
 0x549   : > { %v4814_v41 = vadd.bf16 %v8581_v13, %v4270_v12  ;;  %v8661_v62 = vcombine.high %v5035_v17, %v5036_v9  ;;  %v8660_v14 = vcombine.low %v5035_v17, %v5036_v9  ;;  %v8583_v17 = vcombine.low %v4414_v46, %v4426_v47 }
 0x54a   : > { %v4845_v16 = vmax.bf16 %v11994_v10, %v4813_v57  ;;  %v4474_v46 = vrot.slane %v10692_v43, %v10191_v8  ;;  %v9245_v43 = vld [vmem:[%s9508_s0 + $0x40] sm:$0xff] }
 0x54b   : > { %v4846_v63 = vmax.bf16 %v11994_v10, %v4814_v41  ;;  %v4128_v52 = vpop.f32.mrb[104].mxu1  ;;  %5419 = vmatprep.subr.bf16.mxu0 %v8661_v62  ;;  %v9242_v62 = vld [vmem:[%s9508_s0 + $0x28] sm:$0xff] }
 0x54c   : > { %v4130_v31 = vpop.f32.mrb[105].mxu1  ;;  %5420 = vmatpush1.bf16.msra.mxu0 %v8660_v14 }
 0x54d   : > { %v8598_v5 = vcombine.low %v4845_v16, %v4846_v63  ;;  %v8599_v2 = vcombine.high %v4845_v16, %v4846_v63  ;;  %v4132_v25 = vpop.f32.mrb[106].mxu1  ;;  %v4450_v63 = vrot.slane %v10673_v60, %v10191_v8  ;;  %v9243_v60 = vld [vmem:[%s9508_s0 + $0x30] sm:$0xff] }
 0x54e   : > { %v4271_v4 = vpack.c.bf16 %v4132_v25, %v4128_v52  ;;  %v4134_v22 = vpop.f32.mrb[107].mxu1  ;;  %v4438_v52 = vrot.slane %v10671_v59, %v10191_v8 }
 0x54f   : > { %v4272_v27 = vpack.c.bf16 %v4134_v22, %v4130_v31  ;;  %v5037_v39 = vadd.bf16 %v9239_v56, %v8598_v5  ;;  %v5038_v45 = vadd.bf16 %v9240_v50, %v8599_v2 }
 0x550   : > { %v4815_v28 = vadd.bf16 %v8582_v3, %v4271_v4 }
 0x551   : > { %v4816_v49 = vadd.bf16 %v8582_v3, %v4272_v27  ;;  %v8663_v40 = vcombine.high %v5037_v39, %v5038_v45  ;;  %v8662_v34 = vcombine.low %v5037_v39, %v5038_v45  ;;  %v8584_v27 = vcombine.low %v4438_v52, %v4450_v63 }
 0x552   : > { %v4847_v33 = vmax.bf16 %v11994_v10, %v4815_v28  ;;  %v9244_v28 = vld [vmem:[%s9508_s0 + $0x38] sm:$0xff]  ;;  %v4486_v63 = vrot.slane %v10703_v0, %v10191_v8 }
 0x553   : > { %v4848_v48 = vmax.bf16 %v11994_v10, %v4816_v49  ;;  %v4138_v13 = vpop.f32.mrb[108].mxu1  ;;  %5421 = vmatprep.subr.bf16.mxu0 %v8663_v40 }
 0x554   : > { %v4140_v61 = vpop.f32.mrb[109].mxu1  ;;  %5422 = vmatpush1.bf16.msra.mxu0 %v8662_v34 }
 0x555   : > { %v8600_v20 = vcombine.low %v4847_v33, %v4848_v48  ;;  %v8601_v12 = vcombine.high %v4847_v33, %v4848_v48  ;;  %v4142_v21 = vpop.f32.mrb[110].mxu1  ;;  %v4462_v33 = vrot.slane %v10687_v37, %v10191_v8 }
 0x556   : > { %v4273_v19 = vpack.c.bf16 %v4142_v21, %v4138_v13  ;;  %v4144_v9 = vpop.f32.mrb[111].mxu1 }
 0x557   : > { %v4274_v57 = vpack.c.bf16 %v4144_v9, %v4140_v61  ;;  %v5039_v41 = vadd.bf16 %v9241_v11, %v8600_v20  ;;  %v5040_v44 = vadd.bf16 %v9242_v62, %v8601_v12  ;;  %v9246_v62 = vld [vmem:[%s9508_s0 + $0x48] sm:$0xff] }
 0x558   : > { %v4817_v14 = vadd.bf16 %v8583_v17, %v4273_v19  ;;  %v8585_v19 = vcombine.low %v4462_v33, %v4474_v46 }
 0x559   : > { %v4818_v53 = vadd.bf16 %v8583_v17, %v4274_v57  ;;  %v8665_v51 = vcombine.high %v5039_v41, %v5040_v44  ;;  %v8664_v16 = vcombine.low %v5039_v41, %v5040_v44 }
 0x55a   : > { %v4849_v31 = vmax.bf16 %v11994_v10, %v4817_v14 }
 0x55b   : > { %v4850_v5 = vmax.bf16 %v11994_v10, %v4818_v53  ;;  %v4148_v2 = vpop.f32.mrb[112].mxu1  ;;  %5423 = vmatprep.subr.bf16.mxu0 %v8665_v51 }
 0x55c   : > { %v4150_v25 = vpop.f32.mrb[113].mxu1  ;;  %5424 = vmatpush1.bf16.msra.mxu0 %v8664_v16  ;;  %v4498_v16 = vrot.slane %v10708_v29, %v10191_v8  ;;  %v9247_v29 = vld [vmem:[%s9508_s0 + $0x50] sm:$0xff] }
 0x55d   : > { %v8602_v3 = vcombine.low %v4849_v31, %v4850_v5  ;;  %v8603_v4 = vcombine.high %v4849_v31, %v4850_v5  ;;  %v4152_v22 = vpop.f32.mrb[114].mxu1 }
 0x55e   : > { %v4275_v56 = vpack.c.bf16 %v4152_v22, %v4148_v2  ;;  %v4154_v39 = vpop.f32.mrb[115].mxu1  ;;  %v8586_v22 = vcombine.low %v4486_v63, %v4498_v16 }
 0x55f   : > { %v4276_v50 = vpack.c.bf16 %v4154_v39, %v4150_v25  ;;  %v5041_v45 = vadd.bf16 %v9243_v60, %v8602_v3  ;;  %v5042_v59 = vadd.bf16 %v9244_v28, %v8603_v4  ;;  %v9248_v60 = vld [vmem:[%s9508_s0 + $0x58] sm:$0xff] }
 0x560   : > { %v4819_v49 = vadd.bf16 %v8584_v27, %v4275_v56 }
 0x561   : > { %v4820_v40 = vadd.bf16 %v8584_v27, %v4276_v50  ;;  %v8667_v34 = vcombine.high %v5041_v45, %v5042_v59  ;;  %v8666_v47 = vcombine.low %v5041_v45, %v5042_v59 }
 0x562   : > { %v4851_v48 = vmax.bf16 %v11994_v10, %v4819_v49 }
 0x563   : > { %v4852_v13 = vmax.bf16 %v11994_v10, %v4820_v40  ;;  %v4158_v61 = vpop.f32.mrb[116].mxu1  ;;  %5425 = vmatprep.subr.bf16.mxu0 %v8667_v34  ;;  %v4522_v40 = vrot.slane %v10724_v58, %v10191_v8  ;;  %v4510_v34 = vrot.slane %v10719_v7, %v10191_v8  ;;  %v9249_v58 = vld [vmem:[%s9508_s0 + $0x60] sm:$0xff] }
 0x564   : > { %v4160_v20 = vpop.f32.mrb[117].mxu1  ;;  %5426 = vmatpush1.bf16.msra.mxu0 %v8666_v47 }
 0x565   : > { %v8604_v12 = vcombine.low %v4851_v48, %v4852_v13  ;;  %v8605_v21 = vcombine.high %v4851_v48, %v4852_v13  ;;  %v4162_v17 = vpop.f32.mrb[118].mxu1 }
 0x566   : > { %v4277_v9 = vpack.c.bf16 %v4162_v17, %v4158_v61  ;;  %v4164_v57 = vpop.f32.mrb[119].mxu1 }
 0x567   : > { %v4278_v11 = vpack.c.bf16 %v4164_v57, %v4160_v20  ;;  %v5043_v41 = vadd.bf16 %v9245_v43, %v8604_v12  ;;  %v5044_v37 = vadd.bf16 %v9246_v62, %v8605_v21  ;;  %v8587_v12 = vcombine.low %v4510_v34, %v4522_v40  ;;  %v9250_v57 = vld [vmem:[%s9508_s0 + $0x68] sm:$0xff] }
 0x568   : > { %v4821_v44 = vadd.bf16 %v8585_v19, %v4277_v9 }
 0x569   : > { %v4822_v14 = vadd.bf16 %v8585_v19, %v4278_v11  ;;  %v8669_v53 = vcombine.high %v5043_v41, %v5044_v37  ;;  %v8668_v51 = vcombine.low %v5043_v41, %v5044_v37  ;;  %v4546_v37 = vrot.slane %v10743_v6, %v10191_v8  ;;  %v9251_v6 = vld [vmem:[%s9508_s0 + $0x70] sm:$0xff] }
 0x56a   : > { %v4853_v52 = vmax.bf16 %v11994_v10, %v4821_v44  ;;  %v4534_v44 = vrot.slane %v10741_v23, %v10191_v8 }
 0x56b   : > { %v4854_v31 = vmax.bf16 %v11994_v10, %v4822_v14  ;;  %v4168_v5 = vpop.f32.mrb[120].mxu1  ;;  %5427 = vmatprep.subr.bf16.mxu0 %v8669_v53 }
 0x56c   : > { %v4170_v2 = vpop.f32.mrb[121].mxu1  ;;  %5428 = vmatpush1.bf16.msra.mxu0 %v8668_v51 }
 0x56d   : > { %v8606_v25 = vcombine.low %v4853_v52, %v4854_v31  ;;  %v8607_v3 = vcombine.high %v4853_v52, %v4854_v31  ;;  %v4172_v4 = vpop.f32.mrb[122].mxu1 }
 0x56e   : > { %v4279_v27 = vpack.c.bf16 %v4172_v4, %v4168_v5  ;;  %v4174_v56 = vpop.f32.mrb[123].mxu1  ;;  %v8588_v5 = vcombine.low %v4534_v44, %v4546_v37 }
 0x56f   : > { %v4280_v39 = vpack.c.bf16 %v4174_v56, %v4170_v2  ;;  %v5045_v50 = vadd.bf16 %v9247_v29, %v8606_v25  ;;  %v5046_v0 = vadd.bf16 %v9248_v60, %v8607_v3  ;;  %v4558_v60 = vrot.slane %v10757_v54, %v10191_v8 }
 0x570   : > { %v4823_v45 = vadd.bf16 %v8586_v22, %v4279_v27 }
 0x571   : > { %v4824_v28 = vadd.bf16 %v8586_v22, %v4280_v39  ;;  %v8671_v59 = vcombine.high %v5045_v50, %v5046_v0  ;;  %v8670_v49 = vcombine.low %v5045_v50, %v5046_v0  ;;  %v9252_v22 = vld [vmem:[%s9508_s0 + $0x78] sm:$0xff]  ;;  %v4570_v50 = vrot.slane %v10762_v55, %v10191_v8  ;;  %v9253_v55 = vld [vmem:[%s9508_s0 + $0x80] sm:$0xff] }
 0x572   : > { %v4855_v47 = vmax.bf16 %v11994_v10, %v4823_v45 }
 0x573   : > { %v4856_v46 = vmax.bf16 %v11994_v10, %v4824_v28  ;;  %v4178_v33 = vpop.f32.mrb[124].mxu1  ;;  %5429 = vmatprep.subr.bf16.mxu0 %v8671_v59 }
 0x574   : > { %v4180_v48 = vpop.f32.mrb[125].mxu1  ;;  %5430 = vmatpush1.bf16.msra.mxu0 %v8670_v49 }
 0x575   : > { %v8608_v13 = vcombine.low %v4855_v47, %v4856_v46  ;;  %v8609_v61 = vcombine.high %v4855_v47, %v4856_v46  ;;  %v4182_v20 = vpop.f32.mrb[126].mxu1  ;;  %v8589_v47 = vcombine.low %v4558_v60, %v4570_v50 }
 0x576   : > { %v4281_v21 = vpack.c.bf16 %v4182_v20, %v4178_v33  ;;  %v4184_v17 = vpop.f32.mrb[127].mxu1 }
 0x577   : > { %v4282_v19 = vpack.c.bf16 %v4184_v17, %v4180_v48  ;;  %v5047_v9 = vadd.bf16 %v9249_v58, %v8608_v13  ;;  %v5048_v7 = vadd.bf16 %v9250_v57, %v8609_v61  ;;  %v9254_v61 = vld [vmem:[%s9508_s0 + $0x88] sm:$0xff]  ;;  %v4582_v58 = vrot.slane %v10773_v1, %v10191_v8 }
 0x578   : > { %v4825_v11 = vadd.bf16 %v8587_v12, %v4281_v21 }
 0x579   : > { %v4826_v43 = vadd.bf16 %v8587_v12, %v4282_v19  ;;  %v8673_v41 = vcombine.high %v5047_v9, %v5048_v7  ;;  %v8672_v62 = vcombine.low %v5047_v9, %v5048_v7  ;;  %v4594_v19 = vrot.slane %v10778_v15, %v10191_v8  ;;  %v9255_v15 = vld [vmem:[%s9508_s0 + $0x90] sm:$0xff] }
 0x57a   : > { %v4857_v14 = vmax.bf16 %v11994_v10, %v4825_v11 }
 0x57b   : > { %v4858_v53 = vmax.bf16 %v11994_v10, %v4826_v43  ;;  %v4188_v51 = vpop.f32.mrb[128].mxu1  ;;  %5431 = vmatprep.subr.bf16.mxu0 %v8673_v41  ;;  %v8590_v37 = vcombine.low %v4582_v58, %v4594_v19  ;;  %v9260_v58 = vld [vmem:[%s9508_s0 + $0xb8] sm:$0xff] }
 0x57c   : > { %v4190_v16 = vpop.f32.mrb[129].mxu1  ;;  %5432 = vmatpush1.bf16.msra.mxu0 %v8672_v62 }
 0x57d   : > { %v8610_v63 = vcombine.low %v4857_v14, %v4858_v53  ;;  %v8611_v52 = vcombine.high %v4857_v14, %v4858_v53  ;;  %v4192_v31 = vpop.f32.mrb[130].mxu1 }
 0x57e   : > { %v4283_v2 = vpack.c.bf16 %v4192_v31, %v4188_v51  ;;  %v4194_v25 = vpop.f32.mrb[131].mxu1 }
 0x57f   : > { %v4284_v3 = vpack.c.bf16 %v4194_v25, %v4190_v16  ;;  %v5049_v4 = vadd.bf16 %v9251_v6, %v8610_v63  ;;  %v5050_v23 = vadd.bf16 %v9252_v22, %v8611_v52  ;;  %v9256_v16 = vld [vmem:[%s9508_s0 + $0x98] sm:$0xff]  ;;  %v4606_v25 = vrot.slane %v10789_v18, %v10191_v8 }
 0x580   : > { %v4827_v27 = vadd.bf16 %v8588_v5, %v4283_v2  ;;  %v4618_v2 = vrot.slane %v10794_v30, %v10191_v8  ;;  %v9257_v30 = vld [vmem:[%s9508_s0 + $0xa0] sm:$0xff] }
 0x581   : > { %v4828_v56 = vadd.bf16 %v8588_v5, %v4284_v3  ;;  %v8675_v39 = vcombine.high %v5049_v4, %v5050_v23  ;;  %v8674_v29 = vcombine.low %v5049_v4, %v5050_v23 }
 0x582   : > { %v4859_v0 = vmax.bf16 %v11994_v10, %v4827_v27 }
 0x583   : > { %v4860_v45 = vmax.bf16 %v11994_v10, %v4828_v56  ;;  %v4198_v28 = vpop.f32.mrb[132].mxu1  ;;  %5433 = vmatprep.subr.bf16.mxu0 %v8675_v39  ;;  %v8591_v39 = vcombine.low %v4606_v25, %v4618_v2 }
 0x584   : > { %v4200_v59 = vpop.f32.mrb[133].mxu1  ;;  %5434 = vmatpush1.bf16.msra.mxu0 %v8674_v29 }
 0x585   : > { %v8612_v49 = vcombine.low %v4859_v0, %v4860_v45  ;;  %v8613_v40 = vcombine.high %v4859_v0, %v4860_v45  ;;  %v4202_v34 = vpop.f32.mrb[134].mxu1  ;;  %v9258_v45 = vld [vmem:[%s9508_s0 + $0xa8] sm:$0xff] }
 0x586   : > { %v4285_v46 = vpack.c.bf16 %v4202_v34, %v4198_v28  ;;  %v4204_v33 = vpop.f32.mrb[135].mxu1  ;;  %v4642_v34 = vrot.slane %v10813_v38, %v10191_v8  ;;  %v9259_v38 = vld [vmem:[%s9508_s0 + $0xb0] sm:$0xff] }
 0x587   : > { %v4286_v48 = vpack.c.bf16 %v4204_v33, %v4200_v59  ;;  %v5051_v13 = vadd.bf16 %v9253_v55, %v8612_v49  ;;  %v5052_v54 = vadd.bf16 %v9254_v61, %v8613_v40 }
 0x588   : > { %v4829_v20 = vadd.bf16 %v8589_v47, %v4285_v46 }
 0x589   : > { %v4830_v12 = vadd.bf16 %v8589_v47, %v4286_v48  ;;  %v8677_v21 = vcombine.high %v5051_v13, %v5052_v54  ;;  %v8676_v17 = vcombine.low %v5051_v13, %v5052_v54  ;;  %v4630_v47 = vrot.slane %v10811_v32, %v10191_v8 }
 0x58a   : > { %v4861_v9 = vmax.bf16 %v11994_v10, %v4829_v20 }
 0x58b   : > { %v4862_v57 = vmax.bf16 %v11994_v10, %v4830_v12  ;;  %v4208_v7 = vpop.f32.mrb[136].mxu1  ;;  %5435 = vmatprep.subr.bf16.mxu0 %v8677_v21  ;;  %v8592_v20 = vcombine.low %v4630_v47, %v4642_v34 }
 0x58c   : > { %v4210_v11 = vpop.f32.mrb[137].mxu1  ;;  %5436 = vmatpush1.bf16.msra.mxu0 %v8676_v17 }
 0x58d   : > { %v8614_v43 = vcombine.low %v4861_v9, %v4862_v57  ;;  %v8615_v41 = vcombine.high %v4861_v9, %v4862_v57  ;;  %v4212_v62 = vpop.f32.mrb[138].mxu1 }
 0x58e   : > { %v4287_v44 = vpack.c.bf16 %v4212_v62, %v4208_v7  ;;  %v4214_v14 = vpop.f32.mrb[139].mxu1 }
 0x58f   : > { %v4288_v53 = vpack.c.bf16 %v4214_v14, %v4210_v11  ;;  %v5053_v51 = vadd.bf16 %v9255_v15, %v8614_v43  ;;  %v5054_v1 = vadd.bf16 %v9256_v16, %v8615_v41  ;;  %v4666_v43 = vrot.slane %v10832_v36, %v10191_v8  ;;  %v9261_v36 = vld [vmem:[%s9508_s0 + $0xc0] sm:$0xff] }
 0x590   : > { %v4831_v63 = vadd.bf16 %v8590_v37, %v4287_v44  ;;  %v4654_v41 = vrot.slane %v10827_v42, %v10191_v8 }
 0x591   : > { %v4832_v52 = vadd.bf16 %v8590_v37, %v4288_v53  ;;  %v8679_v31 = vcombine.high %v5053_v51, %v5054_v1  ;;  %v8678_v5 = vcombine.low %v5053_v51, %v5054_v1 }
 0x592   : > { %v4863_v3 = vmax.bf16 %v11994_v10, %v4831_v63  ;;  %v8593_v16 = vcombine.low %v4654_v41, %v4666_v43 }
 0x593   : > { %v4864_v6 = vmax.bf16 %v11994_v10, %v4832_v52  ;;  %v4218_v4 = vpop.f32.mrb[140].mxu1  ;;  %5437 = vmatprep.subr.bf16.mxu0 %v8679_v31 }
 0x594   : > { %v4220_v22 = vpop.f32.mrb[141].mxu1  ;;  %5438 = vmatpush1.bf16.msra.mxu0 %v8678_v5  ;;  %v9262_v5 = vld [vmem:[%s9508_s0 + $0xc8] sm:$0xff] }
 0x595   : > { %v8616_v23 = vcombine.low %v4863_v3, %v4864_v6  ;;  %v8617_v27 = vcombine.high %v4863_v3, %v4864_v6  ;;  %v4222_v56 = vpop.f32.mrb[142].mxu1 }
 0x596   : > { %v4289_v29 = vpack.c.bf16 %v4222_v56, %v4218_v4  ;;  %v4224_v50 = vpop.f32.mrb[143].mxu1  ;;  %v4690_v4 = vrot.slane %v10848_v24, %v10191_v8  ;;  %v4706_v24 = vpop.permute.xlu1 %4705 }
 0x597   : > { %v4290_v60 = vpack.c.bf16 %v4224_v50, %v4220_v22  ;;  %v5055_v0 = vadd.bf16 %v9257_v30, %v8616_v23  ;;  %v5056_v18 = vadd.bf16 %v9258_v45, %v8617_v27  ;;  %v4678_v22 = vrot.slane %v10843_v26, %v10191_v8  ;;  %v9264_v26 = vld [vmem:[%s9508_s0 + $0xd8] sm:$0xff] }
 0x598   : > { %v4833_v28 = vadd.bf16 %v8591_v39, %v4289_v29 }
 0x599   : > { %v4834_v59 = vadd.bf16 %v8591_v39, %v4290_v60  ;;  %v8681_v49 = vcombine.high %v5055_v0, %v5056_v18  ;;  %v8680_v40 = vcombine.low %v5055_v0, %v5056_v18  ;;  %v8594_v30 = vcombine.low %v4678_v22, %v4690_v4  ;;  %v9108_v4 = vld [vmem:[%s11926_s9 + $0x54] ss:$8 sps:$4 sm:$0xff]   ;;  %v9110_v22 = vld [vmem:[%s11926_s9 + $0x50] ss:$8 sps:$4 sm:$0xff]  }
 0x59a   : > { %v4865_v46 = vmax.bf16 %v11994_v10, %v4833_v28  ;;  %v9263_v28 = vld [vmem:[%s9508_s0 + $0xd0] sm:$0xff] }
 0x59b   : > { %v4866_v33 = vmax.bf16 %v11994_v10, %v4834_v59  ;;  %v4228_v48 = vpop.f32.mrb[144].mxu1  ;;  %5439 = vmatprep.subr.bf16.mxu0 %v8681_v49 }
 0x59c   : > { %v4230_v55 = vpop.f32.mrb[145].mxu1  ;;  %5440 = vmatpush1.bf16.msra.mxu0 %v8680_v40 }
 0x59d   : > { %v8618_v13 = vcombine.low %v4865_v46, %v4866_v33  ;;  %v8619_v61 = vcombine.high %v4865_v46, %v4866_v33  ;;  %v4232_v54 = vpop.f32.mrb[146].mxu1  ;;  %v4714_v33 = vrot.slane %v4706_v24, %v10191_v8  ;;  %v9126_v24 = vld [vmem:[%s11926_s9 + $0xb4] ss:$8 sps:$4 sm:$0xff]  }
 0x59e   : > { %v4291_v12 = vpack.c.bf16 %v4232_v54, %v4228_v48  ;;  %v4234_v21 = vpop.f32.mrb[147].mxu1  ;;  %v4702_v48 = vrot.slane %v10853_v35, %v10191_v8 }
 0x59f   : > { %v4292_v17 = vpack.c.bf16 %v4234_v21, %v4230_v55  ;;  %v5057_v19 = vadd.bf16 %v9259_v38, %v8618_v13  ;;  %v5058_v32 = vadd.bf16 %v9260_v58, %v8619_v61 }
 0x5a0   : > { %v4835_v9 = vadd.bf16 %v8592_v20, %v4291_v12 }
 0x5a1   : > { %v4836_v57 = vadd.bf16 %v8592_v20, %v4292_v17  ;;  %v8683_v7 = vcombine.high %v5057_v19, %v5058_v32  ;;  %v8682_v11 = vcombine.low %v5057_v19, %v5058_v32  ;;  %v8595_v17 = vcombine.low %v4702_v48, %v4714_v33  ;;  %v9265_v32 = vld [vmem:[%s9508_s0 + $0xe0] sm:$0xff]  ;;  %v5691_v33 = vpop.permute.xlu1 %5690  ;;  %v5679_v48 = vpop.permute.xlu0 %5678 }
 0x5a2   : > { %v4867_v62 = vmax.bf16 %v11994_v10, %v4835_v9  ;;  %v9266_v9 = vld [vmem:[%s9508_s0 + $0xe8] sm:$0xff] }
 0x5a3   : > { %v4868_v37 = vmax.bf16 %v11994_v10, %v4836_v57  ;;  %v4238_v44 = vpop.f32.mrb[148].mxu1  ;;  %5441 = vmatprep.subr.bf16.mxu0 %v8683_v7 }
 0x5a4   : > { %v4240_v14 = vpop.f32.mrb[149].mxu1  ;;  %5442 = vmatpush1.bf16.msra.mxu0 %v8682_v11 }
 0x5a5   : > { %v8620_v53 = vcombine.low %v4867_v62, %v4868_v37  ;;  %v8621_v15 = vcombine.high %v4867_v62, %v4868_v37  ;;  %v4242_v51 = vpop.f32.mrb[150].mxu1 }
 0x5a6   : > { %v4293_v1 = vpack.c.bf16 %v4242_v51, %v4238_v44  ;;  %v4244_v63 = vpop.f32.mrb[151].mxu1  ;;  %v9268_v51 = vld [vmem:[%s9508_s0 + $0xf8] sm:$0xff] }
 0x5a7   : > { %v4294_v52 = vpack.c.bf16 %v4244_v63, %v4240_v14  ;;  %v5059_v31 = vadd.bf16 %v9261_v36, %v8620_v53  ;;  %v5060_v42 = vadd.bf16 %v9262_v5, %v8621_v15  ;;  %v9267_v53 = vld [vmem:[%s9508_s0 + $0xf0] sm:$0xff]  ;;  %v9099_v5 = vld [vmem:[%s11926_s9 + $0x24] ss:$8 sps:$4 sm:$0xff]   ;;  %s8371_s0 = sshll.u32 %s12085_s24, 1 }
 0x5a8   : > { %v4837_v2 = vadd.bf16 %v8593_v16, %v4293_v1  ;;  %v9096_v36 = vld [vmem:[%s11926_s9 + $0x14] ss:$8 sps:$4 sm:$0xff]   ;;  %p706_p8 = scmp.lt.s32.totalorder %s8371_s0, 3 }
 0x5a9   : > { %v4838_v25 = vadd.bf16 %v8593_v16, %v4294_v52  ;;  %v8685_v3 = vcombine.high %v5059_v31, %v5060_v42  ;;  %v8684_v6 = vcombine.low %v5059_v31, %v5060_v42  ;;  %v9093_v52 = vld [vmem:[%s11926_s9] ss:$8 sps:$4 sm:$0xff]   ;;  %v9098_v31 = vld [vmem:[%s11926_s9 + $0x10] ss:$8 sps:$4 sm:$0xff]  }
 0x5aa   : > { %v4869_v23 = vmax.bf16 %v11994_v10, %v4837_v2  ;;  %v9101_v42 = vld [vmem:[%s11926_s9 + $0x20] ss:$8 sps:$4 sm:$0xff]   ;;  %v9102_v2 = vld [vmem:[%s11926_s9 + $0x34] ss:$8 sps:$4 sm:$0xff]   ;;  %s12091_s0 = smov (!%p706_p8, %s8371_s0), 3 }
 0x5ab   : > { %v4870_v27 = vmax.bf16 %v11994_v10, %v4838_v25  ;;  %v4248_v56 = vpop.f32.mrb[152].mxu1  ;;  %5443 = vmatprep.subr.bf16.mxu0 %v8685_v3  ;;  %v9104_v25 = vld [vmem:[%s11926_s9 + $0x30] ss:$8 sps:$4 sm:$0xff]   ;;  %v9105_v3 = vld [vmem:[%s11926_s9 + $0x44] ss:$8 sps:$4 sm:$0xff]   ;;  %s708_s30 = scalar_lea.vmem %s11934_s17, %s12091_s0 }
 0x5ac   : > { %v4250_v39 = vpop.f32.mrb[153].mxu1  ;;  %5444 = vmatpush1.bf16.msra.mxu0 %v8684_v6  ;;  %v9107_v6 = vld [vmem:[%s11926_s9 + $0x40] ss:$8 sps:$4 sm:$0xff]  }
 0x5ad   : > { %v8622_v29 = vcombine.low %v4869_v23, %v4870_v27  ;;  %v8623_v50 = vcombine.high %v4869_v23, %v4870_v27  ;;  %v4252_v60 = vpop.f32.mrb[154].mxu1  ;;  %v9111_v23 = vld [vmem:[%s11926_s9 + $0x64] ss:$8 sps:$4 sm:$0xff]   ;;  %v9113_v27 = vld [vmem:[%s11926_s9 + $0x60] ss:$8 sps:$4 sm:$0xff]  }
 0x5ae   : > { %v4295_v0 = vpack.c.bf16 %v4252_v60, %v4248_v56  ;;  %v4254_v45 = vpop.f32.mrb[155].mxu1  ;;  %v9114_v56 = vld [vmem:[%s11926_s9 + $0x74] ss:$8 sps:$4 sm:$0xff]  }
 0x5af   : > { %v4296_v18 = vpack.c.bf16 %v4254_v45, %v4250_v39  ;;  %v5061_v59 = vadd.bf16 %v9263_v28, %v8622_v29  ;;  %v5062_v49 = vadd.bf16 %v9264_v26, %v8623_v50  ;;  %v9116_v39 = vld [vmem:[%s11926_s9 + $0x70] ss:$8 sps:$4 sm:$0xff]   ;;  %v9117_v29 = vld [vmem:[%s11926_s9 + $0x84] ss:$8 sps:$4 sm:$0xff]   ;;  %v9119_v50 = vld [vmem:[%s11926_s9 + $0x80] ss:$8 sps:$4 sm:$0xff]  }
 0x5b0   : > { %v4839_v40 = vadd.bf16 %v8594_v30, %v4295_v0  ;;  %v9120_v60 = vld [vmem:[%s11926_s9 + $0x94] ss:$8 sps:$4 sm:$0xff]   ;;  %v9123_v0 = vld [vmem:[%s11926_s9 + $0xa4] ss:$8 sps:$4 sm:$0xff]   ;;  %v9125_v45 = vld [vmem:[%s11926_s9 + $0xa0] ss:$8 sps:$4 sm:$0xff]  }
 0x5b1   : > { %v4840_v34 = vadd.bf16 %v8594_v30, %v4296_v18  ;;  %v8687_v47 = vcombine.high %v5061_v59, %v5062_v49  ;;  %v8686_v46 = vcombine.low %v5061_v59, %v5062_v49  ;;  %v9122_v30 = vld [vmem:[%s11926_s9 + $0x90] ss:$8 sps:$4 sm:$0xff]   ;;  %v9129_v28 = vld [vmem:[%s11926_s9 + $0xc4] ss:$8 sps:$4 sm:$0xff]   ;;  %v9131_v59 = vld [vmem:[%s11926_s9 + $0xc0] ss:$8 sps:$4 sm:$0xff]  }
 0x5b2   : > { %v4871_v55 = vmax.bf16 %v11994_v10, %v4839_v40  ;;  %v9128_v18 = vld [vmem:[%s11926_s9 + $0xb0] ss:$8 sps:$4 sm:$0xff]   ;;  %v9132_v26 = vld [vmem:[%s11926_s9 + $0xd4] ss:$8 sps:$4 sm:$0xff]   ;;  %v9135_v40 = vld [vmem:[%s11926_s9 + $0xe4] ss:$8 sps:$4 sm:$0xff]  }
 0x5b3   : > { %v4872_v13 = vmax.bf16 %v11994_v10, %v4840_v34  ;;  %v4258_v61 = vpop.f32.mrb[156].mxu1  ;;  %5445 = vmatprep.subr.bf16.mxu0 %v8687_v47  ;;  %v9134_v49 = vld [vmem:[%s11926_s9 + $0xd0] ss:$8 sps:$4 sm:$0xff]   ;;  %v9137_v34 = vld [vmem:[%s11926_s9 + $0xe0] ss:$8 sps:$4 sm:$0xff]  }
 0x5b4   : > { %v4260_v54 = vpop.f32.mrb[157].mxu1  ;;  %5446 = vmatpush1.bf16.msra.mxu0 %v8686_v46  ;;  %v9138_v47 = vld [vmem:[%s11926_s9 + $0xf4] ss:$8 sps:$4 sm:$0xff]   ;;  %v9140_v46 = vld [vmem:[%s11926_s9 + $0xf0] ss:$8 sps:$4 sm:$0xff]  }
 0x5b5   : > { %v8624_v20 = vcombine.low %v4871_v55, %v4872_v13  ;;  %v8625_v12 = vcombine.high %v4871_v55, %v4872_v13  ;;  %v4262_v21 = vpop.f32.mrb[158].mxu1  ;;  %v5699_v55 = vrot.slane %v5691_v33, %v10191_v8  ;;  %v5687_v13 = vrot.slane %v5679_v48, %v10191_v8 }
 0x5b6   : > { %v4297_v38 = vpack.c.bf16 %v4262_v21, %v4258_v61  ;;  %v4264_v19 = vpop.f32.mrb[159].mxu1 }
 0x5b7   : > { %v4298_v58 = vpack.c.bf16 %v4264_v19, %v4260_v54  ;;  %v5063_v35 = vadd.bf16 %v9265_v32, %v8624_v20  ;;  %v5064_v57 = vadd.bf16 %v9266_v9, %v8625_v12  ;;  %v8692_v12 = vcombine.low %v5687_v13, %v5699_v55  ;;  %v5715_v19 = vpop.permute.xlu1 %5714 }
 0x5b8   : > { %v4841_v7 = vadd.bf16 %v8595_v17, %v4297_v38  ;;  %v9143_v38 = vld [vmem:[%s11928_s11 + $0x4] ss:$8 sps:$4 sm:$0xff]  }
 0x5b9   : > { %v4842_v11 = vadd.bf16 %v8595_v17, %v4298_v58  ;;  %v8689_v43 = vcombine.high %v5063_v35, %v5064_v57  ;;  %v8688_v41 = vcombine.low %v5063_v35, %v5064_v57  ;;  %v5703_v58 = vpop.permute.xlu0 %5702  ;;  %6444 = vmatprep.mubr.bf16.mxu1 %v9143_v38  ;;  %v5723_v57 = vrot.slane %v5715_v19, %v10191_v8 }
 0x5ba   : > { %v4873_v62 = vmax.bf16 %v11994_v10, %v4841_v7  ;;  %v5711_v7 = vrot.slane %v5703_v58, %v10191_v8 }
 0x5bb   : > { %v4874_v37 = vmax.bf16 %v11994_v10, %v4842_v11  ;;  %5447 = vmatprep.subr.bf16.mxu0 %v8689_v43 }
 0x5bc   : > { %5448 = vmatpush1.bf16.msra.mxu0 %v8688_v41 }
 0x5bd   : > { %v8626_v44 = vcombine.low %v4873_v62, %v4874_v37  ;;  %v8627_v14 = vcombine.high %v4873_v62, %v4874_v37 }
 0x5bf   : > { %v5065_v15 = vadd.bf16 %v9267_v53, %v8626_v44  ;;  %v5066_v16 = vadd.bf16 %v9268_v51, %v8627_v14  ;;  %v8693_v44 = vcombine.low %v5711_v7, %v5723_v57  ;;  %v5727_v51 = vpop.permute.xlu0 %5726 }
 0x5c1   : > { %v8691_v1 = vcombine.high %v5065_v15, %v5066_v16  ;;  %v8690_v63 = vcombine.low %v5065_v15, %v5066_v16  ;;  %v5739_v15 = vpop.permute.xlu1 %5738 }
 0x5c3   : > { %5449 = vmatprep.subr.bf16.mxu0 %v8691_v1 }
 0x5c4   : > { %5450 = vmatpush1.bf16.msra.mxu0 %v8690_v63 }
 0x5c7   : > { %5452 = vmatmul.mubr.bf16.vlgmr.msra.gmra.mrb[96].mxu0 %v9093_v52  ;;  %v5747_v52 = vrot.slane %v5739_v15, %v10191_v8 }
 0x5c8   : > { %5461 = vmatprep.mubr.bf16.mxu0 %v9096_v36  ;;  %v5735_v36 = vrot.slane %v5727_v51, %v10191_v8 }
 0x5cf   : > { %5462 = vmatmul.mubr.bf16.gmra.mrb[100].mxu0 %v9098_v31 }
 0x5d0   : > { %5471 = vmatprep.mubr.bf16.mxu0 %v9099_v5 }
 0x5d7   : > { %5472 = vmatmul.mubr.bf16.gmra.mrb[104].mxu0 %v9101_v42 }
 0x5d8   : > { %5481 = vmatprep.mubr.bf16.mxu0 %v9102_v2 }
 0x5df   : > { %5482 = vmatmul.mubr.bf16.gmra.mrb[108].mxu0 %v9104_v25 }
 0x5e0   : > { %5491 = vmatprep.mubr.bf16.mxu0 %v9105_v3  ;;  %v8694_v3 = vcombine.low %v5735_v36, %v5747_v52 }
 0x5e7   : > { %5492 = vmatmul.mubr.bf16.gmra.mrb[112].mxu0 %v9107_v6 }
 0x5e8   : > { %5501 = vmatprep.mubr.bf16.mxu0 %v9108_v4 }
 0x5ef   : > { %5502 = vmatmul.mubr.bf16.gmra.mrb[116].mxu0 %v9110_v22  ;;  %v5763_v22 = vpop.permute.xlu1 %5762 }
 0x5f0   : > { %5511 = vmatprep.mubr.bf16.mxu0 %v9111_v23  ;;  %v5751_v23 = vpop.permute.xlu0 %5750 }
 0x5f7   : > { %5512 = vmatmul.mubr.bf16.gmra.mrb[120].mxu0 %v9113_v27 }
 0x5f8   : > { %5521 = vmatprep.mubr.bf16.mxu0 %v9114_v56 }
 0x5ff   : > { %5522 = vmatmul.mubr.bf16.gmra.mrb[124].mxu0 %v9116_v39 }
 0x600   : > { %5531 = vmatprep.mubr.bf16.mxu0 %v9117_v29  ;;  %v5771_v29 = vrot.slane %v5763_v22, %v10191_v8 }
 0x607   : > { %5532 = vmatmul.mubr.bf16.gmra.mrb[128].mxu0 %v9119_v50  ;;  %v5759_v50 = vrot.slane %v5751_v23, %v10191_v8 }
 0x608   : > { %5541 = vmatprep.mubr.bf16.mxu0 %v9120_v60 }
 0x60f   : > { %5542 = vmatmul.mubr.bf16.gmra.mrb[132].mxu0 %v9122_v30 }
 0x610   : > { %5551 = vmatprep.mubr.bf16.mxu0 %v9123_v0 }
 0x617   : > { %5552 = vmatmul.mubr.bf16.gmra.mrb[136].mxu0 %v9125_v45 }
 0x618   : > { %5561 = vmatprep.mubr.bf16.mxu0 %v9126_v24 }
 0x61f   : > { %5562 = vmatmul.mubr.bf16.gmra.mrb[140].mxu0 %v9128_v18  ;;  %v8695_v18 = vcombine.low %v5759_v50, %v5771_v29 }
 0x620   : > { %5571 = vmatprep.mubr.bf16.mxu0 %v9129_v28 }
 0x627   : > { %5572 = vmatmul.mubr.bf16.gmra.mrb[144].mxu0 %v9131_v59 }
 0x628   : > { %5581 = vmatprep.mubr.bf16.mxu0 %v9132_v26  ;;  %v5787_v26 = vpop.permute.xlu1 %5786 }
 0x62f   : > { %5582 = vmatmul.mubr.bf16.gmra.mrb[148].mxu0 %v9134_v49  ;;  %v5775_v49 = vpop.permute.xlu0 %5774 }
 0x630   : > { %5591 = vmatprep.mubr.bf16.mxu0 %v9135_v40  ;;  %v5783_v33 = vrot.slane %v5775_v49, %v10191_v8 }
 0x633   : > { %v5799_v38 = vpop.permute.xlu0 %5798 }
 0x637   : > { %5592 = vmatmul.mubr.bf16.gmra.mrb[152].mxu0 %v9137_v34 }
 0x638   : > { %5601 = vmatprep.mubr.bf16.mxu0 %v9138_v47 }
 0x63f   : > { %5602 = vmatmul.mubr.bf16.gmra.mrb[156].mxu0 %v9140_v46  ;;  %v5795_v46 = vrot.slane %v5787_v26, %v10191_v8 }
 0x69a   : > { %v5453_v61 = vpop.f32.mrb[96].mxu0 }
 0x69b   : > { %v5455_v54 = vpop.f32.mrb[97].mxu0 }
 0x69c   : > { %v5457_v20 = vpop.f32.mrb[98].mxu0 }
 0x69d   : > { %v5612_v21 = vpack.c.bf16 %v5457_v20, %v5453_v61  ;;  %v5459_v17 = vpop.f32.mrb[99].mxu0  ;;  %v8696_v20 = vcombine.low %v5783_v33, %v5795_v46 }
 0x69e   : > { %v5613_v32 = vpack.c.bf16 %v5459_v17, %v5455_v54  ;;  %v5811_v17 = vpop.permute.xlu1 %5810 }
 0x69f   : > { %v6156_v35 = vadd.bf16 %v8692_v12, %v5612_v21 }
 0x6a0   : > { %v6157_v9 = vadd.bf16 %v8692_v12, %v5613_v32 }
 0x6a1   : > { %v6188_v41 = vmax.bf16 %v11994_v10, %v6156_v35  ;;  %v5819_v35 = vrot.slane %v5811_v17, %v10191_v8 }
 0x6a2   : > { %v5463_v11 = vpop.f32.mrb[100].mxu0  ;;  %v6189_v43 = vmax.bf16 %v11994_v10, %v6157_v9  ;;  %v5807_v9 = vrot.slane %v5799_v38, %v10191_v8 }
 0x6a3   : > { %v5465_v62 = vpop.f32.mrb[101].mxu0 }
 0x6a4   : > { %v5467_v37 = vpop.f32.mrb[102].mxu0  ;;  %6412 = vmatprep.subr.bf16.mxu1 %v6189_v43 }
 0x6a5   : > { %v5614_v14 = vpack.c.bf16 %v5467_v37, %v5463_v11  ;;  %v5469_v53 = vpop.f32.mrb[103].mxu0  ;;  %6413 = vmatpush1.bf16.msra.mxu1 %v6188_v41 }
 0x6a6   : > { %v5615_v16 = vpack.c.bf16 %v5469_v53, %v5465_v62  ;;  %v8697_v62 = vcombine.low %v5807_v9, %v5819_v35  ;;  %v5823_v53 = vpop.permute.xlu0 %5822 }
 0x6a7   : > { %v6158_v1 = vadd.bf16 %v8693_v44, %v5614_v14  ;;  %v5835_v14 = vpop.permute.xlu1 %5834 }
 0x6a8   : > { %v6159_v63 = vadd.bf16 %v8693_v44, %v5615_v16 }
 0x6a9   : > { %v6190_v42 = vmax.bf16 %v11994_v10, %v6158_v1  ;;  %v5843_v1 = vrot.slane %v5835_v14, %v10191_v8 }
 0x6aa   : > { %v5473_v31 = vpop.f32.mrb[104].mxu0  ;;  %v6191_v5 = vmax.bf16 %v11994_v10, %v6159_v63  ;;  %v5831_v63 = vrot.slane %v5823_v53, %v10191_v8 }
 0x6ab   : > { %v5475_v2 = vpop.f32.mrb[105].mxu0 }
 0x6ac   : > { %v5477_v25 = vpop.f32.mrb[106].mxu0  ;;  %6414 = vmatprep.subr.bf16.mxu1 %v6191_v5 }
 0x6ad   : > { %v5616_v6 = vpack.c.bf16 %v5477_v25, %v5473_v31  ;;  %v5479_v4 = vpop.f32.mrb[107].mxu0  ;;  %6415 = vmatpush1.bf16.msra.mxu1 %v6190_v42 }
 0x6ae   : > { %v5617_v27 = vpack.c.bf16 %v5479_v4, %v5475_v2  ;;  %v8698_v2 = vcombine.low %v5831_v63, %v5843_v1  ;;  %v5847_v4 = vpop.permute.xlu0 %5846 }
 0x6af   : > { %v6160_v56 = vadd.bf16 %v8694_v3, %v5616_v6  ;;  %v5859_v6 = vpop.permute.xlu1 %5858 }
 0x6b0   : > { %v6161_v39 = vadd.bf16 %v8694_v3, %v5617_v27 }
 0x6b1   : > { %v6192_v0 = vmax.bf16 %v11994_v10, %v6160_v56  ;;  %v5867_v56 = vrot.slane %v5859_v6, %v10191_v8 }
 0x6b2   : > { %v5483_v60 = vpop.f32.mrb[108].mxu0  ;;  %v6193_v30 = vmax.bf16 %v11994_v10, %v6161_v39  ;;  %v5855_v39 = vrot.slane %v5847_v4, %v10191_v8 }
 0x6b3   : > { %v5485_v45 = vpop.f32.mrb[109].mxu0 }
 0x6b4   : > { %v5487_v24 = vpop.f32.mrb[110].mxu0  ;;  %6416 = vmatprep.subr.bf16.mxu1 %v6193_v30 }
 0x6b5   : > { %v5618_v28 = vpack.c.bf16 %v5487_v24, %v5483_v60  ;;  %v5489_v59 = vpop.f32.mrb[111].mxu0  ;;  %6417 = vmatpush1.bf16.msra.mxu1 %v6192_v0 }
 0x6b6   : > { %v5619_v40 = vpack.c.bf16 %v5489_v59, %v5485_v45  ;;  %v8699_v45 = vcombine.low %v5855_v39, %v5867_v56  ;;  %v5871_v59 = vpop.permute.xlu0 %5870 }
 0x6b7   : > { %v6162_v34 = vadd.bf16 %v8695_v18, %v5618_v28  ;;  %v5883_v28 = vpop.permute.xlu1 %5882 }
 0x6b8   : > { %v6163_v47 = vadd.bf16 %v8695_v18, %v5619_v40 }
 0x6b9   : > { %v6194_v13 = vmax.bf16 %v11994_v10, %v6162_v34  ;;  %v5891_v34 = vrot.slane %v5883_v28, %v10191_v8 }
 0x6ba   : > { %v5493_v48 = vpop.f32.mrb[112].mxu0  ;;  %v6195_v55 = vmax.bf16 %v11994_v10, %v6163_v47  ;;  %v5879_v47 = vrot.slane %v5871_v59, %v10191_v8 }
 0x6bb   : > { %v5495_v61 = vpop.f32.mrb[113].mxu0 }
 0x6bc   : > { %v5497_v54 = vpop.f32.mrb[114].mxu0  ;;  %6418 = vmatprep.subr.bf16.mxu1 %v6195_v55 }
 0x6bd   : > { %v5620_v12 = vpack.c.bf16 %v5497_v54, %v5493_v48  ;;  %v5499_v21 = vpop.f32.mrb[115].mxu0  ;;  %6419 = vmatpush1.bf16.msra.mxu1 %v6194_v13 }
 0x6be   : > { %v5621_v19 = vpack.c.bf16 %v5499_v21, %v5495_v61  ;;  %v8700_v61 = vcombine.low %v5879_v47, %v5891_v34  ;;  %v5895_v21 = vpop.permute.xlu0 %5894 }
 0x6bf   : > { %v6164_v58 = vadd.bf16 %v8696_v20, %v5620_v12  ;;  %v5907_v12 = vpop.permute.xlu1 %5906 }
 0x6c0   : > { %v6165_v32 = vadd.bf16 %v8696_v20, %v5621_v19 }
 0x6c1   : > { %v6196_v11 = vmax.bf16 %v11994_v10, %v6164_v58  ;;  %v5915_v58 = vrot.slane %v5907_v12, %v10191_v8 }
 0x6c2   : > { %v5503_v57 = vpop.f32.mrb[116].mxu0  ;;  %v6197_v7 = vmax.bf16 %v11994_v10, %v6165_v32  ;;  %v5903_v32 = vrot.slane %v5895_v21, %v10191_v8 }
 0x6c3   : > { %v5505_v43 = vpop.f32.mrb[117].mxu0 }
 0x6c4   : > { %v5507_v41 = vpop.f32.mrb[118].mxu0  ;;  %6420 = vmatprep.subr.bf16.mxu1 %v6197_v7 }
 0x6c5   : > { %v5622_v37 = vpack.c.bf16 %v5507_v41, %v5503_v57  ;;  %v5509_v44 = vpop.f32.mrb[119].mxu0  ;;  %6421 = vmatpush1.bf16.msra.mxu1 %v6196_v11 }
 0x6c6   : > { %v5623_v15 = vpack.c.bf16 %v5509_v44, %v5505_v43  ;;  %v8701_v43 = vcombine.low %v5903_v32, %v5915_v58  ;;  %v5919_v44 = vpop.permute.xlu0 %5918 }
 0x6c7   : > { %v6166_v51 = vadd.bf16 %v8697_v62, %v5622_v37  ;;  %v5931_v37 = vpop.permute.xlu1 %5930 }
 0x6c8   : > { %v6167_v16 = vadd.bf16 %v8697_v62, %v5623_v15 }
 0x6c9   : > { %v6198_v31 = vmax.bf16 %v11994_v10, %v6166_v51  ;;  %v5939_v51 = vrot.slane %v5931_v37, %v10191_v8 }
 0x6ca   : > { %v5513_v52 = vpop.f32.mrb[120].mxu0  ;;  %v6199_v36 = vmax.bf16 %v11994_v10, %v6167_v16  ;;  %v5927_v16 = vrot.slane %v5919_v44, %v10191_v8 }
 0x6cb   : > { %v5515_v5 = vpop.f32.mrb[121].mxu0 }
 0x6cc   : > { %v5517_v42 = vpop.f32.mrb[122].mxu0  ;;  %6422 = vmatprep.subr.bf16.mxu1 %v6199_v36 }
 0x6cd   : > { %v5624_v25 = vpack.c.bf16 %v5517_v42, %v5513_v52  ;;  %v5519_v3 = vpop.f32.mrb[123].mxu0  ;;  %6423 = vmatpush1.bf16.msra.mxu1 %v6198_v31 }
 0x6ce   : > { %v5625_v22 = vpack.c.bf16 %v5519_v3, %v5515_v5  ;;  %v8702_v5 = vcombine.low %v5927_v16, %v5939_v51  ;;  %v5943_v3 = vpop.permute.xlu0 %5942 }
 0x6cf   : > { %v6168_v23 = vadd.bf16 %v8698_v2, %v5624_v25  ;;  %v5955_v25 = vpop.permute.xlu1 %5954 }
 0x6d0   : > { %v6169_v27 = vadd.bf16 %v8698_v2, %v5625_v22 }
 0x6d1   : > { %v6200_v60 = vmax.bf16 %v11994_v10, %v6168_v23  ;;  %v5963_v23 = vrot.slane %v5955_v25, %v10191_v8 }
 0x6d2   : > { %v5523_v29 = vpop.f32.mrb[124].mxu0  ;;  %v6201_v50 = vmax.bf16 %v11994_v10, %v6169_v27  ;;  %v5951_v27 = vrot.slane %v5943_v3, %v10191_v8 }
 0x6d3   : > { %v5525_v30 = vpop.f32.mrb[125].mxu0 }
 0x6d4   : > { %v5527_v0 = vpop.f32.mrb[126].mxu0  ;;  %6424 = vmatprep.subr.bf16.mxu1 %v6201_v50 }
 0x6d5   : > { %v5626_v24 = vpack.c.bf16 %v5527_v0, %v5523_v29  ;;  %v5529_v18 = vpop.f32.mrb[127].mxu0  ;;  %6425 = vmatpush1.bf16.msra.mxu1 %v6200_v60 }
 0x6d6   : > { %v5627_v26 = vpack.c.bf16 %v5529_v18, %v5525_v30  ;;  %v8703_v30 = vcombine.low %v5951_v27, %v5963_v23  ;;  %v5967_v18 = vpop.permute.xlu0 %5966 }
 0x6d7   : > { %v6170_v49 = vadd.bf16 %v8699_v45, %v5626_v24  ;;  %v5979_v24 = vpop.permute.xlu1 %5978 }
 0x6d8   : > { %v6171_v40 = vadd.bf16 %v8699_v45, %v5627_v26 }
 0x6d9   : > { %v6202_v48 = vmax.bf16 %v11994_v10, %v6170_v49  ;;  %v5987_v49 = vrot.slane %v5979_v24, %v10191_v8 }
 0x6da   : > { %v5533_v46 = vpop.f32.mrb[128].mxu0  ;;  %v6203_v33 = vmax.bf16 %v11994_v10, %v6171_v40  ;;  %v5975_v40 = vrot.slane %v5967_v18, %v10191_v8 }
 0x6db   : > { %v5535_v55 = vpop.f32.mrb[129].mxu0 }
 0x6dc   : > { %v5537_v13 = vpop.f32.mrb[130].mxu0  ;;  %6426 = vmatprep.subr.bf16.mxu1 %v6203_v33 }
 0x6dd   : > { %v5628_v54 = vpack.c.bf16 %v5537_v13, %v5533_v46  ;;  %v5539_v20 = vpop.f32.mrb[131].mxu0  ;;  %6427 = vmatpush1.bf16.msra.mxu1 %v6202_v48 }
 0x6de   : > { %v5629_v17 = vpack.c.bf16 %v5539_v20, %v5535_v55  ;;  %v8704_v55 = vcombine.low %v5975_v40, %v5987_v49  ;;  %v5991_v20 = vpop.permute.xlu0 %5990  ;;  %v9146_v49 = vld [vmem:[%s11928_s11 + $0x10] ss:$8 sps:$4 sm:$0xff]   ;;  %v9147_v40 = vld [vmem:[%s11928_s11 + $0x24] ss:$8 sps:$4 sm:$0xff]  }
 0x6df   : > { %v6172_v38 = vadd.bf16 %v8700_v61, %v5628_v54  ;;  %v6003_v54 = vpop.permute.xlu1 %6002 }
 0x6e0   : > { %v6173_v19 = vadd.bf16 %v8700_v61, %v5629_v17 }
 0x6e1   : > { %v6204_v57 = vmax.bf16 %v11994_v10, %v6172_v38  ;;  %v6011_v38 = vrot.slane %v6003_v54, %v10191_v8  ;;  %v9161_v54 = vld [vmem:[%s11928_s11 + $0x60] ss:$8 sps:$4 sm:$0xff]  }
 0x6e2   : > { %v5543_v35 = vpop.f32.mrb[132].mxu0  ;;  %v6205_v9 = vmax.bf16 %v11994_v10, %v6173_v19  ;;  %v5999_v19 = vrot.slane %v5991_v20, %v10191_v8  ;;  %v9162_v20 = vld [vmem:[%s11928_s11 + $0x74] ss:$8 sps:$4 sm:$0xff]  }
 0x6e3   : > { %v5545_v7 = vpop.f32.mrb[133].mxu0 }
 0x6e4   : > { %v5547_v11 = vpop.f32.mrb[134].mxu0  ;;  %6428 = vmatprep.subr.bf16.mxu1 %v6205_v9 }
 0x6e5   : > { %v5630_v41 = vpack.c.bf16 %v5547_v11, %v5543_v35  ;;  %v5549_v62 = vpop.f32.mrb[135].mxu0  ;;  %6429 = vmatpush1.bf16.msra.mxu1 %v6204_v57 }
 0x6e6   : > { %v5631_v14 = vpack.c.bf16 %v5549_v62, %v5545_v7  ;;  %v8705_v7 = vcombine.low %v5999_v19, %v6011_v38  ;;  %v6015_v62 = vpop.permute.xlu0 %6014  ;;  %v9168_v38 = vld [vmem:[%s11928_s11 + $0x94] ss:$8 sps:$4 sm:$0xff]   ;;  %v9170_v19 = vld [vmem:[%s11928_s11 + $0x90] ss:$8 sps:$4 sm:$0xff]  }
 0x6e7   : > { %v6174_v53 = vadd.bf16 %v8701_v43, %v5630_v41  ;;  %v6027_v41 = vpop.permute.xlu1 %6026 }
 0x6e8   : > { %v6175_v15 = vadd.bf16 %v8701_v43, %v5631_v14 }
 0x6e9   : > { %v6206_v52 = vmax.bf16 %v11994_v10, %v6174_v53  ;;  %v6035_v53 = vrot.slane %v6027_v41, %v10191_v8  ;;  %v9183_v41 = vld [vmem:[%s11928_s11 + $0xe4] ss:$8 sps:$4 sm:$0xff]  }
 0x6ea   : > { %v5553_v1 = vpop.f32.mrb[136].mxu0  ;;  %v6207_v63 = vmax.bf16 %v11994_v10, %v6175_v15  ;;  %v6023_v15 = vrot.slane %v6015_v62, %v10191_v8  ;;  %v9185_v62 = vld [vmem:[%s11928_s11 + $0xe0] ss:$8 sps:$4 sm:$0xff]  }
 0x6eb   : > { %v5555_v36 = vpop.f32.mrb[137].mxu0 }
 0x6ec   : > { %v5557_v31 = vpop.f32.mrb[138].mxu0  ;;  %6430 = vmatprep.subr.bf16.mxu1 %v6207_v63 }
 0x6ed   : > { %v5632_v42 = vpack.c.bf16 %v5557_v31, %v5553_v1  ;;  %v5559_v2 = vpop.f32.mrb[139].mxu0  ;;  %6431 = vmatpush1.bf16.msra.mxu1 %v6206_v52 }
 0x6ee   : > { %v5633_v6 = vpack.c.bf16 %v5559_v2, %v5555_v36  ;;  %v8706_v36 = vcombine.low %v6023_v15, %v6035_v53  ;;  %v6039_v2 = vpop.permute.xlu0 %6038 }
 0x6ef   : > { %v6176_v4 = vadd.bf16 %v8702_v5, %v5632_v42  ;;  %v6051_v42 = vpop.permute.xlu1 %6050 }
 0x6f0   : > { %v6177_v22 = vadd.bf16 %v8702_v5, %v5633_v6 }
 0x6f1   : > { %v6208_v29 = vmax.bf16 %v11994_v10, %v6176_v4  ;;  %v6059_v4 = vrot.slane %v6051_v42, %v10191_v8 }
 0x6f2   : > { %v5563_v56 = vpop.f32.mrb[140].mxu0  ;;  %v6209_v39 = vmax.bf16 %v11994_v10, %v6177_v22  ;;  %v6047_v22 = vrot.slane %v6039_v2, %v10191_v8  ;;  %v6672_v53 = vpop.permute.xlu0 %6671 }
 0x6f3   : > { %v5565_v50 = vpop.f32.mrb[141].mxu0 }
 0x6f4   : > { %v5567_v60 = vpop.f32.mrb[142].mxu0  ;;  %6432 = vmatprep.subr.bf16.mxu1 %v6209_v39 }
 0x6f5   : > { %v5634_v0 = vpack.c.bf16 %v5567_v60, %v5563_v56  ;;  %v5569_v45 = vpop.f32.mrb[143].mxu0  ;;  %6433 = vmatpush1.bf16.msra.mxu1 %v6208_v29 }
 0x6f6   : > { %v5635_v28 = vpack.c.bf16 %v5569_v45, %v5565_v50  ;;  %v8707_v50 = vcombine.low %v6047_v22, %v6059_v4  ;;  %v6696_v2 = vpop.permute.xlu0 %6695 }
 0x6f7   : > { %v6178_v59 = vadd.bf16 %v8703_v30, %v5634_v0  ;;  %v6704_v22 = vrot.slane %v6696_v2, %v10191_v8 }
 0x6f8   : > { %v6179_v26 = vadd.bf16 %v8703_v30, %v5635_v28 }
 0x6f9   : > { %v6210_v46 = vmax.bf16 %v11994_v10, %v6178_v59  ;;  %v9141_v59 = vld [vmem:[%s11928_s11] ss:$8 sps:$4 sm:$0xff]  }
 0x6fa   : > { %v5573_v34 = vpop.f32.mrb[144].mxu0  ;;  %v6211_v47 = vmax.bf16 %v11994_v10, %v6179_v26  ;;  %v9144_v26 = vld [vmem:[%s11928_s11 + $0x14] ss:$8 sps:$4 sm:$0xff]  }
 0x6fb   : > { %v5575_v33 = vpop.f32.mrb[145].mxu0 }
 0x6fc   : > { %v5577_v48 = vpop.f32.mrb[146].mxu0  ;;  %6434 = vmatprep.subr.bf16.mxu1 %v6211_v47  ;;  %v9150_v47 = vld [vmem:[%s11928_s11 + $0x34] ss:$8 sps:$4 sm:$0xff]  }
 0x6fd   : > { %v5636_v13 = vpack.c.bf16 %v5577_v48, %v5573_v34  ;;  %v5579_v61 = vpop.f32.mrb[147].mxu0  ;;  %6435 = vmatpush1.bf16.msra.mxu1 %v6210_v46  ;;  %v9149_v34 = vld [vmem:[%s11928_s11 + $0x20] ss:$8 sps:$4 sm:$0xff]   ;;  %v9152_v46 = vld [vmem:[%s11928_s11 + $0x30] ss:$8 sps:$4 sm:$0xff]  }
 0x6fe   : > { %v5637_v12 = vpack.c.bf16 %v5579_v61, %v5575_v33  ;;  %v9153_v33 = vld [vmem:[%s11928_s11 + $0x44] ss:$8 sps:$4 sm:$0xff]   ;;  %v9155_v48 = vld [vmem:[%s11928_s11 + $0x40] ss:$8 sps:$4 sm:$0xff]  }
 0x6ff   : > { %v6180_v21 = vadd.bf16 %v8704_v55, %v5636_v13  ;;  %v9158_v13 = vld [vmem:[%s11928_s11 + $0x50] ss:$8 sps:$4 sm:$0xff]   ;;  %v9159_v61 = vld [vmem:[%s11928_s11 + $0x64] ss:$8 sps:$4 sm:$0xff]  }
 0x700   : > { %v6181_v17 = vadd.bf16 %v8704_v55, %v5637_v12  ;;  %v9156_v55 = vld [vmem:[%s11928_s11 + $0x54] ss:$8 sps:$4 sm:$0xff]   ;;  %v9164_v12 = vld [vmem:[%s11928_s11 + $0x70] ss:$8 sps:$4 sm:$0xff]  }
 0x701   : > { %v6212_v35 = vmax.bf16 %v11994_v10, %v6180_v21  ;;  %v9165_v21 = vld [vmem:[%s11928_s11 + $0x84] ss:$8 sps:$4 sm:$0xff]  }
 0x702   : > { %v5583_v58 = vpop.f32.mrb[148].mxu0  ;;  %v6213_v32 = vmax.bf16 %v11994_v10, %v6181_v17  ;;  %v9167_v17 = vld [vmem:[%s11928_s11 + $0x80] ss:$8 sps:$4 sm:$0xff]  }
 0x703   : > { %v5585_v9 = vpop.f32.mrb[149].mxu0 }
 0x704   : > { %v5587_v57 = vpop.f32.mrb[150].mxu0  ;;  %6436 = vmatprep.subr.bf16.mxu1 %v6213_v32  ;;  %v9173_v32 = vld [vmem:[%s11928_s11 + $0xa0] ss:$8 sps:$4 sm:$0xff]  }
 0x705   : > { %v5638_v11 = vpack.c.bf16 %v5587_v57, %v5583_v58  ;;  %v5589_v43 = vpop.f32.mrb[151].mxu0  ;;  %6437 = vmatpush1.bf16.msra.mxu1 %v6212_v35  ;;  %v9171_v58 = vld [vmem:[%s11928_s11 + $0xa4] ss:$8 sps:$4 sm:$0xff]   ;;  %v9174_v35 = vld [vmem:[%s11928_s11 + $0xb4] ss:$8 sps:$4 sm:$0xff]  }
 0x706   : > { %v5639_v37 = vpack.c.bf16 %v5589_v43, %v5585_v9  ;;  %v9176_v9 = vld [vmem:[%s11928_s11 + $0xb0] ss:$8 sps:$4 sm:$0xff]   ;;  %v9177_v57 = vld [vmem:[%s11928_s11 + $0xc4] ss:$8 sps:$4 sm:$0xff]  }
 0x707   : > { %v6182_v44 = vadd.bf16 %v8705_v7, %v5638_v11  ;;  %v9180_v11 = vld [vmem:[%s11928_s11 + $0xd4] ss:$8 sps:$4 sm:$0xff]   ;;  %v9182_v43 = vld [vmem:[%s11928_s11 + $0xd0] ss:$8 sps:$4 sm:$0xff]  }
 0x708   : > { %v6183_v14 = vadd.bf16 %v8705_v7, %v5639_v37  ;;  %v9179_v7 = vld [vmem:[%s11928_s11 + $0xc0] ss:$8 sps:$4 sm:$0xff]   ;;  %v9186_v37 = vld [vmem:[%s11928_s11 + $0xf4] ss:$8 sps:$4 sm:$0xff]  }
 0x709   : > { %v6214_v1 = vmax.bf16 %v11994_v10, %v6182_v44  ;;  %v9188_v44 = vld [vmem:[%s11928_s11 + $0xf0] ss:$8 sps:$4 sm:$0xff]  }
 0x70a   : > { %v5593_v51 = vpop.f32.mrb[152].mxu0  ;;  %v6215_v16 = vmax.bf16 %v11994_v10, %v6183_v14  ;;  %v6684_v14 = vpop.permute.xlu1 %6683 }
 0x70b   : > { %v5595_v63 = vpop.f32.mrb[153].mxu0  ;;  %v6692_v15 = vrot.slane %v6684_v14, %v10191_v8 }
 0x70c   : > { %v5597_v52 = vpop.f32.mrb[154].mxu0  ;;  %6438 = vmatprep.subr.bf16.mxu1 %v6215_v16 }
 0x70d   : > { %v5640_v31 = vpack.c.bf16 %v5597_v52, %v5593_v51  ;;  %v5599_v5 = vpop.f32.mrb[155].mxu0  ;;  %6439 = vmatpush1.bf16.msra.mxu1 %v6214_v1  ;;  %v6680_v51 = vrot.slane %v6672_v53, %v10191_v8 }
 0x70e   : > { %v5641_v25 = vpack.c.bf16 %v5599_v5, %v5595_v63  ;;  %v9191_v5 = vld [vmem:[%s11930_s13 + $0x4] ss:$8 sps:$4 sm:$0xff]   ;;  %v6708_v42 = vpop.permute.xlu1 %6707 }
 0x70f   : > { %v6184_v3 = vadd.bf16 %v8706_v36, %v5640_v31  ;;  %v8740_v52 = vcombine.low %v6680_v51, %v6692_v15  ;;  %7437 = vmatprep.mubr.bf16.mxu0 %v9191_v5  ;;  %v6716_v4 = vrot.slane %v6708_v42, %v10191_v8 }
 0x710   : > { %v6185_v6 = vadd.bf16 %v8706_v36, %v5641_v25 }
 0x711   : > { %v6216_v56 = vmax.bf16 %v11994_v10, %v6184_v3 }
 0x712   : > { %v5603_v23 = vpop.f32.mrb[156].mxu0  ;;  %v6217_v27 = vmax.bf16 %v11994_v10, %v6185_v6 }
 0x713   : > { %v5605_v39 = vpop.f32.mrb[157].mxu0 }
 0x714   : > { %v5607_v29 = vpop.f32.mrb[158].mxu0  ;;  %6440 = vmatprep.subr.bf16.mxu1 %v6217_v27 }
 0x715   : > { %v5642_v60 = vpack.c.bf16 %v5607_v29, %v5603_v23  ;;  %v5609_v30 = vpop.f32.mrb[159].mxu0  ;;  %6441 = vmatpush1.bf16.msra.mxu1 %v6216_v56 }
 0x716   : > { %v5643_v0 = vpack.c.bf16 %v5609_v30, %v5605_v39 }
 0x717   : > { %v6186_v45 = vadd.bf16 %v8707_v50, %v5642_v60 }
 0x718   : > { %v6187_v24 = vadd.bf16 %v8707_v50, %v5643_v0  ;;  %v8741_v50 = vcombine.low %v6704_v22, %v6716_v4  ;;  %v6732_v0 = vpop.permute.xlu1 %6731 }
 0x719   : > { %v6218_v28 = vmax.bf16 %v11994_v10, %v6186_v45  ;;  %v6720_v45 = vpop.permute.xlu0 %6719 }
 0x71a   : > { %v6219_v18 = vmax.bf16 %v11994_v10, %v6187_v24 }
 0x71c   : > { %6442 = vmatprep.subr.bf16.mxu1 %v6219_v18 }
 0x71d   : > { %6443 = vmatpush1.bf16.msra.mxu1 %v6218_v28 }
 0x720   : > { %6445 = vmatmul.mubr.bf16.vlgmr.msra.gmra.mrb[160].mxu1 %v9141_v59  ;;  %v6740_v59 = vrot.slane %v6732_v0, %v10191_v8 }
 0x721   : > { %6454 = vmatprep.mubr.bf16.mxu1 %v9144_v26  ;;  %v6728_v26 = vrot.slane %v6720_v45, %v10191_v8 }
 0x728   : > { %6455 = vmatmul.mubr.bf16.gmra.mrb[164].mxu1 %v9146_v49 }
 0x729   : > { %6464 = vmatprep.mubr.bf16.mxu1 %v9147_v40 }
 0x730   : > { %6465 = vmatmul.mubr.bf16.gmra.mrb[168].mxu1 %v9149_v34 }
 0x731   : > { %6474 = vmatprep.mubr.bf16.mxu1 %v9150_v47 }
 0x738   : > { %6475 = vmatmul.mubr.bf16.gmra.mrb[172].mxu1 %v9152_v46 }
 0x739   : > { %6484 = vmatprep.mubr.bf16.mxu1 %v9153_v33  ;;  %v8742_v33 = vcombine.low %v6728_v26, %v6740_v59 }
 0x740   : > { %6485 = vmatmul.mubr.bf16.gmra.mrb[176].mxu1 %v9155_v48 }
 0x741   : > { %6494 = vmatprep.mubr.bf16.mxu1 %v9156_v55 }
 0x748   : > { %6495 = vmatmul.mubr.bf16.gmra.mrb[180].mxu1 %v9158_v13  ;;  %v6756_v13 = vpop.permute.xlu1 %6755 }
 0x749   : > { %6504 = vmatprep.mubr.bf16.mxu1 %v9159_v61  ;;  %v6744_v61 = vpop.permute.xlu0 %6743 }
 0x750   : > { %6505 = vmatmul.mubr.bf16.gmra.mrb[184].mxu1 %v9161_v54 }
 0x751   : > { %6514 = vmatprep.mubr.bf16.mxu1 %v9162_v20 }
 0x758   : > { %6515 = vmatmul.mubr.bf16.gmra.mrb[188].mxu1 %v9164_v12 }
 0x759   : > { %6524 = vmatprep.mubr.bf16.mxu1 %v9165_v21  ;;  %v6764_v21 = vrot.slane %v6756_v13, %v10191_v8 }
 0x760   : > { %6525 = vmatmul.mubr.bf16.gmra.mrb[192].mxu1 %v9167_v17  ;;  %v6752_v17 = vrot.slane %v6744_v61, %v10191_v8 }
 0x761   : > { %6534 = vmatprep.mubr.bf16.mxu1 %v9168_v38 }
 0x768   : > { %6535 = vmatmul.mubr.bf16.gmra.mrb[196].mxu1 %v9170_v19 }
 0x769   : > { %6544 = vmatprep.mubr.bf16.mxu1 %v9171_v58 }
 0x770   : > { %6545 = vmatmul.mubr.bf16.gmra.mrb[200].mxu1 %v9173_v32 }
 0x771   : > { %6554 = vmatprep.mubr.bf16.mxu1 %v9174_v35 }
 0x778   : > { %6555 = vmatmul.mubr.bf16.gmra.mrb[204].mxu1 %v9176_v9  ;;  %v8743_v9 = vcombine.low %v6752_v17, %v6764_v21 }
 0x779   : > { %6564 = vmatprep.mubr.bf16.mxu1 %v9177_v57 }
 0x780   : > { %6565 = vmatmul.mubr.bf16.gmra.mrb[208].mxu1 %v9179_v7 }
 0x781   : > { %6574 = vmatprep.mubr.bf16.mxu1 %v9180_v11  ;;  %v6780_v11 = vpop.permute.xlu1 %6779 }
 0x788   : > { %6575 = vmatmul.mubr.bf16.gmra.mrb[212].mxu1 %v9182_v43  ;;  %v6768_v43 = vpop.permute.xlu0 %6767 }
 0x789   : > { %6584 = vmatprep.mubr.bf16.mxu1 %v9183_v41  ;;  %v6776_v14 = vrot.slane %v6768_v43, %v10191_v8 }
 0x78c   : > { %v6792_v5 = vpop.permute.xlu0 %6791 }
 0x790   : > { %6585 = vmatmul.mubr.bf16.gmra.mrb[216].mxu1 %v9185_v62 }
 0x791   : > { %6594 = vmatprep.mubr.bf16.mxu1 %v9186_v37 }
 0x798   : > { %6595 = vmatmul.mubr.bf16.gmra.mrb[220].mxu1 %v9188_v44  ;;  %v6788_v44 = vrot.slane %v6780_v11, %v10191_v8 }
 0x7f3   : > { %v6446_v16 = vpop.f32.mrb[160].mxu1 }
 0x7f4   : > { %v6448_v1 = vpop.f32.mrb[161].mxu1 }
 0x7f5   : > { %v6450_v63 = vpop.f32.mrb[162].mxu1 }
 0x7f6   : > { %v6605_v36 = vpack.c.bf16 %v6450_v63, %v6446_v16  ;;  %v6452_v31 = vpop.f32.mrb[163].mxu1  ;;  %v8744_v63 = vcombine.low %v6776_v14, %v6788_v44 }
 0x7f7   : > { %v6606_v25 = vpack.c.bf16 %v6452_v31, %v6448_v1  ;;  %v6804_v31 = vpop.permute.xlu1 %6803 }
 0x7f8   : > { %v7149_v3 = vadd.bf16 %v8740_v52, %v6605_v36 }
 0x7f9   : > { %v7150_v6 = vadd.bf16 %v8740_v52, %v6606_v25 }
 0x7fa   : > { %v7181_v56 = vmax.bf16 %v11994_v10, %v7149_v3  ;;  %v6812_v3 = vrot.slane %v6804_v31, %v10191_v8 }
 0x7fb   : > { %v6456_v23 = vpop.f32.mrb[164].mxu1  ;;  %v7182_v27 = vmax.bf16 %v11994_v10, %v7150_v6  ;;  %v6800_v6 = vrot.slane %v6792_v5, %v10191_v8 }
 0x7fc   : > { %v6458_v39 = vpop.f32.mrb[165].mxu1 }
 0x7fd   : > { %v6460_v29 = vpop.f32.mrb[166].mxu1  ;;  %7405 = vmatprep.subr.bf16.mxu0 %v7182_v27 }
 0x7fe   : > { %v6607_v60 = vpack.c.bf16 %v6460_v29, %v6456_v23  ;;  %v6462_v30 = vpop.f32.mrb[167].mxu1  ;;  %7406 = vmatpush1.bf16.msra.mxu0 %v7181_v56 }
 0x7ff   : > { %v6608_v24 = vpack.c.bf16 %v6462_v30, %v6458_v39  ;;  %v8745_v39 = vcombine.low %v6800_v6, %v6812_v3  ;;  %v6816_v30 = vpop.permute.xlu0 %6815 }
 0x800   : > { %v7151_v18 = vadd.bf16 %v8741_v50, %v6607_v60  ;;  %v6828_v60 = vpop.permute.xlu1 %6827 }
 0x801   : > { %v7152_v28 = vadd.bf16 %v8741_v50, %v6608_v24 }
 0x802   : > { %v7183_v34 = vmax.bf16 %v11994_v10, %v7151_v18  ;;  %v6836_v18 = vrot.slane %v6828_v60, %v10191_v8 }
 0x803   : > { %v6466_v49 = vpop.f32.mrb[168].mxu1  ;;  %v7184_v40 = vmax.bf16 %v11994_v10, %v7152_v28  ;;  %v6824_v28 = vrot.slane %v6816_v30, %v10191_v8 }
 0x804   : > { %v6468_v47 = vpop.f32.mrb[169].mxu1 }
 0x805   : > { %v6470_v46 = vpop.f32.mrb[170].mxu1  ;;  %7407 = vmatprep.subr.bf16.mxu0 %v7184_v40 }
 0x806   : > { %v6609_v48 = vpack.c.bf16 %v6470_v46, %v6466_v49  ;;  %v6472_v55 = vpop.f32.mrb[171].mxu1  ;;  %7408 = vmatpush1.bf16.msra.mxu0 %v7183_v34 }
 0x807   : > { %v6610_v54 = vpack.c.bf16 %v6472_v55, %v6468_v47  ;;  %v8746_v47 = vcombine.low %v6824_v28, %v6836_v18  ;;  %v6840_v55 = vpop.permute.xlu0 %6839 }
 0x808   : > { %v7153_v20 = vadd.bf16 %v8742_v33, %v6609_v48  ;;  %v6852_v48 = vpop.permute.xlu1 %6851 }
 0x809   : > { %v7154_v12 = vadd.bf16 %v8742_v33, %v6610_v54 }
 0x80a   : > { %v7185_v58 = vmax.bf16 %v11994_v10, %v7153_v20  ;;  %v6860_v20 = vrot.slane %v6852_v48, %v10191_v8 }
 0x80b   : > { %v6476_v38 = vpop.f32.mrb[172].mxu1  ;;  %v7186_v19 = vmax.bf16 %v11994_v10, %v7154_v12  ;;  %v6848_v12 = vrot.slane %v6840_v55, %v10191_v8 }
 0x80c   : > { %v6478_v32 = vpop.f32.mrb[173].mxu1 }
 0x80d   : > { %v6480_v35 = vpop.f32.mrb[174].mxu1  ;;  %7409 = vmatprep.subr.bf16.mxu0 %v7186_v19 }
 0x80e   : > { %v6611_v57 = vpack.c.bf16 %v6480_v35, %v6476_v38  ;;  %v6482_v7 = vpop.f32.mrb[175].mxu1  ;;  %7410 = vmatpush1.bf16.msra.mxu0 %v7185_v58 }
 0x80f   : > { %v6612_v41 = vpack.c.bf16 %v6482_v7, %v6478_v32  ;;  %v8747_v32 = vcombine.low %v6848_v12, %v6860_v20  ;;  %v6864_v7 = vpop.permute.xlu0 %6863 }
 0x810   : > { %v7155_v62 = vadd.bf16 %v8743_v9, %v6611_v57  ;;  %v6876_v57 = vpop.permute.xlu1 %6875 }
 0x811   : > { %v7156_v37 = vadd.bf16 %v8743_v9, %v6612_v41 }
 0x812   : > { %v7187_v51 = vmax.bf16 %v11994_v10, %v7155_v62  ;;  %v6884_v62 = vrot.slane %v6876_v57, %v10191_v8 }
 0x813   : > { %v6486_v53 = vpop.f32.mrb[176].mxu1  ;;  %v7188_v15 = vmax.bf16 %v11994_v10, %v7156_v37  ;;  %v6872_v37 = vrot.slane %v6864_v7, %v10191_v8 }
 0x814   : > { %v6488_v16 = vpop.f32.mrb[177].mxu1 }
 0x815   : > { %v6490_v1 = vpop.f32.mrb[178].mxu1  ;;  %7411 = vmatprep.subr.bf16.mxu0 %v7188_v15 }
 0x816   : > { %v6613_v52 = vpack.c.bf16 %v6490_v1, %v6486_v53  ;;  %v6492_v36 = vpop.f32.mrb[179].mxu1  ;;  %7412 = vmatpush1.bf16.msra.mxu0 %v7187_v51 }
 0x817   : > { %v6614_v42 = vpack.c.bf16 %v6492_v36, %v6488_v16  ;;  %v8748_v16 = vcombine.low %v6872_v37, %v6884_v62  ;;  %v6888_v36 = vpop.permute.xlu0 %6887 }
 0x818   : > { %v7157_v2 = vadd.bf16 %v8744_v63, %v6613_v52  ;;  %v6900_v52 = vpop.permute.xlu1 %6899 }
 0x819   : > { %v7158_v25 = vadd.bf16 %v8744_v63, %v6614_v42 }
 0x81a   : > { %v7189_v23 = vmax.bf16 %v11994_v10, %v7157_v2  ;;  %v6908_v2 = vrot.slane %v6900_v52, %v10191_v8 }
 0x81b   : > { %v6496_v4 = vpop.f32.mrb[180].mxu1  ;;  %v7190_v22 = vmax.bf16 %v11994_v10, %v7158_v25  ;;  %v6896_v25 = vrot.slane %v6888_v36, %v10191_v8 }
 0x81c   : > { %v6498_v27 = vpop.f32.mrb[181].mxu1 }
 0x81d   : > { %v6500_v56 = vpop.f32.mrb[182].mxu1  ;;  %7413 = vmatprep.subr.bf16.mxu0 %v7190_v22 }
 0x81e   : > { %v6615_v29 = vpack.c.bf16 %v6500_v56, %v6496_v4  ;;  %v6502_v50 = vpop.f32.mrb[183].mxu1  ;;  %7414 = vmatpush1.bf16.msra.mxu0 %v7189_v23 }
 0x81f   : > { %v6616_v0 = vpack.c.bf16 %v6502_v50, %v6498_v27  ;;  %v8749_v27 = vcombine.low %v6896_v25, %v6908_v2  ;;  %v6912_v50 = vpop.permute.xlu0 %6911 }
 0x820   : > { %v7159_v45 = vadd.bf16 %v8745_v39, %v6615_v29  ;;  %v6924_v29 = vpop.permute.xlu1 %6923 }
 0x821   : > { %v7160_v24 = vadd.bf16 %v8745_v39, %v6616_v0 }
 0x822   : > { %v7191_v49 = vmax.bf16 %v11994_v10, %v7159_v45  ;;  %v6932_v45 = vrot.slane %v6924_v29, %v10191_v8 }
 0x823   : > { %v6506_v59 = vpop.f32.mrb[184].mxu1  ;;  %v7192_v26 = vmax.bf16 %v11994_v10, %v7160_v24  ;;  %v6920_v24 = vrot.slane %v6912_v50, %v10191_v8 }
 0x824   : > { %v6508_v40 = vpop.f32.mrb[185].mxu1 }
 0x825   : > { %v6510_v34 = vpop.f32.mrb[186].mxu1  ;;  %7415 = vmatprep.subr.bf16.mxu0 %v7192_v26 }
 0x826   : > { %v6617_v46 = vpack.c.bf16 %v6510_v34, %v6506_v59  ;;  %v6512_v33 = vpop.f32.mrb[187].mxu1  ;;  %7416 = vmatpush1.bf16.msra.mxu0 %v7191_v49 }
 0x827   : > { %v6618_v13 = vpack.c.bf16 %v6512_v33, %v6508_v40  ;;  %v8750_v40 = vcombine.low %v6920_v24, %v6932_v45  ;;  %v6936_v33 = vpop.permute.xlu0 %6935 }
 0x828   : > { %v7161_v61 = vadd.bf16 %v8746_v47, %v6617_v46  ;;  %v6948_v46 = vpop.permute.xlu1 %6947 }
 0x829   : > { %v7162_v54 = vadd.bf16 %v8746_v47, %v6618_v13 }
 0x82a   : > { %v7193_v38 = vmax.bf16 %v11994_v10, %v7161_v61  ;;  %v6956_v61 = vrot.slane %v6948_v46, %v10191_v8 }
 0x82b   : > { %v6516_v21 = vpop.f32.mrb[188].mxu1  ;;  %v7194_v17 = vmax.bf16 %v11994_v10, %v7162_v54  ;;  %v6944_v54 = vrot.slane %v6936_v33, %v10191_v8 }
 0x82c   : > { %v6518_v19 = vpop.f32.mrb[189].mxu1 }
 0x82d   : > { %v6520_v58 = vpop.f32.mrb[190].mxu1  ;;  %7417 = vmatprep.subr.bf16.mxu0 %v7194_v17 }
 0x82e   : > { %v6619_v35 = vpack.c.bf16 %v6520_v58, %v6516_v21  ;;  %v6522_v9 = vpop.f32.mrb[191].mxu1  ;;  %7418 = vmatpush1.bf16.msra.mxu0 %v7193_v38 }
 0x82f   : > { %v6620_v11 = vpack.c.bf16 %v6522_v9, %v6518_v19  ;;  %v8751_v19 = vcombine.low %v6944_v54, %v6956_v61  ;;  %v6960_v9 = vpop.permute.xlu0 %6959 }
 0x830   : > { %v7163_v43 = vadd.bf16 %v8747_v32, %v6619_v35  ;;  %v6972_v35 = vpop.permute.xlu1 %6971 }
 0x831   : > { %v7164_v41 = vadd.bf16 %v8747_v32, %v6620_v11 }
 0x832   : > { %v7195_v53 = vmax.bf16 %v11994_v10, %v7163_v43  ;;  %v6980_v43 = vrot.slane %v6972_v35, %v10191_v8 }
 0x833   : > { %v6526_v44 = vpop.f32.mrb[192].mxu1  ;;  %v7196_v14 = vmax.bf16 %v11994_v10, %v7164_v41  ;;  %v6968_v41 = vrot.slane %v6960_v9, %v10191_v8 }
 0x834   : > { %v6528_v15 = vpop.f32.mrb[193].mxu1 }
 0x835   : > { %v6530_v51 = vpop.f32.mrb[194].mxu1  ;;  %7419 = vmatprep.subr.bf16.mxu0 %v7196_v14 }
 0x836   : > { %v6621_v1 = vpack.c.bf16 %v6530_v51, %v6526_v44  ;;  %v6532_v63 = vpop.f32.mrb[195].mxu1  ;;  %7420 = vmatpush1.bf16.msra.mxu0 %v7195_v53 }
 0x837   : > { %v6622_v31 = vpack.c.bf16 %v6532_v63, %v6528_v15  ;;  %v8752_v15 = vcombine.low %v6968_v41, %v6980_v43  ;;  %v6984_v63 = vpop.permute.xlu0 %6983  ;;  %v9194_v43 = vld [vmem:[%s11930_s13 + $0x10] ss:$8 sps:$4 sm:$0xff]   ;;  %v9195_v41 = vld [vmem:[%s11930_s13 + $0x24] ss:$8 sps:$4 sm:$0xff]  }
 0x838   : > { %v7165_v5 = vadd.bf16 %v8748_v16, %v6621_v1  ;;  %v6996_v1 = vpop.permute.xlu1 %6995 }
 0x839   : > { %v7166_v42 = vadd.bf16 %v8748_v16, %v6622_v31 }
 0x83a   : > { %v7197_v4 = vmax.bf16 %v11994_v10, %v7165_v5  ;;  %v7004_v5 = vrot.slane %v6996_v1, %v10191_v8  ;;  %v9209_v1 = vld [vmem:[%s11930_s13 + $0x60] ss:$8 sps:$4 sm:$0xff]  }
 0x83b   : > { %v6536_v3 = vpop.f32.mrb[196].mxu1  ;;  %v7198_v6 = vmax.bf16 %v11994_v10, %v7166_v42  ;;  %v6992_v42 = vrot.slane %v6984_v63, %v10191_v8  ;;  %v9210_v63 = vld [vmem:[%s11930_s13 + $0x74] ss:$8 sps:$4 sm:$0xff]  }
 0x83c   : > { %v6538_v22 = vpop.f32.mrb[197].mxu1 }
 0x83d   : > { %v6540_v23 = vpop.f32.mrb[198].mxu1  ;;  %7421 = vmatprep.subr.bf16.mxu0 %v7198_v6 }
 0x83e   : > { %v6623_v56 = vpack.c.bf16 %v6540_v23, %v6536_v3  ;;  %v6542_v39 = vpop.f32.mrb[199].mxu1  ;;  %7422 = vmatpush1.bf16.msra.mxu0 %v7197_v4 }
 0x83f   : > { %v6624_v60 = vpack.c.bf16 %v6542_v39, %v6538_v22  ;;  %v8753_v22 = vcombine.low %v6992_v42, %v7004_v5  ;;  %v7008_v39 = vpop.permute.xlu0 %7007  ;;  %v9216_v5 = vld [vmem:[%s11930_s13 + $0x94] ss:$8 sps:$4 sm:$0xff]   ;;  %v9218_v42 = vld [vmem:[%s11930_s13 + $0x90] ss:$8 sps:$4 sm:$0xff]  }
 0x840   : > { %v7167_v30 = vadd.bf16 %v8749_v27, %v6623_v56  ;;  %v7020_v56 = vpop.permute.xlu1 %7019 }
 0x841   : > { %v7168_v0 = vadd.bf16 %v8749_v27, %v6624_v60 }
 0x842   : > { %v7199_v59 = vmax.bf16 %v11994_v10, %v7167_v30  ;;  %v7028_v30 = vrot.slane %v7020_v56, %v10191_v8  ;;  %v9231_v56 = vld [vmem:[%s11930_s13 + $0xe4] ss:$8 sps:$4 sm:$0xff]  }
 0x843   : > { %v6546_v18 = vpop.f32.mrb[200].mxu1  ;;  %v7200_v28 = vmax.bf16 %v11994_v10, %v7168_v0  ;;  %v7016_v0 = vrot.slane %v7008_v39, %v10191_v8  ;;  %v9233_v39 = vld [vmem:[%s11930_s13 + $0xe0] ss:$8 sps:$4 sm:$0xff]  }
 0x844   : > { %v6548_v26 = vpop.f32.mrb[201].mxu1 }
 0x845   : > { %v6550_v49 = vpop.f32.mrb[202].mxu1  ;;  %7423 = vmatprep.subr.bf16.mxu0 %v7200_v28 }
 0x846   : > { %v6625_v34 = vpack.c.bf16 %v6550_v49, %v6546_v18  ;;  %v6552_v47 = vpop.f32.mrb[203].mxu1  ;;  %7424 = vmatpush1.bf16.msra.mxu0 %v7199_v59 }
 0x847   : > { %v6626_v48 = vpack.c.bf16 %v6552_v47, %v6548_v26  ;;  %v8754_v26 = vcombine.low %v7016_v0, %v7028_v30  ;;  %v7032_v47 = vpop.permute.xlu0 %7031  ;;  %v9295_v0 = vmov 1966171168  }
 0x848   : > { %v7169_v55 = vadd.bf16 %v8750_v40, %v6625_v34  ;;  %v7044_v34 = vpop.permute.xlu1 %7043 }
 0x849   : > { %v7170_v13 = vadd.bf16 %v8750_v40, %v6626_v48 }
 0x84a   : > { %v7201_v21 = vmax.bf16 %v11994_v10, %v7169_v55  ;;  %v7052_v55 = vrot.slane %v7044_v34, %v10191_v8  ;;  %v12084_v34 = vld [vmem:[#allocation44_spill] sm:$0xff] }
 0x84b   : > { %v6556_v20 = vpop.f32.mrb[204].mxu1  ;;  %v7202_v12 = vmax.bf16 %v11994_v10, %v7170_v13  ;;  %v7040_v13 = vrot.slane %v7032_v47, %v10191_v8  ;;  %v7665_v30 = vpop.permute.xlu0 %7664 }
 0x84c   : > { %v6558_v17 = vpop.f32.mrb[205].mxu1 }
 0x84d   : > { %v6560_v38 = vpop.f32.mrb[206].mxu1  ;;  %7425 = vmatprep.subr.bf16.mxu0 %v7202_v12 }
 0x84e   : > { %v6627_v58 = vpack.c.bf16 %v6560_v38, %v6556_v20  ;;  %v6562_v32 = vpop.f32.mrb[207].mxu1  ;;  %7426 = vmatpush1.bf16.msra.mxu0 %v7201_v21 }
 0x84f   : > { %v6628_v57 = vpack.c.bf16 %v6562_v32, %v6558_v17  ;;  %v8755_v17 = vcombine.low %v7040_v13, %v7052_v55 }
 0x850   : > { %v7171_v7 = vadd.bf16 %v8751_v19, %v6627_v58 }
 0x851   : > { %v7172_v11 = vadd.bf16 %v8751_v19, %v6628_v57 }
 0x852   : > { %v7203_v44 = vmax.bf16 %v11994_v10, %v7171_v7  ;;  %v9189_v7 = vld [vmem:[%s11930_s13] ss:$8 sps:$4 sm:$0xff]  }
 0x853   : > { %v6566_v62 = vpop.f32.mrb[208].mxu1  ;;  %v7204_v37 = vmax.bf16 %v11994_v10, %v7172_v11  ;;  %v9192_v11 = vld [vmem:[%s11930_s13 + $0x14] ss:$8 sps:$4 sm:$0xff]  }
 0x854   : > { %v6568_v14 = vpop.f32.mrb[209].mxu1 }
 0x855   : > { %v6570_v53 = vpop.f32.mrb[210].mxu1  ;;  %7427 = vmatprep.subr.bf16.mxu0 %v7204_v37  ;;  %v9198_v37 = vld [vmem:[%s11930_s13 + $0x34] ss:$8 sps:$4 sm:$0xff]  }
 0x856   : > { %v6629_v51 = vpack.c.bf16 %v6570_v53, %v6566_v62  ;;  %v6572_v16 = vpop.f32.mrb[211].mxu1  ;;  %7428 = vmatpush1.bf16.msra.mxu0 %v7203_v44  ;;  %v9197_v62 = vld [vmem:[%s11930_s13 + $0x20] ss:$8 sps:$4 sm:$0xff]   ;;  %v9200_v44 = vld [vmem:[%s11930_s13 + $0x30] ss:$8 sps:$4 sm:$0xff]  }
 0x857   : > { %v6630_v52 = vpack.c.bf16 %v6572_v16, %v6568_v14  ;;  %v9201_v14 = vld [vmem:[%s11930_s13 + $0x44] ss:$8 sps:$4 sm:$0xff]   ;;  %v9203_v53 = vld [vmem:[%s11930_s13 + $0x40] ss:$8 sps:$4 sm:$0xff]  }
 0x858   : > { %v7173_v36 = vadd.bf16 %v8752_v15, %v6629_v51  ;;  %v9206_v51 = vld [vmem:[%s11930_s13 + $0x50] ss:$8 sps:$4 sm:$0xff]   ;;  %v9207_v16 = vld [vmem:[%s11930_s13 + $0x64] ss:$8 sps:$4 sm:$0xff]  }
 0x859   : > { %v7174_v31 = vadd.bf16 %v8752_v15, %v6630_v52  ;;  %v9204_v15 = vld [vmem:[%s11930_s13 + $0x54] ss:$8 sps:$4 sm:$0xff]   ;;  %v9212_v52 = vld [vmem:[%s11930_s13 + $0x70] ss:$8 sps:$4 sm:$0xff]  }
 0x85a   : > { %v7205_v3 = vmax.bf16 %v11994_v10, %v7173_v36  ;;  %v9213_v36 = vld [vmem:[%s11930_s13 + $0x84] ss:$8 sps:$4 sm:$0xff]  }
 0x85b   : > { %v6576_v2 = vpop.f32.mrb[212].mxu1  ;;  %v7206_v25 = vmax.bf16 %v11994_v10, %v7174_v31  ;;  %v9215_v31 = vld [vmem:[%s11930_s13 + $0x80] ss:$8 sps:$4 sm:$0xff]  }
 0x85c   : > { %v6578_v6 = vpop.f32.mrb[213].mxu1 }
 0x85d   : > { %v6580_v4 = vpop.f32.mrb[214].mxu1  ;;  %7429 = vmatprep.subr.bf16.mxu0 %v7206_v25  ;;  %v9221_v25 = vld [vmem:[%s11930_s13 + $0xa0] ss:$8 sps:$4 sm:$0xff]  }
 0x85e   : > { %v6631_v23 = vpack.c.bf16 %v6580_v4, %v6576_v2  ;;  %v6582_v27 = vpop.f32.mrb[215].mxu1  ;;  %7430 = vmatpush1.bf16.msra.mxu0 %v7205_v3  ;;  %v9219_v2 = vld [vmem:[%s11930_s13 + $0xa4] ss:$8 sps:$4 sm:$0xff]   ;;  %v9222_v3 = vld [vmem:[%s11930_s13 + $0xb4] ss:$8 sps:$4 sm:$0xff]  }
 0x85f   : > { %v6632_v29 = vpack.c.bf16 %v6582_v27, %v6578_v6  ;;  %v9224_v6 = vld [vmem:[%s11930_s13 + $0xb0] ss:$8 sps:$4 sm:$0xff]   ;;  %v9225_v4 = vld [vmem:[%s11930_s13 + $0xc4] ss:$8 sps:$4 sm:$0xff]  }
 0x860   : > { %v7175_v50 = vadd.bf16 %v8753_v22, %v6631_v23  ;;  %v9228_v23 = vld [vmem:[%s11930_s13 + $0xd4] ss:$8 sps:$4 sm:$0xff]   ;;  %v9230_v27 = vld [vmem:[%s11930_s13 + $0xd0] ss:$8 sps:$4 sm:$0xff]  }
 0x861   : > { %v7176_v60 = vadd.bf16 %v8753_v22, %v6632_v29  ;;  %v9227_v22 = vld [vmem:[%s11930_s13 + $0xc0] ss:$8 sps:$4 sm:$0xff]   ;;  %v9234_v29 = vld [vmem:[%s11930_s13 + $0xf4] ss:$8 sps:$4 sm:$0xff]  }
 0x862   : > { %v7207_v18 = vmax.bf16 %v11994_v10, %v7175_v50  ;;  %v9236_v50 = vld [vmem:[%s11930_s13 + $0xf0] ss:$8 sps:$4 sm:$0xff]  }
 0x863   : > { %v6586_v45 = vpop.f32.mrb[216].mxu1  ;;  %v7208_v24 = vmax.bf16 %v11994_v10, %v7176_v60  ;;  %v7677_v60 = vpop.permute.xlu1 %7676 }
 0x864   : > { %v6588_v28 = vpop.f32.mrb[217].mxu1 }
 0x865   : > { %v6590_v59 = vpop.f32.mrb[218].mxu1  ;;  %7431 = vmatprep.subr.bf16.mxu0 %v7208_v24  ;;  %v7685_v24 = vrot.slane %v7677_v60, %v10191_v8 }
 0x866   : > { %v6633_v49 = vpack.c.bf16 %v6590_v59, %v6586_v45  ;;  %v6592_v40 = vpop.f32.mrb[219].mxu1  ;;  %7432 = vmatpush1.bf16.msra.mxu0 %v7207_v18  ;;  %v8227_v45 = vunpack.c.l.s4 %v9295_v0  ;;  %v7673_v18 = vrot.slane %v7665_v30, %v10191_v8 }
 0x867   : > { %v6634_v46 = vpack.c.bf16 %v6592_v40, %v6588_v28 }
 0x868   : > { %v7177_v33 = vadd.bf16 %v8754_v26, %v6633_v49  ;;  %v8228_v28 = vunpack.c.0.s8 %v8227_v45 }
 0x869   : > { %v7178_v48 = vadd.bf16 %v8754_v26, %v6634_v46  ;;  %v11826_v26 = vld.sshfl [vmem:[%s11932_s15] sm:$0x11 pattern:$0x75316420] }
 0x86a   : > { %v7209_v20 = vmax.bf16 %v11994_v10, %v7177_v33  ;;  %v8225_v40 = vcombine.high %v11826_v26, %v11826_v26  ;;  %v11831_v47 = vsub.s32 %v8228_v28, %v12084_v34  ;;  %v8788_v33 = vcombine.low %v7673_v18, %v7685_v24 }
 0x86b   : > { %v6596_v61 = vpop.f32.mrb[220].mxu1  ;;  %v7210_v54 = vmax.bf16 %v11994_v10, %v7178_v48 }
 0x86c   : > { %v6598_v12 = vpop.f32.mrb[221].mxu1  ;;  %v8239_v13 = vrot.slane %v8225_v40, %v11831_v47 }
 0x86d   : > { %v6600_v21 = vpop.f32.mrb[222].mxu1  ;;  %7433 = vmatprep.subr.bf16.mxu0 %v7210_v54  ;;  %v7689_v54 = vpop.permute.xlu0 %7688 }
 0x86e   : > { %v6635_v38 = vpack.c.bf16 %v6600_v21, %v6596_v61  ;;  %v6602_v19 = vpop.f32.mrb[223].mxu1  ;;  %7434 = vmatpush1.bf16.msra.mxu0 %v7209_v20  ;;  %v7701_v61 = vpop.permute.xlu1 %7700  ;;  %8274 = vmatprep.mubr.bf16.mxu1 %v8239_v13 }
 0x86f   : > { %v6636_v58 = vpack.c.bf16 %v6602_v19, %v6598_v12 }
 0x870   : > { %v7179_v32 = vadd.bf16 %v8755_v17, %v6635_v38  ;;  %v7697_v38 = vrot.slane %v7689_v54, %v10191_v8 }
 0x871   : > { %v7180_v35 = vadd.bf16 %v8755_v17, %v6636_v58  ;;  %v7709_v17 = vrot.slane %v7701_v61, %v10191_v8 }
 0x872   : > { %v7211_v57 = vmax.bf16 %v11994_v10, %v7179_v32 }
 0x873   : > { %v7212_v9 = vmax.bf16 %v11994_v10, %v7180_v35 }
 0x875   : > { %7435 = vmatprep.subr.bf16.mxu0 %v7212_v9 }
 0x876   : > { %7436 = vmatpush1.bf16.msra.mxu0 %v7211_v57  ;;  %v8789_v57 = vcombine.low %v7697_v38, %v7709_v17 }
 0x879   : > { %7438 = vmatmul.mubr.bf16.vlgmr.msra.gmra.mrb[160].mxu0 %v9189_v7 }
 0x87a   : > { %7447 = vmatprep.mubr.bf16.mxu0 %v9192_v11 }
 0x881   : > { %7448 = vmatmul.mubr.bf16.gmra.mrb[164].mxu0 %v9194_v43  ;;  %v7725_v43 = vpop.permute.xlu1 %7724 }
 0x882   : > { %7457 = vmatprep.mubr.bf16.mxu0 %v9195_v41  ;;  %v7713_v41 = vpop.permute.xlu0 %7712 }
 0x889   : > { %7458 = vmatmul.mubr.bf16.gmra.mrb[168].mxu0 %v9197_v62 }
 0x88a   : > { %7467 = vmatprep.mubr.bf16.mxu0 %v9198_v37 }
 0x891   : > { %7468 = vmatmul.mubr.bf16.gmra.mrb[172].mxu0 %v9200_v44 }
 0x892   : > { %7477 = vmatprep.mubr.bf16.mxu0 %v9201_v14  ;;  %v7733_v14 = vrot.slane %v7725_v43, %v10191_v8 }
 0x899   : > { %7478 = vmatmul.mubr.bf16.gmra.mrb[176].mxu0 %v9203_v53  ;;  %v7721_v53 = vrot.slane %v7713_v41, %v10191_v8 }
 0x89a   : > { %7487 = vmatprep.mubr.bf16.mxu0 %v9204_v15 }
 0x8a1   : > { %7488 = vmatmul.mubr.bf16.gmra.mrb[180].mxu0 %v9206_v51 }
 0x8a2   : > { %7497 = vmatprep.mubr.bf16.mxu0 %v9207_v16 }
 0x8a9   : > { %7498 = vmatmul.mubr.bf16.gmra.mrb[184].mxu0 %v9209_v1 }
 0x8aa   : > { %7507 = vmatprep.mubr.bf16.mxu0 %v9210_v63 }
 0x8b1   : > { %7508 = vmatmul.mubr.bf16.gmra.mrb[188].mxu0 %v9212_v52  ;;  %v8790_v52 = vcombine.low %v7721_v53, %v7733_v14 }
 0x8b2   : > { %7517 = vmatprep.mubr.bf16.mxu0 %v9213_v36 }
 0x8b9   : > { %7518 = vmatmul.mubr.bf16.gmra.mrb[192].mxu0 %v9215_v31 }
 0x8ba   : > { %7527 = vmatprep.mubr.bf16.mxu0 %v9216_v5  ;;  %v7749_v5 = vpop.permute.xlu1 %7748 }
 0x8be   : > { %v7773_v30 = vpop.permute.xlu1 %7772 }
 0x8bf   : > { %v7781_v28 = vrot.slane %v7773_v30, %v10191_v8 }
 0x8c1   : > { %7528 = vmatmul.mubr.bf16.gmra.mrb[196].mxu0 %v9218_v42  ;;  %v7737_v42 = vpop.permute.xlu0 %7736 }
 0x8c2   : > { %7537 = vmatprep.mubr.bf16.mxu0 %v9219_v2  ;;  %v7797_v54 = vpop.permute.xlu1 %7796 }
 0x8c3   : > { %v7805_v38 = vrot.slane %v7797_v54, %v10191_v8 }
 0x8c5   : > { %v7761_v0 = vpop.permute.xlu0 %7760 }
 0x8c6   : > { %v7821_v41 = vpop.permute.xlu1 %7820 }
 0x8c7   : > { %v7829_v53 = vrot.slane %v7821_v41, %v10191_v8 }
 0x8c9   : > { %7538 = vmatmul.mubr.bf16.gmra.mrb[200].mxu0 %v9221_v25 }
 0x8ca   : > { %7547 = vmatprep.mubr.bf16.mxu0 %v9222_v3 }
 0x8d1   : > { %7548 = vmatmul.mubr.bf16.gmra.mrb[204].mxu0 %v9224_v6  ;;  %v7757_v6 = vrot.slane %v7749_v5, %v10191_v8 }
 0x8d2   : > { %7557 = vmatprep.mubr.bf16.mxu0 %v9225_v4  ;;  %v7745_v4 = vrot.slane %v7737_v42, %v10191_v8  ;;  %v7845_v42 = vpop.permute.xlu1 %7844 }
 0x8d9   : > { %7558 = vmatmul.mubr.bf16.gmra.mrb[208].mxu0 %v9227_v22 }
 0x8da   : > { %7567 = vmatprep.mubr.bf16.mxu0 %v9228_v23 }
 0x8e1   : > { %7568 = vmatmul.mubr.bf16.gmra.mrb[212].mxu0 %v9230_v27 }
 0x8e2   : > { %7577 = vmatprep.mubr.bf16.mxu0 %v9231_v56 }
 0x8e9   : > { %7578 = vmatmul.mubr.bf16.gmra.mrb[216].mxu0 %v9233_v39 }
 0x8ea   : > { %7587 = vmatprep.mubr.bf16.mxu0 %v9234_v29  ;;  %v8791_v29 = vcombine.low %v7745_v4, %v7757_v6  ;;  %v7853_v4 = vrot.slane %v7845_v42, %v10191_v8 }
 0x8f1   : > { %7588 = vmatmul.mubr.bf16.gmra.mrb[220].mxu0 %v9236_v50 }
 0x94c   : > { %v7439_v59 = vpop.f32.mrb[160].mxu0 }
 0x94d   : > { %v7441_v49 = vpop.f32.mrb[161].mxu0 }
 0x94e   : > { %v7443_v46 = vpop.f32.mrb[162].mxu0 }
 0x94f   : > { %v7598_v48 = vpack.c.bf16 %v7443_v46, %v7439_v59  ;;  %v7445_v55 = vpop.f32.mrb[163].mxu0  ;;  %v7769_v59 = vrot.slane %v7761_v0, %v10191_v8  ;;  %v7869_v0 = vpop.permute.xlu1 %7868 }
 0x950   : > { %v7599_v20 = vpack.c.bf16 %v7445_v55, %v7441_v49 }
 0x951   : > { %v8142_v12 = vadd.bf16 %v8788_v33, %v7598_v48  ;;  %v8792_v55 = vcombine.low %v7769_v59, %v7781_v28  ;;  %v7877_v59 = vrot.slane %v7869_v0, %v10191_v8 }
 0x952   : > { %v8143_v21 = vadd.bf16 %v8788_v33, %v7599_v20  ;;  %v7785_v20 = vpop.permute.xlu0 %7784 }
 0x953   : > { %v8174_v32 = vmax.bf16 %v11994_v10, %v8142_v12 }
 0x954   : > { %v7449_v19 = vpop.f32.mrb[164].mxu0  ;;  %v8175_v58 = vmax.bf16 %v11994_v10, %v8143_v21 }
 0x955   : > { %v7451_v35 = vpop.f32.mrb[165].mxu0 }
 0x956   : > { %v7453_v9 = vpop.f32.mrb[166].mxu0  ;;  %8242 = vmatprep.subr.bf16.mxu1 %v8175_v58 }
 0x957   : > { %v7600_v7 = vpack.c.bf16 %v7453_v9, %v7449_v19  ;;  %v7455_v11 = vpop.f32.mrb[167].mxu0  ;;  %8243 = vmatpush1.bf16.msra.mxu1 %v8174_v32  ;;  %v7793_v19 = vrot.slane %v7785_v20, %v10191_v8  ;;  %v7893_v20 = vpop.permute.xlu1 %7892 }
 0x958   : > { %v7601_v62 = vpack.c.bf16 %v7455_v11, %v7451_v35 }
 0x959   : > { %v8144_v37 = vadd.bf16 %v8789_v57, %v7600_v7  ;;  %v8793_v7 = vcombine.low %v7793_v19, %v7805_v38  ;;  %v7901_v19 = vrot.slane %v7893_v20, %v10191_v8 }
 0x95a   : > { %v8145_v44 = vadd.bf16 %v8789_v57, %v7601_v62  ;;  %v7809_v62 = vpop.permute.xlu0 %7808 }
 0x95b   : > { %v8176_v16 = vmax.bf16 %v11994_v10, %v8144_v37 }
 0x95c   : > { %v7459_v15 = vpop.f32.mrb[168].mxu0  ;;  %v8177_v51 = vmax.bf16 %v11994_v10, %v8145_v44 }
 0x95d   : > { %v7461_v1 = vpop.f32.mrb[169].mxu0 }
 0x95e   : > { %v7463_v63 = vpop.f32.mrb[170].mxu0  ;;  %8244 = vmatprep.subr.bf16.mxu1 %v8177_v51 }
 0x95f   : > { %v7602_v36 = vpack.c.bf16 %v7463_v63, %v7459_v15  ;;  %v7465_v31 = vpop.f32.mrb[171].mxu0  ;;  %8245 = vmatpush1.bf16.msra.mxu1 %v8176_v16  ;;  %v7817_v15 = vrot.slane %v7809_v62, %v10191_v8  ;;  %v7917_v62 = vpop.permute.xlu1 %7916 }
 0x960   : > { %v7603_v2 = vpack.c.bf16 %v7465_v31, %v7461_v1 }
 0x961   : > { %v8146_v25 = vadd.bf16 %v8790_v52, %v7602_v36  ;;  %v8794_v36 = vcombine.low %v7817_v15, %v7829_v53  ;;  %v7925_v15 = vrot.slane %v7917_v62, %v10191_v8 }
 0x962   : > { %v8147_v3 = vadd.bf16 %v8790_v52, %v7603_v2  ;;  %v7833_v2 = vpop.permute.xlu0 %7832 }
 0x963   : > { %v8178_v27 = vmax.bf16 %v11994_v10, %v8146_v25 }
 0x964   : > { %v7469_v22 = vpop.f32.mrb[172].mxu0  ;;  %v8179_v23 = vmax.bf16 %v11994_v10, %v8147_v3 }
 0x965   : > { %v7471_v56 = vpop.f32.mrb[173].mxu0 }
 0x966   : > { %v7473_v39 = vpop.f32.mrb[174].mxu0  ;;  %8246 = vmatprep.subr.bf16.mxu1 %v8179_v23 }
 0x967   : > { %v7604_v50 = vpack.c.bf16 %v7473_v39, %v7469_v22  ;;  %v7475_v60 = vpop.f32.mrb[175].mxu0  ;;  %8247 = vmatpush1.bf16.msra.mxu1 %v8178_v27  ;;  %v7841_v22 = vrot.slane %v7833_v2, %v10191_v8  ;;  %v7941_v2 = vpop.permute.xlu1 %7940 }
 0x968   : > { %v7605_v45 = vpack.c.bf16 %v7475_v60, %v7471_v56 }
 0x969   : > { %v8148_v24 = vadd.bf16 %v8791_v29, %v7604_v50  ;;  %v8795_v50 = vcombine.low %v7841_v22, %v7853_v4  ;;  %v7949_v22 = vrot.slane %v7941_v2, %v10191_v8 }
 0x96a   : > { %v8149_v18 = vadd.bf16 %v8791_v29, %v7605_v45  ;;  %v7857_v45 = vpop.permute.xlu0 %7856 }
 0x96b   : > { %v8180_v46 = vmax.bf16 %v11994_v10, %v8148_v24 }
 0x96c   : > { %v7479_v49 = vpop.f32.mrb[176].mxu0  ;;  %v8181_v40 = vmax.bf16 %v11994_v10, %v8149_v18 }
 0x96d   : > { %v7481_v33 = vpop.f32.mrb[177].mxu0 }
 0x96e   : > { %v7483_v48 = vpop.f32.mrb[178].mxu0  ;;  %8248 = vmatprep.subr.bf16.mxu1 %v8181_v40 }
 0x96f   : > { %v7606_v13 = vpack.c.bf16 %v7483_v48, %v7479_v49  ;;  %v7485_v61 = vpop.f32.mrb[179].mxu0  ;;  %8249 = vmatpush1.bf16.msra.mxu1 %v8180_v46  ;;  %v7865_v49 = vrot.slane %v7857_v45, %v10191_v8  ;;  %v7965_v45 = vpop.permute.xlu1 %7964 }
 0x970   : > { %v7607_v12 = vpack.c.bf16 %v7485_v61, %v7481_v33 }
 0x971   : > { %v8150_v21 = vadd.bf16 %v8792_v55, %v7606_v13  ;;  %v8796_v13 = vcombine.low %v7865_v49, %v7877_v59  ;;  %v7973_v49 = vrot.slane %v7965_v45, %v10191_v8 }
 0x972   : > { %v8151_v17 = vadd.bf16 %v8792_v55, %v7607_v12  ;;  %v7881_v12 = vpop.permute.xlu0 %7880 }
 0x973   : > { %v8182_v35 = vmax.bf16 %v11994_v10, %v8150_v21 }
 0x974   : > { %v7489_v58 = vpop.f32.mrb[180].mxu0  ;;  %v8183_v32 = vmax.bf16 %v11994_v10, %v8151_v17 }
 0x975   : > { %v7491_v9 = vpop.f32.mrb[181].mxu0 }
 0x976   : > { %v7493_v57 = vpop.f32.mrb[182].mxu0  ;;  %8250 = vmatprep.subr.bf16.mxu1 %v8183_v32 }
 0x977   : > { %v7608_v11 = vpack.c.bf16 %v7493_v57, %v7489_v58  ;;  %v7495_v43 = vpop.f32.mrb[183].mxu0  ;;  %8251 = vmatpush1.bf16.msra.mxu1 %v8182_v35  ;;  %v7889_v58 = vrot.slane %v7881_v12, %v10191_v8  ;;  %v7989_v12 = vpop.permute.xlu1 %7988 }
 0x978   : > { %v7609_v37 = vpack.c.bf16 %v7495_v43, %v7491_v9 }
 0x979   : > { %v8152_v44 = vadd.bf16 %v8793_v7, %v7608_v11  ;;  %v8797_v11 = vcombine.low %v7889_v58, %v7901_v19  ;;  %v7997_v58 = vrot.slane %v7989_v12, %v10191_v8 }
 0x97a   : > { %v8153_v14 = vadd.bf16 %v8793_v7, %v7609_v37  ;;  %v7905_v37 = vpop.permute.xlu0 %7904 }
 0x97b   : > { %v8184_v1 = vmax.bf16 %v11994_v10, %v8152_v44 }
 0x97c   : > { %v7499_v51 = vpop.f32.mrb[184].mxu0  ;;  %v8185_v16 = vmax.bf16 %v11994_v10, %v8153_v14 }
 0x97d   : > { %v7501_v63 = vpop.f32.mrb[185].mxu0 }
 0x97e   : > { %v7503_v52 = vpop.f32.mrb[186].mxu0  ;;  %8252 = vmatprep.subr.bf16.mxu1 %v8185_v16 }
 0x97f   : > { %v7610_v31 = vpack.c.bf16 %v7503_v52, %v7499_v51  ;;  %v7505_v5 = vpop.f32.mrb[187].mxu0  ;;  %8253 = vmatpush1.bf16.msra.mxu1 %v8184_v1  ;;  %v7913_v51 = vrot.slane %v7905_v37, %v10191_v8  ;;  %v8013_v37 = vpop.permute.xlu1 %8012 }
 0x980   : > { %v7611_v25 = vpack.c.bf16 %v7505_v5, %v7501_v63 }
 0x981   : > { %v8154_v3 = vadd.bf16 %v8794_v36, %v7610_v31  ;;  %v8798_v31 = vcombine.low %v7913_v51, %v7925_v15  ;;  %v8021_v51 = vrot.slane %v8013_v37, %v10191_v8 }
 0x982   : > { %v8155_v6 = vadd.bf16 %v8794_v36, %v7611_v25  ;;  %v7929_v25 = vpop.permute.xlu0 %7928 }
 0x983   : > { %v8186_v56 = vmax.bf16 %v11994_v10, %v8154_v3 }
 0x984   : > { %v7509_v23 = vpop.f32.mrb[188].mxu0  ;;  %v8187_v27 = vmax.bf16 %v11994_v10, %v8155_v6 }
 0x985   : > { %v7511_v39 = vpop.f32.mrb[189].mxu0 }
 0x986   : > { %v7513_v29 = vpop.f32.mrb[190].mxu0  ;;  %8254 = vmatprep.subr.bf16.mxu1 %v8187_v27 }
 0x987   : > { %v7612_v60 = vpack.c.bf16 %v7513_v29, %v7509_v23  ;;  %v7515_v30 = vpop.f32.mrb[191].mxu0  ;;  %8255 = vmatpush1.bf16.msra.mxu1 %v8186_v56  ;;  %v7937_v23 = vrot.slane %v7929_v25, %v10191_v8  ;;  %v8037_v25 = vpop.permute.xlu1 %8036 }
 0x988   : > { %v7613_v24 = vpack.c.bf16 %v7515_v30, %v7511_v39 }
 0x989   : > { %v8156_v18 = vadd.bf16 %v8795_v50, %v7612_v60  ;;  %v8799_v60 = vcombine.low %v7937_v23, %v7949_v22  ;;  %v8045_v23 = vrot.slane %v8037_v25, %v10191_v8 }
 0x98a   : > { %v8157_v28 = vadd.bf16 %v8795_v50, %v7613_v24  ;;  %v7953_v24 = vpop.permute.xlu0 %7952 }
 0x98b   : > { %v8188_v33 = vmax.bf16 %v11994_v10, %v8156_v18 }
 0x98c   : > { %v7519_v40 = vpop.f32.mrb[192].mxu0  ;;  %v8189_v46 = vmax.bf16 %v11994_v10, %v8157_v28 }
 0x98d   : > { %v7521_v48 = vpop.f32.mrb[193].mxu0 }
 0x98e   : > { %v7523_v55 = vpop.f32.mrb[194].mxu0  ;;  %8256 = vmatprep.subr.bf16.mxu1 %v8189_v46 }
 0x98f   : > { %v7614_v61 = vpack.c.bf16 %v7523_v55, %v7519_v40  ;;  %v7525_v54 = vpop.f32.mrb[195].mxu0  ;;  %8257 = vmatpush1.bf16.msra.mxu1 %v8188_v33  ;;  %v7961_v40 = vrot.slane %v7953_v24, %v10191_v8 }
 0x990   : > { %v7615_v21 = vpack.c.bf16 %v7525_v54, %v7521_v48 }
 0x991   : > { %v8158_v17 = vadd.bf16 %v8796_v13, %v7614_v61  ;;  %v8800_v61 = vcombine.low %v7961_v40, %v7973_v49  ;;  %v8232_v49 = vrot.slane %v11826_v26, %v11831_v47  ;;  %v8215_v40 = vsub.s32 0, %v12084_v34 }
 0x992   : > { %v8159_v38 = vadd.bf16 %v8796_v13, %v7615_v21  ;;  %v7977_v21 = vpop.permute.xlu0 %7976  ;;  %v12086_v26 = vlaneseq }
 0x993   : > { %v8190_v9 = vmax.bf16 %v11994_v10, %v8158_v17 }
 0x994   : > { %v7529_v32 = vpop.f32.mrb[196].mxu0  ;;  %v8191_v35 = vmax.bf16 %v11994_v10, %v8159_v38  ;;  %vm8303_vm0 = vcmp.lt.s32.totalorder %v12086_v26, 256 }
 0x995   : > { %v7531_v57 = vpop.f32.mrb[197].mxu0 }
 0x996   : > { %v7533_v7 = vpop.f32.mrb[198].mxu0  ;;  %8258 = vmatprep.subr.bf16.mxu1 %v8191_v35 }
 0x997   : > { %v7616_v43 = vpack.c.bf16 %v7533_v7, %v7529_v32  ;;  %v7535_v41 = vpop.f32.mrb[199].mxu0  ;;  %8259 = vmatpush1.bf16.msra.mxu1 %v8190_v9  ;;  %v7985_v32 = vrot.slane %v7977_v21, %v10191_v8 }
 0x998   : > { %v7617_v44 = vpack.c.bf16 %v7535_v41, %v7531_v57 }
 0x999   : > { %v8160_v14 = vadd.bf16 %v8797_v11, %v7616_v43  ;;  %v8801_v43 = vcombine.low %v7985_v32, %v7997_v58 }
 0x99a   : > { %v8161_v53 = vadd.bf16 %v8797_v11, %v7617_v44  ;;  %v8001_v44 = vpop.permute.xlu0 %8000 }
 0x99b   : > { %v8192_v63 = vmax.bf16 %v11994_v10, %v8160_v14 }
 0x99c   : > { %v7539_v16 = vpop.f32.mrb[200].mxu0  ;;  %v8193_v1 = vmax.bf16 %v11994_v10, %v8161_v53 }
 0x99d   : > { %v7541_v52 = vpop.f32.mrb[201].mxu0 }
 0x99e   : > { %v7543_v36 = vpop.f32.mrb[202].mxu0  ;;  %8260 = vmatprep.subr.bf16.mxu1 %v8193_v1 }
 0x99f   : > { %v7618_v5 = vpack.c.bf16 %v7543_v36, %v7539_v16  ;;  %v7545_v42 = vpop.f32.mrb[203].mxu0  ;;  %8261 = vmatpush1.bf16.msra.mxu1 %v8192_v63  ;;  %v8009_v16 = vrot.slane %v8001_v44, %v10191_v8 }
 0x9a0   : > { %v7619_v3 = vpack.c.bf16 %v7545_v42, %v7541_v52 }
 0x9a1   : > { %v8162_v6 = vadd.bf16 %v8798_v31, %v7618_v5  ;;  %v8802_v5 = vcombine.low %v8009_v16, %v8021_v51 }
 0x9a2   : > { %v8163_v4 = vadd.bf16 %v8798_v31, %v7619_v3  ;;  %v8025_v3 = vpop.permute.xlu0 %8024 }
 0x9a3   : > { %v8194_v39 = vmax.bf16 %v11994_v10, %v8162_v6 }
 0x9a4   : > { %v7549_v27 = vpop.f32.mrb[204].mxu0  ;;  %v8195_v56 = vmax.bf16 %v11994_v10, %v8163_v4 }
 0x9a5   : > { %v7551_v29 = vpop.f32.mrb[205].mxu0 }
 0x9a6   : > { %v7553_v50 = vpop.f32.mrb[206].mxu0  ;;  %8262 = vmatprep.subr.bf16.mxu1 %v8195_v56 }
 0x9a7   : > { %v7620_v30 = vpack.c.bf16 %v7553_v50, %v7549_v27  ;;  %v7555_v0 = vpop.f32.mrb[207].mxu0  ;;  %8263 = vmatpush1.bf16.msra.mxu1 %v8194_v39  ;;  %v8033_v27 = vrot.slane %v8025_v3, %v10191_v8 }
 0x9a8   : > { %v7621_v18 = vpack.c.bf16 %v7555_v0, %v7551_v29 }
 0x9a9   : > { %v8164_v28 = vadd.bf16 %v8799_v60, %v7620_v30  ;;  %v8803_v30 = vcombine.low %v8033_v27, %v8045_v23 }
 0x9aa   : > { %v8165_v59 = vadd.bf16 %v8799_v60, %v7621_v18 }
 0x9ab   : > { %v8196_v48 = vmax.bf16 %v11994_v10, %v8164_v28 }
 0x9ac   : > { %v7559_v46 = vpop.f32.mrb[208].mxu0  ;;  %v8197_v33 = vmax.bf16 %v11994_v10, %v8165_v59 }
 0x9ad   : > { %v7561_v55 = vpop.f32.mrb[209].mxu0 }
 0x9ae   : > { %v7563_v13 = vpop.f32.mrb[210].mxu0  ;;  %8264 = vmatprep.subr.bf16.mxu1 %v8197_v33 }
 0x9af   : > { %v7622_v54 = vpack.c.bf16 %v7563_v13, %v7559_v46  ;;  %v7565_v20 = vpop.f32.mrb[211].mxu0  ;;  %8265 = vmatpush1.bf16.msra.mxu1 %v8196_v48  ;;  %v8211_v46 = vpop.permute.xlu0 %8210 }
 0x9b0   : > { %v7623_v17 = vpack.c.bf16 %v7565_v20, %v7561_v55  ;;  %v8216_v33 = vrot.slane %v8211_v46, %v8215_v40 }
 0x9b1   : > { %v8166_v38 = vadd.bf16 %v8800_v61, %v7622_v54 }
 0x9b2   : > { %v8167_v19 = vadd.bf16 %v8800_v61, %v7623_v17 }
 0x9b3   : > { %v8198_v57 = vmax.bf16 %v11994_v10, %v8166_v38 }
 0x9b4   : > { %v7569_v35 = vpop.f32.mrb[212].mxu0  ;;  %v8199_v9 = vmax.bf16 %v11994_v10, %v8167_v19 }
 0x9b5   : > { %v7571_v7 = vpop.f32.mrb[213].mxu0 }
 0x9b6   : > { %v7573_v11 = vpop.f32.mrb[214].mxu0  ;;  %8266 = vmatprep.subr.bf16.mxu1 %v8199_v9 }
 0x9b7   : > { %v7624_v41 = vpack.c.bf16 %v7573_v11, %v7569_v35  ;;  %v7575_v62 = vpop.f32.mrb[215].mxu0  ;;  %8267 = vmatpush1.bf16.msra.mxu1 %v8198_v57 }
 0x9b8   : > { %v7625_v14 = vpack.c.bf16 %v7575_v62, %v7571_v7 }
 0x9b9   : > { %v8168_v53 = vadd.bf16 %v8801_v43, %v7624_v41 }
 0x9ba   : > { %v8169_v15 = vadd.bf16 %v8801_v43, %v7625_v14 }
 0x9bb   : > { %v8200_v52 = vmax.bf16 %v11994_v10, %v8168_v53 }
 0x9bc   : > { %v7579_v1 = vpop.f32.mrb[216].mxu0  ;;  %v8201_v63 = vmax.bf16 %v11994_v10, %v8169_v15 }
 0x9bd   : > { %v7581_v36 = vpop.f32.mrb[217].mxu0 }
 0x9be   : > { %v7583_v31 = vpop.f32.mrb[218].mxu0  ;;  %8268 = vmatprep.subr.bf16.mxu1 %v8201_v63 }
 0x9bf   : > { %v7626_v42 = vpack.c.bf16 %v7583_v31, %v7579_v1  ;;  %v7585_v2 = vpop.f32.mrb[219].mxu0  ;;  %8269 = vmatpush1.bf16.msra.mxu1 %v8200_v52 }
 0x9c0   : > { %v7627_v6 = vpack.c.bf16 %v7585_v2, %v7581_v36 }
 0x9c1   : > { %v8170_v4 = vadd.bf16 %v8802_v5, %v7626_v42 }
 0x9c2   : > { %v8171_v22 = vadd.bf16 %v8802_v5, %v7627_v6 }
 0x9c3   : > { %v8202_v29 = vmax.bf16 %v11994_v10, %v8170_v4 }
 0x9c4   : > { %v7589_v56 = vpop.f32.mrb[220].mxu0  ;;  %v8203_v39 = vmax.bf16 %v11994_v10, %v8171_v22 }
 0x9c5   : > { %v7591_v50 = vpop.f32.mrb[221].mxu0 }
 0x9c6   : > { %v7593_v60 = vpop.f32.mrb[222].mxu0  ;;  %8270 = vmatprep.subr.bf16.mxu1 %v8203_v39 }
 0x9c7   : > { %v7628_v0 = vpack.c.bf16 %v7593_v60, %v7589_v56  ;;  %v7595_v45 = vpop.f32.mrb[223].mxu0  ;;  %8271 = vmatpush1.bf16.msra.mxu1 %v8202_v29 }
 0x9c8   : > { %v7629_v24 = vpack.c.bf16 %v7595_v45, %v7591_v50 }
 0x9c9   : > { %v8172_v18 = vadd.bf16 %v8803_v30, %v7628_v0 }
 0x9ca   : > { %v8173_v28 = vadd.bf16 %v8803_v30, %v7629_v24 }
 0x9cb   : > { %v8204_v8 = vmax.bf16 %v11994_v10, %v8172_v18 }
 0x9cc   : > { %v8205_v59 = vmax.bf16 %v11994_v10, %v8173_v28 }
 0x9ce   : > { %8272 = vmatprep.subr.bf16.mxu1 %v8205_v59 }
 0x9cf   : > { %8273 = vmatpush1.bf16.msra.mxu1 %v8204_v8 }
 0x9d2   : > { %8275 = vmatmul.mubr.bf16.vlgmr.msra.gmra.mrb[224].mxu1 %v8232_v49 }
 0xaa5   : > { %v8276_v48 = vpop.f32.mrb[224].mxu1 }
 0xaa6   : > { %v8277_v55 = vadd.f32 %v8276_v48, %v8216_v33  ;;  %v8278_v13 = vpop.f32.mrb[225].mxu1 }
 0xaa7   : > { %v8279_v61 = vadd.f32 %v8278_v13, %v8216_v33  ;;  %v8280_v54 = vpop.f32.mrb[226].mxu1 }
 0xaa8   : > { %v8281_v10 = vpop.f32.mrb[227].mxu1 }
 0xaa9   : > { %v8285_v20 = vcombine.low %v8277_v55, %v8279_v61 }
 0xaab   : > { %v8292_v12 = vrot.slane %v8285_v20, %v11831_v47 }
 0xaad   : > { %v8299_v34 = vrot.slane %v8292_v12, %v11831_v47 }
 0xaaf   : > { %8305 = vst.msk [vmem:[%s708_s30] sm:$0x3] %vm8303_vm0, %v8299_v34 }
 0xab0 PF: > { %p26_p9 = scmp.ge.s32.totalorder %s9406_s29, 4   ;;  %s12087_s26 = smov %s9287_s27 }
 0xab1   : > { %s12088_s27 = smov %s9415_s18  ;;  %s12089_s28 = smov %s9406_s29 }
 0xab2   :  { %28 = sbr.rel (!%p26_p9) target bundleno = 5 (0x5), region = 161 }

</bundles_post_ra>
